<compile_context>
chip_gen: v7x
topology: tpu7x:2x2x1
jax: 0.10.0
libtpu: 0.0.40
codegen_flags: <defaults>
</compile_context>

<pallas_src>
import functools

import jax
import jax.numpy as jnp
from jax.experimental import pallas as pl
from jax.experimental.pallas import tpu as pltpu


def _sigmoid(x):
    return 1.0 / (1.0 + jnp.exp(-x))


# ----------------------------------------------------------------------------
# Fused kernel: embedding output (time-major) -> stacked (bi)LSTM -> dense head
# ----------------------------------------------------------------------------
def fused_lstm_dense_kernel(*refs, T, B, E, H, num_layers, num_dirs):
    """Ref order: x(T,B,E), mask(T,B,1),
                  [wihT(Din,4H), whhT(H,4H), b(1,4H)] * (num_layers*num_dirs),
                  w1T, b1, w2T, b2,  out(B,2),  act_scratch(2*num_dirs*T,B,H)
    Gate order (i, f, g, o) matches PyTorch."""
    n_lstm = num_layers * num_dirs * 3
    x_ref, mask_ref = refs[0], refs[1]
    lstm_refs = refs[2:2 + n_lstm]
    w1T_ref, b1_ref, w2T_ref, b2_ref = refs[2 + n_lstm:6 + n_lstm]
    out_ref = refs[6 + n_lstm]
    act_sc = refs[7 + n_lstm]            # ping-pong layer-output buffer (VMEM)

    # Precomputed per-step validity masks, loaded once per step index.
    masks = [mask_ref[t] for t in range(T)]            # each (B, 1) f32

    def run_direction(xproj, whh, d, layer, write_out):
        """Serial recurrence for one direction (x-projection already hoisted)."""
        reverse = (d == 1)
        xp = xproj.reshape(T, B, 4 * H)
        h = jnp.zeros((B, H), jnp.float32)
        c = jnp.zeros((B, H), jnp.float32)
        dst_base = ((layer % 2) * num_dirs + d) * T
        for s in range(T):                              # fully unrolled, T static
            t = T - 1 - s if reverse else s
            g = xp[t] + jnp.dot(h, whh, preferred_element_type=jnp.float32)
            i_g = _sigmoid(g[:, 0 * H:1 * H])
            f_g = _sigmoid(g[:, 1 * H:2 * H])
            g_g = jnp.tanh(g[:, 2 * H:3 * H])
            o_g = _sigmoid(g[:, 3 * H:4 * H])
            c_new = f_g * c + i_g * g_g
            h_new = o_g * jnp.tanh(c_new)
            m = masks[t]                                # packed-seq masking
            h = m * h_new + (1.0 - m) * h
            c = m * c_new + (1.0 - m) * c
            if write_out:
                act_sc[dst_base + t] = h
        return h

    h_finals = []
    for layer in range(num_layers):
        top = (layer == num_layers - 1)
        if layer == 0:
            x_parts = [x_ref[...].reshape(T * B, E)]
        else:
            src = (layer - 1) % 2
            x_parts = [
                act_sc[pl.ds((src * num_dirs + d) * T, T)].reshape(T * B, H)
                for d in range(num_dirs)
            ]
        h_finals = []
        for d in range(num_dirs):
            base = (layer * num_dirs + d) * 3
            wihT = lstm_refs[base + 0][...]             # (Din, 4H)
            whh = lstm_refs[base + 1][...]              # (H, 4H)
            bias = lstm_refs[base + 2][...]             # (1, 4H)
            # Hoisted input projection for the whole sequence.
            if layer == 0:
                xproj = jnp.dot(x_parts[0], wihT,
                                preferred_element_type=jnp.float32) + bias
            else:
                xproj = jnp.dot(x_parts[0], wihT[0:H, :],
                                preferred_element_type=jnp.float32) + bias
                for k in range(1, num_dirs):
                    xproj = xproj + jnp.dot(
                        x_parts[k], wihT[k * H:(k + 1) * H, :],
                        preferred_element_type=jnp.float32)
            h_finals.append(
                run_direction(xproj, whh, d, layer, write_out=not top))

    if num_dirs == 2:
        # torch.cat([hn[-1], hn[-2]], dim=1) == [backward_top, forward_top]
        encoded = jnp.concatenate([h_finals[1], h_finals[0]], axis=1)
    else:
        encoded = h_finals[0]                           # hn[-1]

    # Dense head fused as the epilogue: Linear -> Tanh -> Linear -> Softmax.
    h1 = jnp.tanh(jnp.dot(encoded, w1T_ref[...],
                          preferred_element_type=jnp.float32) + b1_ref[...])
    logits = jnp.dot(h1, w2T_ref[...],
                     preferred_element_type=jnp.float32) + b2_ref[...]
    mx = jnp.max(logits, axis=-1, keepdims=True)
    e = jnp.exp(logits - mx)
    denom = jnp.sum(e, axis=-1, keepdims=True)
    out_ref[...] = e * pl.reciprocal(denom, approx=True)


# ----------------------------------------------------------------------------
# Wrapper around pallas_call
# ----------------------------------------------------------------------------
def run_fused_model(x_tbd, mask_tb1, lstm_flat, dense_flat, *, num_layers,
                    num_dirs, hidden):
    T, B, E = x_tbd.shape
    H = hidden
    kern = functools.partial(fused_lstm_dense_kernel, T=T, B=B, E=E, H=H,
                             num_layers=num_layers, num_dirs=num_dirs)
    n_in = 2 + len(lstm_flat) + len(dense_flat)
    return pl.pallas_call(
        kern,
        out_shape=jax.ShapeDtypeStruct((B, 2), jnp.float32),
        in_specs=[pl.BlockSpec(memory_space=pltpu.MemorySpace.VMEM)] * n_in,
        out_specs=pl.BlockSpec(memory_space=pltpu.MemorySpace.VMEM),
        scratch_shapes=[pltpu.VMEM((2 * num_dirs * T, B, H), jnp.float32)],
        compiler_params=pltpu.CompilerParams(
            vmem_limit_bytes=32 * 1024 * 1024),
    )(x_tbd, mask_tb1, *lstm_flat, *dense_flat)


# ----------------------------------------------------------------------------
# Model: parameter construction + forward pass
# ----------------------------------------------------------------------------
def init_params(key, vocab_size, emb_dim, hidden, num_layers, bidirectional,
                dense_size):
    num_dirs = 2 if bidirectional else 1
    n_keys = 1 + num_layers * num_dirs * 4 + 4
    keys = iter(jax.random.split(key, n_keys))
    params = {}

    # Embedding (vocab_size + 5 rows, padding_idx=0 -> row 0 zeroed).
    emb = jax.random.normal(next(keys), (vocab_size + 5, emb_dim),
                            jnp.float32) * 0.1
    params['embedding'] = emb.at[0].set(0.0)

    # LSTM weights, PyTorch init style: U(-1/sqrt(H), 1/sqrt(H)).
    k = 1.0 / jnp.sqrt(jnp.float32(hidden))
    lstm = []
    for layer in range(num_layers):
        din = emb_dim if layer == 0 else num_dirs * hidden
        dirs = []
        for _ in range(num_dirs):
            w_ih = jax.random.uniform(next(keys), (4 * hidden, din),
                                      jnp.float32, -k, k)
            w_hh = jax.random.uniform(next(keys), (4 * hidden, hidden),
                                      jnp.float32, -k, k)
            b_ih = jax.random.uniform(next(keys), (4 * hidden,),
                                      jnp.float32, -k, k)
            b_hh = jax.random.uniform(next(keys), (4 * hidden,),
                                      jnp.float32, -k, k)
            dirs.append({'wihT': w_ih.T,
                         'whhT': w_hh.T,
                         'b': (b_ih + b_hh).reshape(1, 4 * hidden)})
        lstm.append(dirs)
    params['lstm'] = lstm

    # Dense head: Linear(enc_dim, dense_size) -> Tanh -> Linear(dense_size, 2)
    enc_dim = num_dirs * hidden
    k1 = 1.0 / jnp.sqrt(jnp.float32(enc_dim))
    k2 = 1.0 / jnp.sqrt(jnp.float32(dense_size))
    params['dense'] = {
        'w1T': jax.random.uniform(next(keys), (enc_dim, dense_size),
                                  jnp.float32, -k1, k1),
        'b1': jax.random.uniform(next(keys), (1, dense_size),
                                 jnp.float32, -k1, k1),
        'w2T': jax.random.uniform(next(keys), (dense_size, 2),
                                  jnp.float32, -k2, k2),
        'b2': jax.random.uniform(next(keys), (1, 2), jnp.float32, -k2, k2),
    }
    return params


def forward(params, char_ids, domain_lens, *, bidirectional):
    num_dirs = 2 if bidirectional else 1
    num_layers = len(params['lstm'])
    hidden = params['lstm'][0][0]['whhT'].shape[0]

    B, T = char_ids.shape
    Bp = ((B + 7) // 8) * 8                      # pad batch to f32 sublane tile
    pad = Bp - B
    if pad:
        char_ids = jnp.pad(char_ids, ((0, pad), (0, 0)))
        domain_lens = jnp.pad(domain_lens, (0, pad))   # len 0 -> fully masked

    # Embedding gather + time-major transpose stay in plain JAX (glue).
    emb = jnp.take(params['embedding'], char_ids, axis=0)   # (Bp, T, E)
    x = jnp.transpose(emb, (1, 0, 2)).astype(jnp.float32)   # (T, Bp, E)

    lens = domain_lens.astype(jnp.int32)
    mask = (jnp.arange(T, dtype=jnp.int32)[:, None]
            < lens[None, :]).astype(jnp.float32)[..., None]  # (T, Bp, 1)

    lstm_flat = []
    for layer in range(num_layers):
        for d in range(num_dirs):
            p = params['lstm'][layer][d]
            lstm_flat.extend([p['wihT'], p['whhT'], p['b']])
    dn = params['dense']
    dense_flat = [dn['w1T'], dn['b1'], dn['w2T'], dn['b2']]

    prob = run_fused_model(x, mask, lstm_flat, dense_flat,
                           num_layers=num_layers, num_dirs=num_dirs,
                           hidden=hidden)
    return prob[:B]


# ----------------------------------------------------------------------------
if __name__ == "__main__":
    # Module hyper-parameters (synthetic, small).
    VOCAB_SIZE = 20
    EMB_DIM = 8
    HIDDEN = 16
    NUM_LAYERS = 2
    BIDIRECTIONAL = True
    DENSE_SIZE = 32

    # Batch: char_ids (B, T) int32 with padding_idx=0, per-sequence lengths.
    B, T = 4, 8
    key = jax.random.PRNGKey(0)
    k_ids, k_params = jax.random.split(key)

    domain_lens = jnp.array([8, 5, 6, 3], dtype=jnp.int32)
    char_ids = jax.random.randint(k_ids, (B, T), 1, VOCAB_SIZE + 5,
                                  dtype=jnp.int32)
    pos = jnp.arange(T)[None, :]
    char_ids = jnp.where(pos < domain_lens[:, None], char_ids, 0)  # pad with 0

    params = init_params(k_params, VOCAB_SIZE, EMB_DIM, HIDDEN, NUM_LAYERS,
                         BIDIRECTIONAL, DENSE_SIZE)

    prob = forward(params, char_ids, domain_lens, bidirectional=BIDIRECTIONAL)
    prob = jax.block_until_ready(prob)

    assert prob.shape == (B, 2)
    assert bool(jnp.all(jnp.isfinite(prob)))
    # approx reciprocal in the softmax denominator -> slightly relaxed tolerance
    assert bool(jnp.allclose(jnp.sum(prob, axis=-1), 1.0, atol=2e-3))
    print("KERNEL_OK")
</pallas_src>

<mosaic_0001>
module attributes {stable_mosaic.version = 11 : i64} {
  func.func @fused_lstm_dense_kernel(%arg0: memref<8x8x8xf32, #tpu.memory_space<vmem>>, %arg1: memref<8x8x1xf32, #tpu.memory_space<vmem>>, %arg2: memref<8x64xf32, #tpu.memory_space<vmem>>, %arg3: memref<16x64xf32, #tpu.memory_space<vmem>>, %arg4: memref<1x64xf32, #tpu.memory_space<vmem>>, %arg5: memref<8x64xf32, #tpu.memory_space<vmem>>, %arg6: memref<16x64xf32, #tpu.memory_space<vmem>>, %arg7: memref<1x64xf32, #tpu.memory_space<vmem>>, %arg8: memref<32x64xf32, #tpu.memory_space<vmem>>, %arg9: memref<16x64xf32, #tpu.memory_space<vmem>>, %arg10: memref<1x64xf32, #tpu.memory_space<vmem>>, %arg11: memref<32x64xf32, #tpu.memory_space<vmem>>, %arg12: memref<16x64xf32, #tpu.memory_space<vmem>>, %arg13: memref<1x64xf32, #tpu.memory_space<vmem>>, %arg14: memref<32x32xf32, #tpu.memory_space<vmem>>, %arg15: memref<1x32xf32, #tpu.memory_space<vmem>>, %arg16: memref<32x2xf32, #tpu.memory_space<vmem>>, %arg17: memref<1x2xf32, #tpu.memory_space<vmem>>, %arg18: memref<8x2xf32, #tpu.memory_space<vmem>>, %arg19: memref<32x8x16xf32, #tpu.memory_space<vmem>>) attributes {dimension_semantics = [], scalar_prefetch = 0 : i64, scratch_operands = 1 : i64, tpu.core_type = #tpu.core_type<tc>} {
    %c0 = arith.constant 0 : index
    %c0_0 = arith.constant 0 : index
    %c0_1 = arith.constant 0 : index
    %0 = vector.load %arg1[%c0, %c0_0, %c0_1] : memref<8x8x1xf32, #tpu.memory_space<vmem>>, vector<1x8x1xf32>
    %1 = vector.shape_cast %0 : vector<1x8x1xf32> to vector<8x1xf32>
    %c1 = arith.constant 1 : index
    %c0_2 = arith.constant 0 : index
    %c0_3 = arith.constant 0 : index
    %2 = vector.load %arg1[%c1, %c0_2, %c0_3] : memref<8x8x1xf32, #tpu.memory_space<vmem>>, vector<1x8x1xf32>
    %3 = vector.shape_cast %2 : vector<1x8x1xf32> to vector<8x1xf32>
    %c2 = arith.constant 2 : index
    %c0_4 = arith.constant 0 : index
    %c0_5 = arith.constant 0 : index
    %4 = vector.load %arg1[%c2, %c0_4, %c0_5] : memref<8x8x1xf32, #tpu.memory_space<vmem>>, vector<1x8x1xf32>
    %5 = vector.shape_cast %4 : vector<1x8x1xf32> to vector<8x1xf32>
    %c3 = arith.constant 3 : index
    %c0_6 = arith.constant 0 : index
    %c0_7 = arith.constant 0 : index
    %6 = vector.load %arg1[%c3, %c0_6, %c0_7] : memref<8x8x1xf32, #tpu.memory_space<vmem>>, vector<1x8x1xf32>
    %7 = vector.shape_cast %6 : vector<1x8x1xf32> to vector<8x1xf32>
    %c4 = arith.constant 4 : index
    %c0_8 = arith.constant 0 : index
    %c0_9 = arith.constant 0 : index
    %8 = vector.load %arg1[%c4, %c0_8, %c0_9] : memref<8x8x1xf32, #tpu.memory_space<vmem>>, vector<1x8x1xf32>
    %9 = vector.shape_cast %8 : vector<1x8x1xf32> to vector<8x1xf32>
    %c5 = arith.constant 5 : index
    %c0_10 = arith.constant 0 : index
    %c0_11 = arith.constant 0 : index
    %10 = vector.load %arg1[%c5, %c0_10, %c0_11] : memref<8x8x1xf32, #tpu.memory_space<vmem>>, vector<1x8x1xf32>
    %11 = vector.shape_cast %10 : vector<1x8x1xf32> to vector<8x1xf32>
    %c6 = arith.constant 6 : index
    %c0_12 = arith.constant 0 : index
    %c0_13 = arith.constant 0 : index
    %12 = vector.load %arg1[%c6, %c0_12, %c0_13] : memref<8x8x1xf32, #tpu.memory_space<vmem>>, vector<1x8x1xf32>
    %13 = vector.shape_cast %12 : vector<1x8x1xf32> to vector<8x1xf32>
    %c7 = arith.constant 7 : index
    %c0_14 = arith.constant 0 : index
    %c0_15 = arith.constant 0 : index
    %14 = vector.load %arg1[%c7, %c0_14, %c0_15] : memref<8x8x1xf32, #tpu.memory_space<vmem>>, vector<1x8x1xf32>
    %15 = vector.shape_cast %14 : vector<1x8x1xf32> to vector<8x1xf32>
    %c0_16 = arith.constant 0 : index
    %c0_17 = arith.constant 0 : index
    %c0_18 = arith.constant 0 : index
    %16 = vector.load %arg0[%c0_16, %c0_17, %c0_18] : memref<8x8x8xf32, #tpu.memory_space<vmem>>, vector<8x8x8xf32>
    %17 = vector.shape_cast %16 : vector<8x8x8xf32> to vector<64x8xf32>
    %c0_19 = arith.constant 0 : index
    %c0_20 = arith.constant 0 : index
    %18 = vector.load %arg2[%c0_19, %c0_20] : memref<8x64xf32, #tpu.memory_space<vmem>>, vector<8x64xf32>
    %c0_21 = arith.constant 0 : index
    %c0_22 = arith.constant 0 : index
    %19 = vector.load %arg3[%c0_21, %c0_22] : memref<16x64xf32, #tpu.memory_space<vmem>>, vector<16x64xf32>
    %c0_23 = arith.constant 0 : index
    %c0_24 = arith.constant 0 : index
    %20 = vector.load %arg4[%c0_23, %c0_24] : memref<1x64xf32, #tpu.memory_space<vmem>>, vector<1x64xf32>
    %cst = arith.constant dense<0.000000e+00> : vector<64x64xf32>
    %21 = tpu.matmul %17, %18, %cst {dimension_numbers = #tpu.dot_dimension_numbers<[1], [0], [0], [1], [0, 0, 1, 1], [], []>} : vector<64x8xf32>, vector<8x64xf32>, vector<64x64xf32> -> vector<64x64xf32>
    %22 = vector.broadcast %20 : vector<1x64xf32> to vector<64x64xf32>
    %23 = arith.addf %21, %22 : vector<64x64xf32>
    %24 = vector.shape_cast %23 : vector<64x64xf32> to vector<8x8x64xf32>
    %cst_25 = arith.constant 0.000000e+00 : f32
    %25 = vector.broadcast %cst_25 : f32 to vector<8x16xf32>
    %cst_26 = arith.constant 0.000000e+00 : f32
    %26 = vector.broadcast %cst_26 : f32 to vector<8x16xf32>
    %27 = vector.extract_strided_slice %24 {offsets = [0, 0, 0], sizes = [1, 8, 64], strides = [1, 1, 1]} : vector<8x8x64xf32> to vector<1x8x64xf32>
    %28 = vector.shape_cast %27 : vector<1x8x64xf32> to vector<8x64xf32>
    %cst_27 = arith.constant dense<0.000000e+00> : vector<8x64xf32>
    %29 = tpu.matmul %25, %19, %cst_27 {dimension_numbers = #tpu.dot_dimension_numbers<[1], [0], [0], [1], [0, 0, 1, 1], [], []>} : vector<8x16xf32>, vector<16x64xf32>, vector<8x64xf32> -> vector<8x64xf32>
    %30 = arith.addf %28, %29 : vector<8x64xf32>
    %31 = vector.extract_strided_slice %30 {offsets = [0, 0], sizes = [8, 16], strides = [1, 1]} : vector<8x64xf32> to vector<8x16xf32>
    %cst_28 = arith.constant 0.000000e+00 : f32
    %32 = vector.broadcast %cst_28 : f32 to vector<8x16xf32>
    %33 = arith.subf %32, %31 : vector<8x16xf32>
    %34 = math.exp %33 : vector<8x16xf32>
    %cst_29 = arith.constant 1.000000e+00 : f32
    %35 = vector.broadcast %cst_29 : f32 to vector<8x16xf32>
    %36 = arith.addf %35, %34 : vector<8x16xf32>
    %cst_30 = arith.constant 1.000000e+00 : f32
    %37 = vector.broadcast %cst_30 : f32 to vector<8x16xf32>
    %38 = arith.divf %37, %36 : vector<8x16xf32>
    %39 = vector.extract_strided_slice %30 {offsets = [0, 16], sizes = [8, 16], strides = [1, 1]} : vector<8x64xf32> to vector<8x16xf32>
    %cst_31 = arith.constant 0.000000e+00 : f32
    %40 = vector.broadcast %cst_31 : f32 to vector<8x16xf32>
    %41 = arith.subf %40, %39 : vector<8x16xf32>
    %42 = math.exp %41 : vector<8x16xf32>
    %cst_32 = arith.constant 1.000000e+00 : f32
    %43 = vector.broadcast %cst_32 : f32 to vector<8x16xf32>
    %44 = arith.addf %43, %42 : vector<8x16xf32>
    %cst_33 = arith.constant 1.000000e+00 : f32
    %45 = vector.broadcast %cst_33 : f32 to vector<8x16xf32>
    %46 = arith.divf %45, %44 : vector<8x16xf32>
    %47 = vector.extract_strided_slice %30 {offsets = [0, 32], sizes = [8, 16], strides = [1, 1]} : vector<8x64xf32> to vector<8x16xf32>
    %48 = math.tanh %47 : vector<8x16xf32>
    %49 = vector.extract_strided_slice %30 {offsets = [0, 48], sizes = [8, 16], strides = [1, 1]} : vector<8x64xf32> to vector<8x16xf32>
    %cst_34 = arith.constant 0.000000e+00 : f32
    %50 = vector.broadcast %cst_34 : f32 to vector<8x16xf32>
    %51 = arith.subf %50, %49 : vector<8x16xf32>
    %52 = math.exp %51 : vector<8x16xf32>
    %cst_35 = arith.constant 1.000000e+00 : f32
    %53 = vector.broadcast %cst_35 : f32 to vector<8x16xf32>
    %54 = arith.addf %53, %52 : vector<8x16xf32>
    %cst_36 = arith.constant 1.000000e+00 : f32
    %55 = vector.broadcast %cst_36 : f32 to vector<8x16xf32>
    %56 = arith.divf %55, %54 : vector<8x16xf32>
    %57 = arith.mulf %46, %26 : vector<8x16xf32>
    %58 = arith.mulf %38, %48 : vector<8x16xf32>
    %59 = arith.addf %57, %58 : vector<8x16xf32>
    %60 = math.tanh %59 : vector<8x16xf32>
    %61 = arith.mulf %56, %60 : vector<8x16xf32>
    %62 = vector.broadcast %1 : vector<8x1xf32> to vector<8x16xf32>
    %63 = arith.mulf %62, %61 : vector<8x16xf32>
    %cst_37 = arith.constant 1.000000e+00 : f32
    %64 = vector.broadcast %cst_37 : f32 to vector<8x1xf32>
    %65 = arith.subf %64, %1 : vector<8x1xf32>
    %66 = vector.broadcast %65 : vector<8x1xf32> to vector<8x16xf32>
    %67 = arith.mulf %66, %25 : vector<8x16xf32>
    %68 = arith.addf %63, %67 : vector<8x16xf32>
    %69 = vector.broadcast %1 : vector<8x1xf32> to vector<8x16xf32>
    %70 = arith.mulf %69, %59 : vector<8x16xf32>
    %cst_38 = arith.constant 1.000000e+00 : f32
    %71 = vector.broadcast %cst_38 : f32 to vector<8x1xf32>
    %72 = arith.subf %71, %1 : vector<8x1xf32>
    %73 = vector.broadcast %72 : vector<8x1xf32> to vector<8x16xf32>
    %74 = arith.mulf %73, %26 : vector<8x16xf32>
    %75 = arith.addf %70, %74 : vector<8x16xf32>
    %c0_39 = arith.constant 0 : index
    %c0_40 = arith.constant 0 : index
    %c0_41 = arith.constant 0 : index
    %76 = vector.load %arg19[%c0_39, %c0_40, %c0_41] : memref<32x8x16xf32, #tpu.memory_space<vmem>>, vector<1x8x16xf32>
    %77 = vector.shape_cast %76 : vector<1x8x16xf32> to vector<8x16xf32>
    %78 = vector.shape_cast %68 : vector<8x16xf32> to vector<1x8x16xf32>
    tpu.vector_store %arg19[%c0_39, %c0_40, %c0_41], %78 {strides = array<i32>} : memref<32x8x16xf32, #tpu.memory_space<vmem>>, vector<1x8x16xf32>,
    %79 = vector.extract_strided_slice %24 {offsets = [1, 0, 0], sizes = [1, 8, 64], strides = [1, 1, 1]} : vector<8x8x64xf32> to vector<1x8x64xf32>
    %80 = vector.shape_cast %79 : vector<1x8x64xf32> to vector<8x64xf32>
    %cst_42 = arith.constant dense<0.000000e+00> : vector<8x64xf32>
    %81 = tpu.matmul %68, %19, %cst_42 {dimension_numbers = #tpu.dot_dimension_numbers<[1], [0], [0], [1], [0, 0, 1, 1], [], []>} : vector<8x16xf32>, vector<16x64xf32>, vector<8x64xf32> -> vector<8x64xf32>
    %82 = arith.addf %80, %81 : vector<8x64xf32>
    %83 = vector.extract_strided_slice %82 {offsets = [0, 0], sizes = [8, 16], strides = [1, 1]} : vector<8x64xf32> to vector<8x16xf32>
    %cst_43 = arith.constant 0.000000e+00 : f32
    %84 = vector.broadcast %cst_43 : f32 to vector<8x16xf32>
    %85 = arith.subf %84, %83 : vector<8x16xf32>
    %86 = math.exp %85 : vector<8x16xf32>
    %cst_44 = arith.constant 1.000000e+00 : f32
    %87 = vector.broadcast %cst_44 : f32 to vector<8x16xf32>
    %88 = arith.addf %87, %86 : vector<8x16xf32>
    %cst_45 = arith.constant 1.000000e+00 : f32
    %89 = vector.broadcast %cst_45 : f32 to vector<8x16xf32>
    %90 = arith.divf %89, %88 : vector<8x16xf32>
    %91 = vector.extract_strided_slice %82 {offsets = [0, 16], sizes = [8, 16], strides = [1, 1]} : vector<8x64xf32> to vector<8x16xf32>
    %cst_46 = arith.constant 0.000000e+00 : f32
    %92 = vector.broadcast %cst_46 : f32 to vector<8x16xf32>
    %93 = arith.subf %92, %91 : vector<8x16xf32>
    %94 = math.exp %93 : vector<8x16xf32>
    %cst_47 = arith.constant 1.000000e+00 : f32
    %95 = vector.broadcast %cst_47 : f32 to vector<8x16xf32>
    %96 = arith.addf %95, %94 : vector<8x16xf32>
    %cst_48 = arith.constant 1.000000e+00 : f32
    %97 = vector.broadcast %cst_48 : f32 to vector<8x16xf32>
    %98 = arith.divf %97, %96 : vector<8x16xf32>
    %99 = vector.extract_strided_slice %82 {offsets = [0, 32], sizes = [8, 16], strides = [1, 1]} : vector<8x64xf32> to vector<8x16xf32>
    %100 = math.tanh %99 : vector<8x16xf32>
    %101 = vector.extract_strided_slice %82 {offsets = [0, 48], sizes = [8, 16], strides = [1, 1]} : vector<8x64xf32> to vector<8x16xf32>
    %cst_49 = arith.constant 0.000000e+00 : f32
    %102 = vector.broadcast %cst_49 : f32 to vector<8x16xf32>
    %103 = arith.subf %102, %101 : vector<8x16xf32>
    %104 = math.exp %103 : vector<8x16xf32>
    %cst_50 = arith.constant 1.000000e+00 : f32
    %105 = vector.broadcast %cst_50 : f32 to vector<8x16xf32>
    %106 = arith.addf %105, %104 : vector<8x16xf32>
    %cst_51 = arith.constant 1.000000e+00 : f32
    %107 = vector.broadcast %cst_51 : f32 to vector<8x16xf32>
    %108 = arith.divf %107, %106 : vector<8x16xf32>
    %109 = arith.mulf %98, %75 : vector<8x16xf32>
    %110 = arith.mulf %90, %100 : vector<8x16xf32>
    %111 = arith.addf %109, %110 : vector<8x16xf32>
    %112 = math.tanh %111 : vector<8x16xf32>
    %113 = arith.mulf %108, %112 : vector<8x16xf32>
    %114 = vector.broadcast %3 : vector<8x1xf32> to vector<8x16xf32>
    %115 = arith.mulf %114, %113 : vector<8x16xf32>
    %cst_52 = arith.constant 1.000000e+00 : f32
    %116 = vector.broadcast %cst_52 : f32 to vector<8x1xf32>
    %117 = arith.subf %116, %3 : vector<8x1xf32>
    %118 = vector.broadcast %117 : vector<8x1xf32> to vector<8x16xf32>
    %119 = arith.mulf %118, %68 : vector<8x16xf32>
    %120 = arith.addf %115, %119 : vector<8x16xf32>
    %121 = vector.broadcast %3 : vector<8x1xf32> to vector<8x16xf32>
    %122 = arith.mulf %121, %111 : vector<8x16xf32>
    %cst_53 = arith.constant 1.000000e+00 : f32
    %123 = vector.broadcast %cst_53 : f32 to vector<8x1xf32>
    %124 = arith.subf %123, %3 : vector<8x1xf32>
    %125 = vector.broadcast %124 : vector<8x1xf32> to vector<8x16xf32>
    %126 = arith.mulf %125, %75 : vector<8x16xf32>
    %127 = arith.addf %122, %126 : vector<8x16xf32>
    %c1_54 = arith.constant 1 : index
    %c0_55 = arith.constant 0 : index
    %c0_56 = arith.constant 0 : index
    %128 = vector.load %arg19[%c1_54, %c0_55, %c0_56] : memref<32x8x16xf32, #tpu.memory_space<vmem>>, vector<1x8x16xf32>
    %129 = vector.shape_cast %128 : vector<1x8x16xf32> to vector<8x16xf32>
    %130 = vector.shape_cast %120 : vector<8x16xf32> to vector<1x8x16xf32>
    tpu.vector_store %arg19[%c1_54, %c0_55, %c0_56], %130 {strides = array<i32>} : memref<32x8x16xf32, #tpu.memory_space<vmem>>, vector<1x8x16xf32>,
    %131 = vector.extract_strided_slice %24 {offsets = [2, 0, 0], sizes = [1, 8, 64], strides = [1, 1, 1]} : vector<8x8x64xf32> to vector<1x8x64xf32>
    %132 = vector.shape_cast %131 : vector<1x8x64xf32> to vector<8x64xf32>
    %cst_57 = arith.constant dense<0.000000e+00> : vector<8x64xf32>
    %133 = tpu.matmul %120, %19, %cst_57 {dimension_numbers = #tpu.dot_dimension_numbers<[1], [0], [0], [1], [0, 0, 1, 1], [], []>} : vector<8x16xf32>, vector<16x64xf32>, vector<8x64xf32> -> vector<8x64xf32>
    %134 = arith.addf %132, %133 : vector<8x64xf32>
    %135 = vector.extract_strided_slice %134 {offsets = [0, 0], sizes = [8, 16], strides = [1, 1]} : vector<8x64xf32> to vector<8x16xf32>
    %cst_58 = arith.constant 0.000000e+00 : f32
    %136 = vector.broadcast %cst_58 : f32 to vector<8x16xf32>
    %137 = arith.subf %136, %135 : vector<8x16xf32>
    %138 = math.exp %137 : vector<8x16xf32>
    %cst_59 = arith.constant 1.000000e+00 : f32
    %139 = vector.broadcast %cst_59 : f32 to vector<8x16xf32>
    %140 = arith.addf %139, %138 : vector<8x16xf32>
    %cst_60 = arith.constant 1.000000e+00 : f32
    %141 = vector.broadcast %cst_60 : f32 to vector<8x16xf32>
    %142 = arith.divf %141, %140 : vector<8x16xf32>
    %143 = vector.extract_strided_slice %134 {offsets = [0, 16], sizes = [8, 16], strides = [1, 1]} : vector<8x64xf32> to vector<8x16xf32>
    %cst_61 = arith.constant 0.000000e+00 : f32
    %144 = vector.broadcast %cst_61 : f32 to vector<8x16xf32>
    %145 = arith.subf %144, %143 : vector<8x16xf32>
    %146 = math.exp %145 : vector<8x16xf32>
    %cst_62 = arith.constant 1.000000e+00 : f32
    %147 = vector.broadcast %cst_62 : f32 to vector<8x16xf32>
    %148 = arith.addf %147, %146 : vector<8x16xf32>
    %cst_63 = arith.constant 1.000000e+00 : f32
    %149 = vector.broadcast %cst_63 : f32 to vector<8x16xf32>
    %150 = arith.divf %149, %148 : vector<8x16xf32>
    %151 = vector.extract_strided_slice %134 {offsets = [0, 32], sizes = [8, 16], strides = [1, 1]} : vector<8x64xf32> to vector<8x16xf32>
    %152 = math.tanh %151 : vector<8x16xf32>
    %153 = vector.extract_strided_slice %134 {offsets = [0, 48], sizes = [8, 16], strides = [1, 1]} : vector<8x64xf32> to vector<8x16xf32>
    %cst_64 = arith.constant 0.000000e+00 : f32
    %154 = vector.broadcast %cst_64 : f32 to vector<8x16xf32>
    %155 = arith.subf %154, %153 : vector<8x16xf32>
    %156 = math.exp %155 : vector<8x16xf32>
    %cst_65 = arith.constant 1.000000e+00 : f32
    %157 = vector.broadcast %cst_65 : f32 to vector<8x16xf32>
    %158 = arith.addf %157, %156 : vector<8x16xf32>
    %cst_66 = arith.constant 1.000000e+00 : f32
    %159 = vector.broadcast %cst_66 : f32 to vector<8x16xf32>
    %160 = arith.divf %159, %158 : vector<8x16xf32>
    %161 = arith.mulf %150, %127 : vector<8x16xf32>
    %162 = arith.mulf %142, %152 : vector<8x16xf32>
    %163 = arith.addf %161, %162 : vector<8x16xf32>
    %164 = math.tanh %163 : vector<8x16xf32>
    %165 = arith.mulf %160, %164 : vector<8x16xf32>
    %166 = vector.broadcast %5 : vector<8x1xf32> to vector<8x16xf32>
    %167 = arith.mulf %166, %165 : vector<8x16xf32>
    %cst_67 = arith.constant 1.000000e+00 : f32
    %168 = vector.broadcast %cst_67 : f32 to vector<8x1xf32>
    %169 = arith.subf %168, %5 : vector<8x1xf32>
    %170 = vector.broadcast %169 : vector<8x1xf32> to vector<8x16xf32>
    %171 = arith.mulf %170, %120 : vector<8x16xf32>
    %172 = arith.addf %167, %171 : vector<8x16xf32>
    %173 = vector.broadcast %5 : vector<8x1xf32> to vector<8x16xf32>
    %174 = arith.mulf %173, %163 : vector<8x16xf32>
    %cst_68 = arith.constant 1.000000e+00 : f32
    %175 = vector.broadcast %cst_68 : f32 to vector<8x1xf32>
    %176 = arith.subf %175, %5 : vector<8x1xf32>
    %177 = vector.broadcast %176 : vector<8x1xf32> to vector<8x16xf32>
    %178 = arith.mulf %177, %127 : vector<8x16xf32>
    %179 = arith.addf %174, %178 : vector<8x16xf32>
    %c2_69 = arith.constant 2 : index
    %c0_70 = arith.constant 0 : index
    %c0_71 = arith.constant 0 : index
    %180 = vector.load %arg19[%c2_69, %c0_70, %c0_71] : memref<32x8x16xf32, #tpu.memory_space<vmem>>, vector<1x8x16xf32>
    %181 = vector.shape_cast %180 : vector<1x8x16xf32> to vector<8x16xf32>
    %182 = vector.shape_cast %172 : vector<8x16xf32> to vector<1x8x16xf32>
    tpu.vector_store %arg19[%c2_69, %c0_70, %c0_71], %182 {strides = array<i32>} : memref<32x8x16xf32, #tpu.memory_space<vmem>>, vector<1x8x16xf32>,
    %183 = vector.extract_strided_slice %24 {offsets = [3, 0, 0], sizes = [1, 8, 64], strides = [1, 1, 1]} : vector<8x8x64xf32> to vector<1x8x64xf32>
    %184 = vector.shape_cast %183 : vector<1x8x64xf32> to vector<8x64xf32>
    %cst_72 = arith.constant dense<0.000000e+00> : vector<8x64xf32>
    %185 = tpu.matmul %172, %19, %cst_72 {dimension_numbers = #tpu.dot_dimension_numbers<[1], [0], [0], [1], [0, 0, 1, 1], [], []>} : vector<8x16xf32>, vector<16x64xf32>, vector<8x64xf32> -> vector<8x64xf32>
    %186 = arith.addf %184, %185 : vector<8x64xf32>
    %187 = vector.extract_strided_slice %186 {offsets = [0, 0], sizes = [8, 16], strides = [1, 1]} : vector<8x64xf32> to vector<8x16xf32>
    %cst_73 = arith.constant 0.000000e+00 : f32
    %188 = vector.broadcast %cst_73 : f32 to vector<8x16xf32>
    %189 = arith.subf %188, %187 : vector<8x16xf32>
    %190 = math.exp %189 : vector<8x16xf32>
    %cst_74 = arith.constant 1.000000e+00 : f32
    %191 = vector.broadcast %cst_74 : f32 to vector<8x16xf32>
    %192 = arith.addf %191, %190 : vector<8x16xf32>
    %cst_75 = arith.constant 1.000000e+00 : f32
    %193 = vector.broadcast %cst_75 : f32 to vector<8x16xf32>
    %194 = arith.divf %193, %192 : vector<8x16xf32>
    %195 = vector.extract_strided_slice %186 {offsets = [0, 16], sizes = [8, 16], strides = [1, 1]} : vector<8x64xf32> to vector<8x16xf32>
    %cst_76 = arith.constant 0.000000e+00 : f32
    %196 = vector.broadcast %cst_76 : f32 to vector<8x16xf32>
    %197 = arith.subf %196, %195 : vector<8x16xf32>
    %198 = math.exp %197 : vector<8x16xf32>
    %cst_77 = arith.constant 1.000000e+00 : f32
    %199 = vector.broadcast %cst_77 : f32 to vector<8x16xf32>
    %200 = arith.addf %199, %198 : vector<8x16xf32>
    %cst_78 = arith.constant 1.000000e+00 : f32
    %201 = vector.broadcast %cst_78 : f32 to vector<8x16xf32>
    %202 = arith.divf %201, %200 : vector<8x16xf32>
    %203 = vector.extract_strided_slice %186 {offsets = [0, 32], sizes = [8, 16], strides = [1, 1]} : vector<8x64xf32> to vector<8x16xf32>
    %204 = math.tanh %203 : vector<8x16xf32>
    %205 = vector.extract_strided_slice %186 {offsets = [0, 48], sizes = [8, 16], strides = [1, 1]} : vector<8x64xf32> to vector<8x16xf32>
    %cst_79 = arith.constant 0.000000e+00 : f32
    %206 = vector.broadcast %cst_79 : f32 to vector<8x16xf32>
    %207 = arith.subf %206, %205 : vector<8x16xf32>
    %208 = math.exp %207 : vector<8x16xf32>
    %cst_80 = arith.constant 1.000000e+00 : f32
    %209 = vector.broadcast %cst_80 : f32 to vector<8x16xf32>
    %210 = arith.addf %209, %208 : vector<8x16xf32>
    %cst_81 = arith.constant 1.000000e+00 : f32
    %211 = vector.broadcast %cst_81 : f32 to vector<8x16xf32>
    %212 = arith.divf %211, %210 : vector<8x16xf32>
    %213 = arith.mulf %202, %179 : vector<8x16xf32>
    %214 = arith.mulf %194, %204 : vector<8x16xf32>
    %215 = arith.addf %213, %214 : vector<8x16xf32>
    %216 = math.tanh %215 : vector<8x16xf32>
    %217 = arith.mulf %212, %216 : vector<8x16xf32>
    %218 = vector.broadcast %7 : vector<8x1xf32> to vector<8x16xf32>
    %219 = arith.mulf %218, %217 : vector<8x16xf32>
    %cst_82 = arith.constant 1.000000e+00 : f32
    %220 = vector.broadcast %cst_82 : f32 to vector<8x1xf32>
    %221 = arith.subf %220, %7 : vector<8x1xf32>
    %222 = vector.broadcast %221 : vector<8x1xf32> to vector<8x16xf32>
    %223 = arith.mulf %222, %172 : vector<8x16xf32>
    %224 = arith.addf %219, %223 : vector<8x16xf32>
    %225 = vector.broadcast %7 : vector<8x1xf32> to vector<8x16xf32>
    %226 = arith.mulf %225, %215 : vector<8x16xf32>
    %cst_83 = arith.constant 1.000000e+00 : f32
    %227 = vector.broadcast %cst_83 : f32 to vector<8x1xf32>
    %228 = arith.subf %227, %7 : vector<8x1xf32>
    %229 = vector.broadcast %228 : vector<8x1xf32> to vector<8x16xf32>
    %230 = arith.mulf %229, %179 : vector<8x16xf32>
    %231 = arith.addf %226, %230 : vector<8x16xf32>
    %c3_84 = arith.constant 3 : index
    %c0_85 = arith.constant 0 : index
    %c0_86 = arith.constant 0 : index
    %232 = vector.load %arg19[%c3_84, %c0_85, %c0_86] : memref<32x8x16xf32, #tpu.memory_space<vmem>>, vector<1x8x16xf32>
    %233 = vector.shape_cast %232 : vector<1x8x16xf32> to vector<8x16xf32>
    %234 = vector.shape_cast %224 : vector<8x16xf32> to vector<1x8x16xf32>
    tpu.vector_store %arg19[%c3_84, %c0_85, %c0_86], %234 {strides = array<i32>} : memref<32x8x16xf32, #tpu.memory_space<vmem>>, vector<1x8x16xf32>,
    %235 = vector.extract_strided_slice %24 {offsets = [4, 0, 0], sizes = [1, 8, 64], strides = [1, 1, 1]} : vector<8x8x64xf32> to vector<1x8x64xf32>
    %236 = vector.shape_cast %235 : vector<1x8x64xf32> to vector<8x64xf32>
    %cst_87 = arith.constant dense<0.000000e+00> : vector<8x64xf32>
    %237 = tpu.matmul %224, %19, %cst_87 {dimension_numbers = #tpu.dot_dimension_numbers<[1], [0], [0], [1], [0, 0, 1, 1], [], []>} : vector<8x16xf32>, vector<16x64xf32>, vector<8x64xf32> -> vector<8x64xf32>
    %238 = arith.addf %236, %237 : vector<8x64xf32>
    %239 = vector.extract_strided_slice %238 {offsets = [0, 0], sizes = [8, 16], strides = [1, 1]} : vector<8x64xf32> to vector<8x16xf32>
    %cst_88 = arith.constant 0.000000e+00 : f32
    %240 = vector.broadcast %cst_88 : f32 to vector<8x16xf32>
    %241 = arith.subf %240, %239 : vector<8x16xf32>
    %242 = math.exp %241 : vector<8x16xf32>
    %cst_89 = arith.constant 1.000000e+00 : f32
    %243 = vector.broadcast %cst_89 : f32 to vector<8x16xf32>
    %244 = arith.addf %243, %242 : vector<8x16xf32>
    %cst_90 = arith.constant 1.000000e+00 : f32
    %245 = vector.broadcast %cst_90 : f32 to vector<8x16xf32>
    %246 = arith.divf %245, %244 : vector<8x16xf32>
    %247 = vector.extract_strided_slice %238 {offsets = [0, 16], sizes = [8, 16], strides = [1, 1]} : vector<8x64xf32> to vector<8x16xf32>
    %cst_91 = arith.constant 0.000000e+00 : f32
    %248 = vector.broadcast %cst_91 : f32 to vector<8x16xf32>
    %249 = arith.subf %248, %247 : vector<8x16xf32>
    %250 = math.exp %249 : vector<8x16xf32>
    %cst_92 = arith.constant 1.000000e+00 : f32
    %251 = vector.broadcast %cst_92 : f32 to vector<8x16xf32>
    %252 = arith.addf %251, %250 : vector<8x16xf32>
    %cst_93 = arith.constant 1.000000e+00 : f32
    %253 = vector.broadcast %cst_93 : f32 to vector<8x16xf32>
    %254 = arith.divf %253, %252 : vector<8x16xf32>
    %255 = vector.extract_strided_slice %238 {offsets = [0, 32], sizes = [8, 16], strides = [1, 1]} : vector<8x64xf32> to vector<8x16xf32>
    %256 = math.tanh %255 : vector<8x16xf32>
    %257 = vector.extract_strided_slice %238 {offsets = [0, 48], sizes = [8, 16], strides = [1, 1]} : vector<8x64xf32> to vector<8x16xf32>
    %cst_94 = arith.constant 0.000000e+00 : f32
    %258 = vector.broadcast %cst_94 : f32 to vector<8x16xf32>
    %259 = arith.subf %258, %257 : vector<8x16xf32>
    %260 = math.exp %259 : vector<8x16xf32>
    %cst_95 = arith.constant 1.000000e+00 : f32
    %261 = vector.broadcast %cst_95 : f32 to vector<8x16xf32>
    %262 = arith.addf %261, %260 : vector<8x16xf32>
    %cst_96 = arith.constant 1.000000e+00 : f32
    %263 = vector.broadcast %cst_96 : f32 to vector<8x16xf32>
    %264 = arith.divf %263, %262 : vector<8x16xf32>
    %265 = arith.mulf %254, %231 : vector<8x16xf32>
    %266 = arith.mulf %246, %256 : vector<8x16xf32>
    %267 = arith.addf %265, %266 : vector<8x16xf32>
    %268 = math.tanh %267 : vector<8x16xf32>
    %269 = arith.mulf %264, %268 : vector<8x16xf32>
    %270 = vector.broadcast %9 : vector<8x1xf32> to vector<8x16xf32>
    %271 = arith.mulf %270, %269 : vector<8x16xf32>
    %cst_97 = arith.constant 1.000000e+00 : f32
    %272 = vector.broadcast %cst_97 : f32 to vector<8x1xf32>
    %273 = arith.subf %272, %9 : vector<8x1xf32>
    %274 = vector.broadcast %273 : vector<8x1xf32> to vector<8x16xf32>
    %275 = arith.mulf %274, %224 : vector<8x16xf32>
    %276 = arith.addf %271, %275 : vector<8x16xf32>
    %277 = vector.broadcast %9 : vector<8x1xf32> to vector<8x16xf32>
    %278 = arith.mulf %277, %267 : vector<8x16xf32>
    %cst_98 = arith.constant 1.000000e+00 : f32
    %279 = vector.broadcast %cst_98 : f32 to vector<8x1xf32>
    %280 = arith.subf %279, %9 : vector<8x1xf32>
    %281 = vector.broadcast %280 : vector<8x1xf32> to vector<8x16xf32>
    %282 = arith.mulf %281, %231 : vector<8x16xf32>
    %283 = arith.addf %278, %282 : vector<8x16xf32>
    %c4_99 = arith.constant 4 : index
    %c0_100 = arith.constant 0 : index
    %c0_101 = arith.constant 0 : index
    %284 = vector.load %arg19[%c4_99, %c0_100, %c0_101] : memref<32x8x16xf32, #tpu.memory_space<vmem>>, vector<1x8x16xf32>
    %285 = vector.shape_cast %284 : vector<1x8x16xf32> to vector<8x16xf32>
    %286 = vector.shape_cast %276 : vector<8x16xf32> to vector<1x8x16xf32>
    tpu.vector_store %arg19[%c4_99, %c0_100, %c0_101], %286 {strides = array<i32>} : memref<32x8x16xf32, #tpu.memory_space<vmem>>, vector<1x8x16xf32>,
    %287 = vector.extract_strided_slice %24 {offsets = [5, 0, 0], sizes = [1, 8, 64], strides = [1, 1, 1]} : vector<8x8x64xf32> to vector<1x8x64xf32>
    %288 = vector.shape_cast %287 : vector<1x8x64xf32> to vector<8x64xf32>
    %cst_102 = arith.constant dense<0.000000e+00> : vector<8x64xf32>
    %289 = tpu.matmul %276, %19, %cst_102 {dimension_numbers = #tpu.dot_dimension_numbers<[1], [0], [0], [1], [0, 0, 1, 1], [], []>} : vector<8x16xf32>, vector<16x64xf32>, vector<8x64xf32> -> vector<8x64xf32>
    %290 = arith.addf %288, %289 : vector<8x64xf32>
    %291 = vector.extract_strided_slice %290 {offsets = [0, 0], sizes = [8, 16], strides = [1, 1]} : vector<8x64xf32> to vector<8x16xf32>
    %cst_103 = arith.constant 0.000000e+00 : f32
    %292 = vector.broadcast %cst_103 : f32 to vector<8x16xf32>
    %293 = arith.subf %292, %291 : vector<8x16xf32>
    %294 = math.exp %293 : vector<8x16xf32>
    %cst_104 = arith.constant 1.000000e+00 : f32
    %295 = vector.broadcast %cst_104 : f32 to vector<8x16xf32>
    %296 = arith.addf %295, %294 : vector<8x16xf32>
    %cst_105 = arith.constant 1.000000e+00 : f32
    %297 = vector.broadcast %cst_105 : f32 to vector<8x16xf32>
    %298 = arith.divf %297, %296 : vector<8x16xf32>
    %299 = vector.extract_strided_slice %290 {offsets = [0, 16], sizes = [8, 16], strides = [1, 1]} : vector<8x64xf32> to vector<8x16xf32>
    %cst_106 = arith.constant 0.000000e+00 : f32
    %300 = vector.broadcast %cst_106 : f32 to vector<8x16xf32>
    %301 = arith.subf %300, %299 : vector<8x16xf32>
    %302 = math.exp %301 : vector<8x16xf32>
    %cst_107 = arith.constant 1.000000e+00 : f32
    %303 = vector.broadcast %cst_107 : f32 to vector<8x16xf32>
    %304 = arith.addf %303, %302 : vector<8x16xf32>
    %cst_108 = arith.constant 1.000000e+00 : f32
    %305 = vector.broadcast %cst_108 : f32 to vector<8x16xf32>
    %306 = arith.divf %305, %304 : vector<8x16xf32>
    %307 = vector.extract_strided_slice %290 {offsets = [0, 32], sizes = [8, 16], strides = [1, 1]} : vector<8x64xf32> to vector<8x16xf32>
    %308 = math.tanh %307 : vector<8x16xf32>
    %309 = vector.extract_strided_slice %290 {offsets = [0, 48], sizes = [8, 16], strides = [1, 1]} : vector<8x64xf32> to vector<8x16xf32>
    %cst_109 = arith.constant 0.000000e+00 : f32
    %310 = vector.broadcast %cst_109 : f32 to vector<8x16xf32>
    %311 = arith.subf %310, %309 : vector<8x16xf32>
    %312 = math.exp %311 : vector<8x16xf32>
    %cst_110 = arith.constant 1.000000e+00 : f32
    %313 = vector.broadcast %cst_110 : f32 to vector<8x16xf32>
    %314 = arith.addf %313, %312 : vector<8x16xf32>
    %cst_111 = arith.constant 1.000000e+00 : f32
    %315 = vector.broadcast %cst_111 : f32 to vector<8x16xf32>
    %316 = arith.divf %315, %314 : vector<8x16xf32>
    %317 = arith.mulf %306, %283 : vector<8x16xf32>
    %318 = arith.mulf %298, %308 : vector<8x16xf32>
    %319 = arith.addf %317, %318 : vector<8x16xf32>
    %320 = math.tanh %319 : vector<8x16xf32>
    %321 = arith.mulf %316, %320 : vector<8x16xf32>
    %322 = vector.broadcast %11 : vector<8x1xf32> to vector<8x16xf32>
    %323 = arith.mulf %322, %321 : vector<8x16xf32>
    %cst_112 = arith.constant 1.000000e+00 : f32
    %324 = vector.broadcast %cst_112 : f32 to vector<8x1xf32>
    %325 = arith.subf %324, %11 : vector<8x1xf32>
    %326 = vector.broadcast %325 : vector<8x1xf32> to vector<8x16xf32>
    %327 = arith.mulf %326, %276 : vector<8x16xf32>
    %328 = arith.addf %323, %327 : vector<8x16xf32>
    %329 = vector.broadcast %11 : vector<8x1xf32> to vector<8x16xf32>
    %330 = arith.mulf %329, %319 : vector<8x16xf32>
    %cst_113 = arith.constant 1.000000e+00 : f32
    %331 = vector.broadcast %cst_113 : f32 to vector<8x1xf32>
    %332 = arith.subf %331, %11 : vector<8x1xf32>
    %333 = vector.broadcast %332 : vector<8x1xf32> to vector<8x16xf32>
    %334 = arith.mulf %333, %283 : vector<8x16xf32>
    %335 = arith.addf %330, %334 : vector<8x16xf32>
    %c5_114 = arith.constant 5 : index
    %c0_115 = arith.constant 0 : index
    %c0_116 = arith.constant 0 : index
    %336 = vector.load %arg19[%c5_114, %c0_115, %c0_116] : memref<32x8x16xf32, #tpu.memory_space<vmem>>, vector<1x8x16xf32>
    %337 = vector.shape_cast %336 : vector<1x8x16xf32> to vector<8x16xf32>
    %338 = vector.shape_cast %328 : vector<8x16xf32> to vector<1x8x16xf32>
    tpu.vector_store %arg19[%c5_114, %c0_115, %c0_116], %338 {strides = array<i32>} : memref<32x8x16xf32, #tpu.memory_space<vmem>>, vector<1x8x16xf32>,
    %339 = vector.extract_strided_slice %24 {offsets = [6, 0, 0], sizes = [1, 8, 64], strides = [1, 1, 1]} : vector<8x8x64xf32> to vector<1x8x64xf32>
    %340 = vector.shape_cast %339 : vector<1x8x64xf32> to vector<8x64xf32>
    %cst_117 = arith.constant dense<0.000000e+00> : vector<8x64xf32>
    %341 = tpu.matmul %328, %19, %cst_117 {dimension_numbers = #tpu.dot_dimension_numbers<[1], [0], [0], [1], [0, 0, 1, 1], [], []>} : vector<8x16xf32>, vector<16x64xf32>, vector<8x64xf32> -> vector<8x64xf32>
    %342 = arith.addf %340, %341 : vector<8x64xf32>
    %343 = vector.extract_strided_slice %342 {offsets = [0, 0], sizes = [8, 16], strides = [1, 1]} : vector<8x64xf32> to vector<8x16xf32>
    %cst_118 = arith.constant 0.000000e+00 : f32
    %344 = vector.broadcast %cst_118 : f32 to vector<8x16xf32>
    %345 = arith.subf %344, %343 : vector<8x16xf32>
    %346 = math.exp %345 : vector<8x16xf32>
    %cst_119 = arith.constant 1.000000e+00 : f32
    %347 = vector.broadcast %cst_119 : f32 to vector<8x16xf32>
    %348 = arith.addf %347, %346 : vector<8x16xf32>
    %cst_120 = arith.constant 1.000000e+00 : f32
    %349 = vector.broadcast %cst_120 : f32 to vector<8x16xf32>
    %350 = arith.divf %349, %348 : vector<8x16xf32>
    %351 = vector.extract_strided_slice %342 {offsets = [0, 16], sizes = [8, 16], strides = [1, 1]} : vector<8x64xf32> to vector<8x16xf32>
    %cst_121 = arith.constant 0.000000e+00 : f32
    %352 = vector.broadcast %cst_121 : f32 to vector<8x16xf32>
    %353 = arith.subf %352, %351 : vector<8x16xf32>
    %354 = math.exp %353 : vector<8x16xf32>
    %cst_122 = arith.constant 1.000000e+00 : f32
    %355 = vector.broadcast %cst_122 : f32 to vector<8x16xf32>
    %356 = arith.addf %355, %354 : vector<8x16xf32>
    %cst_123 = arith.constant 1.000000e+00 : f32
    %357 = vector.broadcast %cst_123 : f32 to vector<8x16xf32>
    %358 = arith.divf %357, %356 : vector<8x16xf32>
    %359 = vector.extract_strided_slice %342 {offsets = [0, 32], sizes = [8, 16], strides = [1, 1]} : vector<8x64xf32> to vector<8x16xf32>
    %360 = math.tanh %359 : vector<8x16xf32>
    %361 = vector.extract_strided_slice %342 {offsets = [0, 48], sizes = [8, 16], strides = [1, 1]} : vector<8x64xf32> to vector<8x16xf32>
    %cst_124 = arith.constant 0.000000e+00 : f32
    %362 = vector.broadcast %cst_124 : f32 to vector<8x16xf32>
    %363 = arith.subf %362, %361 : vector<8x16xf32>
    %364 = math.exp %363 : vector<8x16xf32>
    %cst_125 = arith.constant 1.000000e+00 : f32
    %365 = vector.broadcast %cst_125 : f32 to vector<8x16xf32>
    %366 = arith.addf %365, %364 : vector<8x16xf32>
    %cst_126 = arith.constant 1.000000e+00 : f32
    %367 = vector.broadcast %cst_126 : f32 to vector<8x16xf32>
    %368 = arith.divf %367, %366 : vector<8x16xf32>
    %369 = arith.mulf %358, %335 : vector<8x16xf32>
    %370 = arith.mulf %350, %360 : vector<8x16xf32>
    %371 = arith.addf %369, %370 : vector<8x16xf32>
    %372 = math.tanh %371 : vector<8x16xf32>
    %373 = arith.mulf %368, %372 : vector<8x16xf32>
    %374 = vector.broadcast %13 : vector<8x1xf32> to vector<8x16xf32>
    %375 = arith.mulf %374, %373 : vector<8x16xf32>
    %cst_127 = arith.constant 1.000000e+00 : f32
    %376 = vector.broadcast %cst_127 : f32 to vector<8x1xf32>
    %377 = arith.subf %376, %13 : vector<8x1xf32>
    %378 = vector.broadcast %377 : vector<8x1xf32> to vector<8x16xf32>
    %379 = arith.mulf %378, %328 : vector<8x16xf32>
    %380 = arith.addf %375, %379 : vector<8x16xf32>
    %381 = vector.broadcast %13 : vector<8x1xf32> to vector<8x16xf32>
    %382 = arith.mulf %381, %371 : vector<8x16xf32>
    %cst_128 = arith.constant 1.000000e+00 : f32
    %383 = vector.broadcast %cst_128 : f32 to vector<8x1xf32>
    %384 = arith.subf %383, %13 : vector<8x1xf32>
    %385 = vector.broadcast %384 : vector<8x1xf32> to vector<8x16xf32>
    %386 = arith.mulf %385, %335 : vector<8x16xf32>
    %387 = arith.addf %382, %386 : vector<8x16xf32>
    %c6_129 = arith.constant 6 : index
    %c0_130 = arith.constant 0 : index
    %c0_131 = arith.constant 0 : index
    %388 = vector.load %arg19[%c6_129, %c0_130, %c0_131] : memref<32x8x16xf32, #tpu.memory_space<vmem>>, vector<1x8x16xf32>
    %389 = vector.shape_cast %388 : vector<1x8x16xf32> to vector<8x16xf32>
    %390 = vector.shape_cast %380 : vector<8x16xf32> to vector<1x8x16xf32>
    tpu.vector_store %arg19[%c6_129, %c0_130, %c0_131], %390 {strides = array<i32>} : memref<32x8x16xf32, #tpu.memory_space<vmem>>, vector<1x8x16xf32>,
    %391 = vector.extract_strided_slice %24 {offsets = [7, 0, 0], sizes = [1, 8, 64], strides = [1, 1, 1]} : vector<8x8x64xf32> to vector<1x8x64xf32>
    %392 = vector.shape_cast %391 : vector<1x8x64xf32> to vector<8x64xf32>
    %cst_132 = arith.constant dense<0.000000e+00> : vector<8x64xf32>
    %393 = tpu.matmul %380, %19, %cst_132 {dimension_numbers = #tpu.dot_dimension_numbers<[1], [0], [0], [1], [0, 0, 1, 1], [], []>} : vector<8x16xf32>, vector<16x64xf32>, vector<8x64xf32> -> vector<8x64xf32>
    %394 = arith.addf %392, %393 : vector<8x64xf32>
    %395 = vector.extract_strided_slice %394 {offsets = [0, 0], sizes = [8, 16], strides = [1, 1]} : vector<8x64xf32> to vector<8x16xf32>
    %cst_133 = arith.constant 0.000000e+00 : f32
    %396 = vector.broadcast %cst_133 : f32 to vector<8x16xf32>
    %397 = arith.subf %396, %395 : vector<8x16xf32>
    %398 = math.exp %397 : vector<8x16xf32>
    %cst_134 = arith.constant 1.000000e+00 : f32
    %399 = vector.broadcast %cst_134 : f32 to vector<8x16xf32>
    %400 = arith.addf %399, %398 : vector<8x16xf32>
    %cst_135 = arith.constant 1.000000e+00 : f32
    %401 = vector.broadcast %cst_135 : f32 to vector<8x16xf32>
    %402 = arith.divf %401, %400 : vector<8x16xf32>
    %403 = vector.extract_strided_slice %394 {offsets = [0, 16], sizes = [8, 16], strides = [1, 1]} : vector<8x64xf32> to vector<8x16xf32>
    %cst_136 = arith.constant 0.000000e+00 : f32
    %404 = vector.broadcast %cst_136 : f32 to vector<8x16xf32>
    %405 = arith.subf %404, %403 : vector<8x16xf32>
    %406 = math.exp %405 : vector<8x16xf32>
    %cst_137 = arith.constant 1.000000e+00 : f32
    %407 = vector.broadcast %cst_137 : f32 to vector<8x16xf32>
    %408 = arith.addf %407, %406 : vector<8x16xf32>
    %cst_138 = arith.constant 1.000000e+00 : f32
    %409 = vector.broadcast %cst_138 : f32 to vector<8x16xf32>
    %410 = arith.divf %409, %408 : vector<8x16xf32>
    %411 = vector.extract_strided_slice %394 {offsets = [0, 32], sizes = [8, 16], strides = [1, 1]} : vector<8x64xf32> to vector<8x16xf32>
    %412 = math.tanh %411 : vector<8x16xf32>
    %413 = vector.extract_strided_slice %394 {offsets = [0, 48], sizes = [8, 16], strides = [1, 1]} : vector<8x64xf32> to vector<8x16xf32>
    %cst_139 = arith.constant 0.000000e+00 : f32
    %414 = vector.broadcast %cst_139 : f32 to vector<8x16xf32>
    %415 = arith.subf %414, %413 : vector<8x16xf32>
    %416 = math.exp %415 : vector<8x16xf32>
    %cst_140 = arith.constant 1.000000e+00 : f32
    %417 = vector.broadcast %cst_140 : f32 to vector<8x16xf32>
    %418 = arith.addf %417, %416 : vector<8x16xf32>
    %cst_141 = arith.constant 1.000000e+00 : f32
    %419 = vector.broadcast %cst_141 : f32 to vector<8x16xf32>
    %420 = arith.divf %419, %418 : vector<8x16xf32>
    %421 = arith.mulf %410, %387 : vector<8x16xf32>
    %422 = arith.mulf %402, %412 : vector<8x16xf32>
    %423 = arith.addf %421, %422 : vector<8x16xf32>
    %424 = math.tanh %423 : vector<8x16xf32>
    %425 = arith.mulf %420, %424 : vector<8x16xf32>
    %426 = vector.broadcast %15 : vector<8x1xf32> to vector<8x16xf32>
    %427 = arith.mulf %426, %425 : vector<8x16xf32>
    %cst_142 = arith.constant 1.000000e+00 : f32
    %428 = vector.broadcast %cst_142 : f32 to vector<8x1xf32>
    %429 = arith.subf %428, %15 : vector<8x1xf32>
    %430 = vector.broadcast %429 : vector<8x1xf32> to vector<8x16xf32>
    %431 = arith.mulf %430, %380 : vector<8x16xf32>
    %432 = arith.addf %427, %431 : vector<8x16xf32>
    %c7_143 = arith.constant 7 : index
    %c0_144 = arith.constant 0 : index
    %c0_145 = arith.constant 0 : index
    %433 = vector.load %arg19[%c7_143, %c0_144, %c0_145] : memref<32x8x16xf32, #tpu.memory_space<vmem>>, vector<1x8x16xf32>
    %434 = vector.shape_cast %433 : vector<1x8x16xf32> to vector<8x16xf32>
    %435 = vector.shape_cast %432 : vector<8x16xf32> to vector<1x8x16xf32>
    tpu.vector_store %arg19[%c7_143, %c0_144, %c0_145], %435 {strides = array<i32>} : memref<32x8x16xf32, #tpu.memory_space<vmem>>, vector<1x8x16xf32>,
    %c0_146 = arith.constant 0 : index
    %c0_147 = arith.constant 0 : index
    %436 = vector.load %arg5[%c0_146, %c0_147] : memref<8x64xf32, #tpu.memory_space<vmem>>, vector<8x64xf32>
    %c0_148 = arith.constant 0 : index
    %c0_149 = arith.constant 0 : index
    %437 = vector.load %arg6[%c0_148, %c0_149] : memref<16x64xf32, #tpu.memory_space<vmem>>, vector<16x64xf32>
    %c0_150 = arith.constant 0 : index
    %c0_151 = arith.constant 0 : index
    %438 = vector.load %arg7[%c0_150, %c0_151] : memref<1x64xf32, #tpu.memory_space<vmem>>, vector<1x64xf32>
    %cst_152 = arith.constant dense<0.000000e+00> : vector<64x64xf32>
    %439 = tpu.matmul %17, %436, %cst_152 {dimension_numbers = #tpu.dot_dimension_numbers<[1], [0], [0], [1], [0, 0, 1, 1], [], []>} : vector<64x8xf32>, vector<8x64xf32>, vector<64x64xf32> -> vector<64x64xf32>
    %440 = vector.broadcast %438 : vector<1x64xf32> to vector<64x64xf32>
    %441 = arith.addf %439, %440 : vector<64x64xf32>
    %442 = vector.shape_cast %441 : vector<64x64xf32> to vector<8x8x64xf32>
    %cst_153 = arith.constant 0.000000e+00 : f32
    %443 = vector.broadcast %cst_153 : f32 to vector<8x16xf32>
    %cst_154 = arith.constant 0.000000e+00 : f32
    %444 = vector.broadcast %cst_154 : f32 to vector<8x16xf32>
    %445 = vector.extract_strided_slice %442 {offsets = [7, 0, 0], sizes = [1, 8, 64], strides = [1, 1, 1]} : vector<8x8x64xf32> to vector<1x8x64xf32>
    %446 = vector.shape_cast %445 : vector<1x8x64xf32> to vector<8x64xf32>
    %cst_155 = arith.constant dense<0.000000e+00> : vector<8x64xf32>
    %447 = tpu.matmul %443, %437, %cst_155 {dimension_numbers = #tpu.dot_dimension_numbers<[1], [0], [0], [1], [0, 0, 1, 1], [], []>} : vector<8x16xf32>, vector<16x64xf32>, vector<8x64xf32> -> vector<8x64xf32>
    %448 = arith.addf %446, %447 : vector<8x64xf32>
    %449 = vector.extract_strided_slice %448 {offsets = [0, 0], sizes = [8, 16], strides = [1, 1]} : vector<8x64xf32> to vector<8x16xf32>
    %cst_156 = arith.constant 0.000000e+00 : f32
    %450 = vector.broadcast %cst_156 : f32 to vector<8x16xf32>
    %451 = arith.subf %450, %449 : vector<8x16xf32>
    %452 = math.exp %451 : vector<8x16xf32>
    %cst_157 = arith.constant 1.000000e+00 : f32
    %453 = vector.broadcast %cst_157 : f32 to vector<8x16xf32>
    %454 = arith.addf %453, %452 : vector<8x16xf32>
    %cst_158 = arith.constant 1.000000e+00 : f32
    %455 = vector.broadcast %cst_158 : f32 to vector<8x16xf32>
    %456 = arith.divf %455, %454 : vector<8x16xf32>
    %457 = vector.extract_strided_slice %448 {offsets = [0, 16], sizes = [8, 16], strides = [1, 1]} : vector<8x64xf32> to vector<8x16xf32>
    %cst_159 = arith.constant 0.000000e+00 : f32
    %458 = vector.broadcast %cst_159 : f32 to vector<8x16xf32>
    %459 = arith.subf %458, %457 : vector<8x16xf32>
    %460 = math.exp %459 : vector<8x16xf32>
    %cst_160 = arith.constant 1.000000e+00 : f32
    %461 = vector.broadcast %cst_160 : f32 to vector<8x16xf32>
    %462 = arith.addf %461, %460 : vector<8x16xf32>
    %cst_161 = arith.constant 1.000000e+00 : f32
    %463 = vector.broadcast %cst_161 : f32 to vector<8x16xf32>
    %464 = arith.divf %463, %462 : vector<8x16xf32>
    %465 = vector.extract_strided_slice %448 {offsets = [0, 32], sizes = [8, 16], strides = [1, 1]} : vector<8x64xf32> to vector<8x16xf32>
    %466 = math.tanh %465 : vector<8x16xf32>
    %467 = vector.extract_strided_slice %448 {offsets = [0, 48], sizes = [8, 16], strides = [1, 1]} : vector<8x64xf32> to vector<8x16xf32>
    %cst_162 = arith.constant 0.000000e+00 : f32
    %468 = vector.broadcast %cst_162 : f32 to vector<8x16xf32>
    %469 = arith.subf %468, %467 : vector<8x16xf32>
    %470 = math.exp %469 : vector<8x16xf32>
    %cst_163 = arith.constant 1.000000e+00 : f32
    %471 = vector.broadcast %cst_163 : f32 to vector<8x16xf32>
    %472 = arith.addf %471, %470 : vector<8x16xf32>
    %cst_164 = arith.constant 1.000000e+00 : f32
    %473 = vector.broadcast %cst_164 : f32 to vector<8x16xf32>
    %474 = arith.divf %473, %472 : vector<8x16xf32>
    %475 = arith.mulf %464, %444 : vector<8x16xf32>
    %476 = arith.mulf %456, %466 : vector<8x16xf32>
    %477 = arith.addf %475, %476 : vector<8x16xf32>
    %478 = math.tanh %477 : vector<8x16xf32>
    %479 = arith.mulf %474, %478 : vector<8x16xf32>
    %480 = vector.broadcast %15 : vector<8x1xf32> to vector<8x16xf32>
    %481 = arith.mulf %480, %479 : vector<8x16xf32>
    %cst_165 = arith.constant 1.000000e+00 : f32
    %482 = vector.broadcast %cst_165 : f32 to vector<8x1xf32>
    %483 = arith.subf %482, %15 : vector<8x1xf32>
    %484 = vector.broadcast %483 : vector<8x1xf32> to vector<8x16xf32>
    %485 = arith.mulf %484, %443 : vector<8x16xf32>
    %486 = arith.addf %481, %485 : vector<8x16xf32>
    %487 = vector.broadcast %15 : vector<8x1xf32> to vector<8x16xf32>
    %488 = arith.mulf %487, %477 : vector<8x16xf32>
    %cst_166 = arith.constant 1.000000e+00 : f32
    %489 = vector.broadcast %cst_166 : f32 to vector<8x1xf32>
    %490 = arith.subf %489, %15 : vector<8x1xf32>
    %491 = vector.broadcast %490 : vector<8x1xf32> to vector<8x16xf32>
    %492 = arith.mulf %491, %444 : vector<8x16xf32>
    %493 = arith.addf %488, %492 : vector<8x16xf32>
    %c15 = arith.constant 15 : index
    %c0_167 = arith.constant 0 : index
    %c0_168 = arith.constant 0 : index
    %494 = vector.load %arg19[%c15, %c0_167, %c0_168] : memref<32x8x16xf32, #tpu.memory_space<vmem>>, vector<1x8x16xf32>
    %495 = vector.shape_cast %494 : vector<1x8x16xf32> to vector<8x16xf32>
    %496 = vector.shape_cast %486 : vector<8x16xf32> to vector<1x8x16xf32>
    tpu.vector_store %arg19[%c15, %c0_167, %c0_168], %496 {strides = array<i32>} : memref<32x8x16xf32, #tpu.memory_space<vmem>>, vector<1x8x16xf32>,
    %497 = vector.extract_strided_slice %442 {offsets = [6, 0, 0], sizes = [1, 8, 64], strides = [1, 1, 1]} : vector<8x8x64xf32> to vector<1x8x64xf32>
    %498 = vector.shape_cast %497 : vector<1x8x64xf32> to vector<8x64xf32>
    %cst_169 = arith.constant dense<0.000000e+00> : vector<8x64xf32>
    %499 = tpu.matmul %486, %437, %cst_169 {dimension_numbers = #tpu.dot_dimension_numbers<[1], [0], [0], [1], [0, 0, 1, 1], [], []>} : vector<8x16xf32>, vector<16x64xf32>, vector<8x64xf32> -> vector<8x64xf32>
    %500 = arith.addf %498, %499 : vector<8x64xf32>
    %501 = vector.extract_strided_slice %500 {offsets = [0, 0], sizes = [8, 16], strides = [1, 1]} : vector<8x64xf32> to vector<8x16xf32>
    %cst_170 = arith.constant 0.000000e+00 : f32
    %502 = vector.broadcast %cst_170 : f32 to vector<8x16xf32>
    %503 = arith.subf %502, %501 : vector<8x16xf32>
    %504 = math.exp %503 : vector<8x16xf32>
    %cst_171 = arith.constant 1.000000e+00 : f32
    %505 = vector.broadcast %cst_171 : f32 to vector<8x16xf32>
    %506 = arith.addf %505, %504 : vector<8x16xf32>
    %cst_172 = arith.constant 1.000000e+00 : f32
    %507 = vector.broadcast %cst_172 : f32 to vector<8x16xf32>
    %508 = arith.divf %507, %506 : vector<8x16xf32>
    %509 = vector.extract_strided_slice %500 {offsets = [0, 16], sizes = [8, 16], strides = [1, 1]} : vector<8x64xf32> to vector<8x16xf32>
    %cst_173 = arith.constant 0.000000e+00 : f32
    %510 = vector.broadcast %cst_173 : f32 to vector<8x16xf32>
    %511 = arith.subf %510, %509 : vector<8x16xf32>
    %512 = math.exp %511 : vector<8x16xf32>
    %cst_174 = arith.constant 1.000000e+00 : f32
    %513 = vector.broadcast %cst_174 : f32 to vector<8x16xf32>
    %514 = arith.addf %513, %512 : vector<8x16xf32>
    %cst_175 = arith.constant 1.000000e+00 : f32
    %515 = vector.broadcast %cst_175 : f32 to vector<8x16xf32>
    %516 = arith.divf %515, %514 : vector<8x16xf32>
    %517 = vector.extract_strided_slice %500 {offsets = [0, 32], sizes = [8, 16], strides = [1, 1]} : vector<8x64xf32> to vector<8x16xf32>
    %518 = math.tanh %517 : vector<8x16xf32>
    %519 = vector.extract_strided_slice %500 {offsets = [0, 48], sizes = [8, 16], strides = [1, 1]} : vector<8x64xf32> to vector<8x16xf32>
    %cst_176 = arith.constant 0.000000e+00 : f32
    %520 = vector.broadcast %cst_176 : f32 to vector<8x16xf32>
    %521 = arith.subf %520, %519 : vector<8x16xf32>
    %522 = math.exp %521 : vector<8x16xf32>
    %cst_177 = arith.constant 1.000000e+00 : f32
    %523 = vector.broadcast %cst_177 : f32 to vector<8x16xf32>
    %524 = arith.addf %523, %522 : vector<8x16xf32>
    %cst_178 = arith.constant 1.000000e+00 : f32
    %525 = vector.broadcast %cst_178 : f32 to vector<8x16xf32>
    %526 = arith.divf %525, %524 : vector<8x16xf32>
    %527 = arith.mulf %516, %493 : vector<8x16xf32>
    %528 = arith.mulf %508, %518 : vector<8x16xf32>
    %529 = arith.addf %527, %528 : vector<8x16xf32>
    %530 = math.tanh %529 : vector<8x16xf32>
    %531 = arith.mulf %526, %530 : vector<8x16xf32>
    %532 = vector.broadcast %13 : vector<8x1xf32> to vector<8x16xf32>
    %533 = arith.mulf %532, %531 : vector<8x16xf32>
    %cst_179 = arith.constant 1.000000e+00 : f32
    %534 = vector.broadcast %cst_179 : f32 to vector<8x1xf32>
    %535 = arith.subf %534, %13 : vector<8x1xf32>
    %536 = vector.broadcast %535 : vector<8x1xf32> to vector<8x16xf32>
    %537 = arith.mulf %536, %486 : vector<8x16xf32>
    %538 = arith.addf %533, %537 : vector<8x16xf32>
    %539 = vector.broadcast %13 : vector<8x1xf32> to vector<8x16xf32>
    %540 = arith.mulf %539, %529 : vector<8x16xf32>
    %cst_180 = arith.constant 1.000000e+00 : f32
    %541 = vector.broadcast %cst_180 : f32 to vector<8x1xf32>
    %542 = arith.subf %541, %13 : vector<8x1xf32>
    %543 = vector.broadcast %542 : vector<8x1xf32> to vector<8x16xf32>
    %544 = arith.mulf %543, %493 : vector<8x16xf32>
    %545 = arith.addf %540, %544 : vector<8x16xf32>
    %c14 = arith.constant 14 : index
    %c0_181 = arith.constant 0 : index
    %c0_182 = arith.constant 0 : index
    %546 = vector.load %arg19[%c14, %c0_181, %c0_182] : memref<32x8x16xf32, #tpu.memory_space<vmem>>, vector<1x8x16xf32>
    %547 = vector.shape_cast %546 : vector<1x8x16xf32> to vector<8x16xf32>
    %548 = vector.shape_cast %538 : vector<8x16xf32> to vector<1x8x16xf32>
    tpu.vector_store %arg19[%c14, %c0_181, %c0_182], %548 {strides = array<i32>} : memref<32x8x16xf32, #tpu.memory_space<vmem>>, vector<1x8x16xf32>,
    %549 = vector.extract_strided_slice %442 {offsets = [5, 0, 0], sizes = [1, 8, 64], strides = [1, 1, 1]} : vector<8x8x64xf32> to vector<1x8x64xf32>
    %550 = vector.shape_cast %549 : vector<1x8x64xf32> to vector<8x64xf32>
    %cst_183 = arith.constant dense<0.000000e+00> : vector<8x64xf32>
    %551 = tpu.matmul %538, %437, %cst_183 {dimension_numbers = #tpu.dot_dimension_numbers<[1], [0], [0], [1], [0, 0, 1, 1], [], []>} : vector<8x16xf32>, vector<16x64xf32>, vector<8x64xf32> -> vector<8x64xf32>
    %552 = arith.addf %550, %551 : vector<8x64xf32>
    %553 = vector.extract_strided_slice %552 {offsets = [0, 0], sizes = [8, 16], strides = [1, 1]} : vector<8x64xf32> to vector<8x16xf32>
    %cst_184 = arith.constant 0.000000e+00 : f32
    %554 = vector.broadcast %cst_184 : f32 to vector<8x16xf32>
    %555 = arith.subf %554, %553 : vector<8x16xf32>
    %556 = math.exp %555 : vector<8x16xf32>
    %cst_185 = arith.constant 1.000000e+00 : f32
    %557 = vector.broadcast %cst_185 : f32 to vector<8x16xf32>
    %558 = arith.addf %557, %556 : vector<8x16xf32>
    %cst_186 = arith.constant 1.000000e+00 : f32
    %559 = vector.broadcast %cst_186 : f32 to vector<8x16xf32>
    %560 = arith.divf %559, %558 : vector<8x16xf32>
    %561 = vector.extract_strided_slice %552 {offsets = [0, 16], sizes = [8, 16], strides = [1, 1]} : vector<8x64xf32> to vector<8x16xf32>
    %cst_187 = arith.constant 0.000000e+00 : f32
    %562 = vector.broadcast %cst_187 : f32 to vector<8x16xf32>
    %563 = arith.subf %562, %561 : vector<8x16xf32>
    %564 = math.exp %563 : vector<8x16xf32>
    %cst_188 = arith.constant 1.000000e+00 : f32
    %565 = vector.broadcast %cst_188 : f32 to vector<8x16xf32>
    %566 = arith.addf %565, %564 : vector<8x16xf32>
    %cst_189 = arith.constant 1.000000e+00 : f32
    %567 = vector.broadcast %cst_189 : f32 to vector<8x16xf32>
    %568 = arith.divf %567, %566 : vector<8x16xf32>
    %569 = vector.extract_strided_slice %552 {offsets = [0, 32], sizes = [8, 16], strides = [1, 1]} : vector<8x64xf32> to vector<8x16xf32>
    %570 = math.tanh %569 : vector<8x16xf32>
    %571 = vector.extract_strided_slice %552 {offsets = [0, 48], sizes = [8, 16], strides = [1, 1]} : vector<8x64xf32> to vector<8x16xf32>
    %cst_190 = arith.constant 0.000000e+00 : f32
    %572 = vector.broadcast %cst_190 : f32 to vector<8x16xf32>
    %573 = arith.subf %572, %571 : vector<8x16xf32>
    %574 = math.exp %573 : vector<8x16xf32>
    %cst_191 = arith.constant 1.000000e+00 : f32
    %575 = vector.broadcast %cst_191 : f32 to vector<8x16xf32>
    %576 = arith.addf %575, %574 : vector<8x16xf32>
    %cst_192 = arith.constant 1.000000e+00 : f32
    %577 = vector.broadcast %cst_192 : f32 to vector<8x16xf32>
    %578 = arith.divf %577, %576 : vector<8x16xf32>
    %579 = arith.mulf %568, %545 : vector<8x16xf32>
    %580 = arith.mulf %560, %570 : vector<8x16xf32>
    %581 = arith.addf %579, %580 : vector<8x16xf32>
    %582 = math.tanh %581 : vector<8x16xf32>
    %583 = arith.mulf %578, %582 : vector<8x16xf32>
    %584 = vector.broadcast %11 : vector<8x1xf32> to vector<8x16xf32>
    %585 = arith.mulf %584, %583 : vector<8x16xf32>
    %cst_193 = arith.constant 1.000000e+00 : f32
    %586 = vector.broadcast %cst_193 : f32 to vector<8x1xf32>
    %587 = arith.subf %586, %11 : vector<8x1xf32>
    %588 = vector.broadcast %587 : vector<8x1xf32> to vector<8x16xf32>
    %589 = arith.mulf %588, %538 : vector<8x16xf32>
    %590 = arith.addf %585, %589 : vector<8x16xf32>
    %591 = vector.broadcast %11 : vector<8x1xf32> to vector<8x16xf32>
    %592 = arith.mulf %591, %581 : vector<8x16xf32>
    %cst_194 = arith.constant 1.000000e+00 : f32
    %593 = vector.broadcast %cst_194 : f32 to vector<8x1xf32>
    %594 = arith.subf %593, %11 : vector<8x1xf32>
    %595 = vector.broadcast %594 : vector<8x1xf32> to vector<8x16xf32>
    %596 = arith.mulf %595, %545 : vector<8x16xf32>
    %597 = arith.addf %592, %596 : vector<8x16xf32>
    %c13 = arith.constant 13 : index
    %c0_195 = arith.constant 0 : index
    %c0_196 = arith.constant 0 : index
    %598 = vector.load %arg19[%c13, %c0_195, %c0_196] : memref<32x8x16xf32, #tpu.memory_space<vmem>>, vector<1x8x16xf32>
    %599 = vector.shape_cast %598 : vector<1x8x16xf32> to vector<8x16xf32>
    %600 = vector.shape_cast %590 : vector<8x16xf32> to vector<1x8x16xf32>
    tpu.vector_store %arg19[%c13, %c0_195, %c0_196], %600 {strides = array<i32>} : memref<32x8x16xf32, #tpu.memory_space<vmem>>, vector<1x8x16xf32>,
    %601 = vector.extract_strided_slice %442 {offsets = [4, 0, 0], sizes = [1, 8, 64], strides = [1, 1, 1]} : vector<8x8x64xf32> to vector<1x8x64xf32>
    %602 = vector.shape_cast %601 : vector<1x8x64xf32> to vector<8x64xf32>
    %cst_197 = arith.constant dense<0.000000e+00> : vector<8x64xf32>
    %603 = tpu.matmul %590, %437, %cst_197 {dimension_numbers = #tpu.dot_dimension_numbers<[1], [0], [0], [1], [0, 0, 1, 1], [], []>} : vector<8x16xf32>, vector<16x64xf32>, vector<8x64xf32> -> vector<8x64xf32>
    %604 = arith.addf %602, %603 : vector<8x64xf32>
    %605 = vector.extract_strided_slice %604 {offsets = [0, 0], sizes = [8, 16], strides = [1, 1]} : vector<8x64xf32> to vector<8x16xf32>
    %cst_198 = arith.constant 0.000000e+00 : f32
    %606 = vector.broadcast %cst_198 : f32 to vector<8x16xf32>
    %607 = arith.subf %606, %605 : vector<8x16xf32>
    %608 = math.exp %607 : vector<8x16xf32>
    %cst_199 = arith.constant 1.000000e+00 : f32
    %609 = vector.broadcast %cst_199 : f32 to vector<8x16xf32>
    %610 = arith.addf %609, %608 : vector<8x16xf32>
    %cst_200 = arith.constant 1.000000e+00 : f32
    %611 = vector.broadcast %cst_200 : f32 to vector<8x16xf32>
    %612 = arith.divf %611, %610 : vector<8x16xf32>
    %613 = vector.extract_strided_slice %604 {offsets = [0, 16], sizes = [8, 16], strides = [1, 1]} : vector<8x64xf32> to vector<8x16xf32>
    %cst_201 = arith.constant 0.000000e+00 : f32
    %614 = vector.broadcast %cst_201 : f32 to vector<8x16xf32>
    %615 = arith.subf %614, %613 : vector<8x16xf32>
    %616 = math.exp %615 : vector<8x16xf32>
    %cst_202 = arith.constant 1.000000e+00 : f32
    %617 = vector.broadcast %cst_202 : f32 to vector<8x16xf32>
    %618 = arith.addf %617, %616 : vector<8x16xf32>
    %cst_203 = arith.constant 1.000000e+00 : f32
    %619 = vector.broadcast %cst_203 : f32 to vector<8x16xf32>
    %620 = arith.divf %619, %618 : vector<8x16xf32>
    %621 = vector.extract_strided_slice %604 {offsets = [0, 32], sizes = [8, 16], strides = [1, 1]} : vector<8x64xf32> to vector<8x16xf32>
    %622 = math.tanh %621 : vector<8x16xf32>
    %623 = vector.extract_strided_slice %604 {offsets = [0, 48], sizes = [8, 16], strides = [1, 1]} : vector<8x64xf32> to vector<8x16xf32>
    %cst_204 = arith.constant 0.000000e+00 : f32
    %624 = vector.broadcast %cst_204 : f32 to vector<8x16xf32>
    %625 = arith.subf %624, %623 : vector<8x16xf32>
    %626 = math.exp %625 : vector<8x16xf32>
    %cst_205 = arith.constant 1.000000e+00 : f32
    %627 = vector.broadcast %cst_205 : f32 to vector<8x16xf32>
    %628 = arith.addf %627, %626 : vector<8x16xf32>
    %cst_206 = arith.constant 1.000000e+00 : f32
    %629 = vector.broadcast %cst_206 : f32 to vector<8x16xf32>
    %630 = arith.divf %629, %628 : vector<8x16xf32>
    %631 = arith.mulf %620, %597 : vector<8x16xf32>
    %632 = arith.mulf %612, %622 : vector<8x16xf32>
    %633 = arith.addf %631, %632 : vector<8x16xf32>
    %634 = math.tanh %633 : vector<8x16xf32>
    %635 = arith.mulf %630, %634 : vector<8x16xf32>
    %636 = vector.broadcast %9 : vector<8x1xf32> to vector<8x16xf32>
    %637 = arith.mulf %636, %635 : vector<8x16xf32>
    %cst_207 = arith.constant 1.000000e+00 : f32
    %638 = vector.broadcast %cst_207 : f32 to vector<8x1xf32>
    %639 = arith.subf %638, %9 : vector<8x1xf32>
    %640 = vector.broadcast %639 : vector<8x1xf32> to vector<8x16xf32>
    %641 = arith.mulf %640, %590 : vector<8x16xf32>
    %642 = arith.addf %637, %641 : vector<8x16xf32>
    %643 = vector.broadcast %9 : vector<8x1xf32> to vector<8x16xf32>
    %644 = arith.mulf %643, %633 : vector<8x16xf32>
    %cst_208 = arith.constant 1.000000e+00 : f32
    %645 = vector.broadcast %cst_208 : f32 to vector<8x1xf32>
    %646 = arith.subf %645, %9 : vector<8x1xf32>
    %647 = vector.broadcast %646 : vector<8x1xf32> to vector<8x16xf32>
    %648 = arith.mulf %647, %597 : vector<8x16xf32>
    %649 = arith.addf %644, %648 : vector<8x16xf32>
    %c12 = arith.constant 12 : index
    %c0_209 = arith.constant 0 : index
    %c0_210 = arith.constant 0 : index
    %650 = vector.load %arg19[%c12, %c0_209, %c0_210] : memref<32x8x16xf32, #tpu.memory_space<vmem>>, vector<1x8x16xf32>
    %651 = vector.shape_cast %650 : vector<1x8x16xf32> to vector<8x16xf32>
    %652 = vector.shape_cast %642 : vector<8x16xf32> to vector<1x8x16xf32>
    tpu.vector_store %arg19[%c12, %c0_209, %c0_210], %652 {strides = array<i32>} : memref<32x8x16xf32, #tpu.memory_space<vmem>>, vector<1x8x16xf32>,
    %653 = vector.extract_strided_slice %442 {offsets = [3, 0, 0], sizes = [1, 8, 64], strides = [1, 1, 1]} : vector<8x8x64xf32> to vector<1x8x64xf32>
    %654 = vector.shape_cast %653 : vector<1x8x64xf32> to vector<8x64xf32>
    %cst_211 = arith.constant dense<0.000000e+00> : vector<8x64xf32>
    %655 = tpu.matmul %642, %437, %cst_211 {dimension_numbers = #tpu.dot_dimension_numbers<[1], [0], [0], [1], [0, 0, 1, 1], [], []>} : vector<8x16xf32>, vector<16x64xf32>, vector<8x64xf32> -> vector<8x64xf32>
    %656 = arith.addf %654, %655 : vector<8x64xf32>
    %657 = vector.extract_strided_slice %656 {offsets = [0, 0], sizes = [8, 16], strides = [1, 1]} : vector<8x64xf32> to vector<8x16xf32>
    %cst_212 = arith.constant 0.000000e+00 : f32
    %658 = vector.broadcast %cst_212 : f32 to vector<8x16xf32>
    %659 = arith.subf %658, %657 : vector<8x16xf32>
    %660 = math.exp %659 : vector<8x16xf32>
    %cst_213 = arith.constant 1.000000e+00 : f32
    %661 = vector.broadcast %cst_213 : f32 to vector<8x16xf32>
    %662 = arith.addf %661, %660 : vector<8x16xf32>
    %cst_214 = arith.constant 1.000000e+00 : f32
    %663 = vector.broadcast %cst_214 : f32 to vector<8x16xf32>
    %664 = arith.divf %663, %662 : vector<8x16xf32>
    %665 = vector.extract_strided_slice %656 {offsets = [0, 16], sizes = [8, 16], strides = [1, 1]} : vector<8x64xf32> to vector<8x16xf32>
    %cst_215 = arith.constant 0.000000e+00 : f32
    %666 = vector.broadcast %cst_215 : f32 to vector<8x16xf32>
    %667 = arith.subf %666, %665 : vector<8x16xf32>
    %668 = math.exp %667 : vector<8x16xf32>
    %cst_216 = arith.constant 1.000000e+00 : f32
    %669 = vector.broadcast %cst_216 : f32 to vector<8x16xf32>
    %670 = arith.addf %669, %668 : vector<8x16xf32>
    %cst_217 = arith.constant 1.000000e+00 : f32
    %671 = vector.broadcast %cst_217 : f32 to vector<8x16xf32>
    %672 = arith.divf %671, %670 : vector<8x16xf32>
    %673 = vector.extract_strided_slice %656 {offsets = [0, 32], sizes = [8, 16], strides = [1, 1]} : vector<8x64xf32> to vector<8x16xf32>
    %674 = math.tanh %673 : vector<8x16xf32>
    %675 = vector.extract_strided_slice %656 {offsets = [0, 48], sizes = [8, 16], strides = [1, 1]} : vector<8x64xf32> to vector<8x16xf32>
    %cst_218 = arith.constant 0.000000e+00 : f32
    %676 = vector.broadcast %cst_218 : f32 to vector<8x16xf32>
    %677 = arith.subf %676, %675 : vector<8x16xf32>
    %678 = math.exp %677 : vector<8x16xf32>
    %cst_219 = arith.constant 1.000000e+00 : f32
    %679 = vector.broadcast %cst_219 : f32 to vector<8x16xf32>
    %680 = arith.addf %679, %678 : vector<8x16xf32>
    %cst_220 = arith.constant 1.000000e+00 : f32
    %681 = vector.broadcast %cst_220 : f32 to vector<8x16xf32>
    %682 = arith.divf %681, %680 : vector<8x16xf32>
    %683 = arith.mulf %672, %649 : vector<8x16xf32>
    %684 = arith.mulf %664, %674 : vector<8x16xf32>
    %685 = arith.addf %683, %684 : vector<8x16xf32>
    %686 = math.tanh %685 : vector<8x16xf32>
    %687 = arith.mulf %682, %686 : vector<8x16xf32>
    %688 = vector.broadcast %7 : vector<8x1xf32> to vector<8x16xf32>
    %689 = arith.mulf %688, %687 : vector<8x16xf32>
    %cst_221 = arith.constant 1.000000e+00 : f32
    %690 = vector.broadcast %cst_221 : f32 to vector<8x1xf32>
    %691 = arith.subf %690, %7 : vector<8x1xf32>
    %692 = vector.broadcast %691 : vector<8x1xf32> to vector<8x16xf32>
    %693 = arith.mulf %692, %642 : vector<8x16xf32>
    %694 = arith.addf %689, %693 : vector<8x16xf32>
    %695 = vector.broadcast %7 : vector<8x1xf32> to vector<8x16xf32>
    %696 = arith.mulf %695, %685 : vector<8x16xf32>
    %cst_222 = arith.constant 1.000000e+00 : f32
    %697 = vector.broadcast %cst_222 : f32 to vector<8x1xf32>
    %698 = arith.subf %697, %7 : vector<8x1xf32>
    %699 = vector.broadcast %698 : vector<8x1xf32> to vector<8x16xf32>
    %700 = arith.mulf %699, %649 : vector<8x16xf32>
    %701 = arith.addf %696, %700 : vector<8x16xf32>
    %c11 = arith.constant 11 : index
    %c0_223 = arith.constant 0 : index
    %c0_224 = arith.constant 0 : index
    %702 = vector.load %arg19[%c11, %c0_223, %c0_224] : memref<32x8x16xf32, #tpu.memory_space<vmem>>, vector<1x8x16xf32>
    %703 = vector.shape_cast %702 : vector<1x8x16xf32> to vector<8x16xf32>
    %704 = vector.shape_cast %694 : vector<8x16xf32> to vector<1x8x16xf32>
    tpu.vector_store %arg19[%c11, %c0_223, %c0_224], %704 {strides = array<i32>} : memref<32x8x16xf32, #tpu.memory_space<vmem>>, vector<1x8x16xf32>,
    %705 = vector.extract_strided_slice %442 {offsets = [2, 0, 0], sizes = [1, 8, 64], strides = [1, 1, 1]} : vector<8x8x64xf32> to vector<1x8x64xf32>
    %706 = vector.shape_cast %705 : vector<1x8x64xf32> to vector<8x64xf32>
    %cst_225 = arith.constant dense<0.000000e+00> : vector<8x64xf32>
    %707 = tpu.matmul %694, %437, %cst_225 {dimension_numbers = #tpu.dot_dimension_numbers<[1], [0], [0], [1], [0, 0, 1, 1], [], []>} : vector<8x16xf32>, vector<16x64xf32>, vector<8x64xf32> -> vector<8x64xf32>
    %708 = arith.addf %706, %707 : vector<8x64xf32>
    %709 = vector.extract_strided_slice %708 {offsets = [0, 0], sizes = [8, 16], strides = [1, 1]} : vector<8x64xf32> to vector<8x16xf32>
    %cst_226 = arith.constant 0.000000e+00 : f32
    %710 = vector.broadcast %cst_226 : f32 to vector<8x16xf32>
    %711 = arith.subf %710, %709 : vector<8x16xf32>
    %712 = math.exp %711 : vector<8x16xf32>
    %cst_227 = arith.constant 1.000000e+00 : f32
    %713 = vector.broadcast %cst_227 : f32 to vector<8x16xf32>
    %714 = arith.addf %713, %712 : vector<8x16xf32>
    %cst_228 = arith.constant 1.000000e+00 : f32
    %715 = vector.broadcast %cst_228 : f32 to vector<8x16xf32>
    %716 = arith.divf %715, %714 : vector<8x16xf32>
    %717 = vector.extract_strided_slice %708 {offsets = [0, 16], sizes = [8, 16], strides = [1, 1]} : vector<8x64xf32> to vector<8x16xf32>
    %cst_229 = arith.constant 0.000000e+00 : f32
    %718 = vector.broadcast %cst_229 : f32 to vector<8x16xf32>
    %719 = arith.subf %718, %717 : vector<8x16xf32>
    %720 = math.exp %719 : vector<8x16xf32>
    %cst_230 = arith.constant 1.000000e+00 : f32
    %721 = vector.broadcast %cst_230 : f32 to vector<8x16xf32>
    %722 = arith.addf %721, %720 : vector<8x16xf32>
    %cst_231 = arith.constant 1.000000e+00 : f32
    %723 = vector.broadcast %cst_231 : f32 to vector<8x16xf32>
    %724 = arith.divf %723, %722 : vector<8x16xf32>
    %725 = vector.extract_strided_slice %708 {offsets = [0, 32], sizes = [8, 16], strides = [1, 1]} : vector<8x64xf32> to vector<8x16xf32>
    %726 = math.tanh %725 : vector<8x16xf32>
    %727 = vector.extract_strided_slice %708 {offsets = [0, 48], sizes = [8, 16], strides = [1, 1]} : vector<8x64xf32> to vector<8x16xf32>
    %cst_232 = arith.constant 0.000000e+00 : f32
    %728 = vector.broadcast %cst_232 : f32 to vector<8x16xf32>
    %729 = arith.subf %728, %727 : vector<8x16xf32>
    %730 = math.exp %729 : vector<8x16xf32>
    %cst_233 = arith.constant 1.000000e+00 : f32
    %731 = vector.broadcast %cst_233 : f32 to vector<8x16xf32>
    %732 = arith.addf %731, %730 : vector<8x16xf32>
    %cst_234 = arith.constant 1.000000e+00 : f32
    %733 = vector.broadcast %cst_234 : f32 to vector<8x16xf32>
    %734 = arith.divf %733, %732 : vector<8x16xf32>
    %735 = arith.mulf %724, %701 : vector<8x16xf32>
    %736 = arith.mulf %716, %726 : vector<8x16xf32>
    %737 = arith.addf %735, %736 : vector<8x16xf32>
    %738 = math.tanh %737 : vector<8x16xf32>
    %739 = arith.mulf %734, %738 : vector<8x16xf32>
    %740 = vector.broadcast %5 : vector<8x1xf32> to vector<8x16xf32>
    %741 = arith.mulf %740, %739 : vector<8x16xf32>
    %cst_235 = arith.constant 1.000000e+00 : f32
    %742 = vector.broadcast %cst_235 : f32 to vector<8x1xf32>
    %743 = arith.subf %742, %5 : vector<8x1xf32>
    %744 = vector.broadcast %743 : vector<8x1xf32> to vector<8x16xf32>
    %745 = arith.mulf %744, %694 : vector<8x16xf32>
    %746 = arith.addf %741, %745 : vector<8x16xf32>
    %747 = vector.broadcast %5 : vector<8x1xf32> to vector<8x16xf32>
    %748 = arith.mulf %747, %737 : vector<8x16xf32>
    %cst_236 = arith.constant 1.000000e+00 : f32
    %749 = vector.broadcast %cst_236 : f32 to vector<8x1xf32>
    %750 = arith.subf %749, %5 : vector<8x1xf32>
    %751 = vector.broadcast %750 : vector<8x1xf32> to vector<8x16xf32>
    %752 = arith.mulf %751, %701 : vector<8x16xf32>
    %753 = arith.addf %748, %752 : vector<8x16xf32>
    %c10 = arith.constant 10 : index
    %c0_237 = arith.constant 0 : index
    %c0_238 = arith.constant 0 : index
    %754 = vector.load %arg19[%c10, %c0_237, %c0_238] : memref<32x8x16xf32, #tpu.memory_space<vmem>>, vector<1x8x16xf32>
    %755 = vector.shape_cast %754 : vector<1x8x16xf32> to vector<8x16xf32>
    %756 = vector.shape_cast %746 : vector<8x16xf32> to vector<1x8x16xf32>
    tpu.vector_store %arg19[%c10, %c0_237, %c0_238], %756 {strides = array<i32>} : memref<32x8x16xf32, #tpu.memory_space<vmem>>, vector<1x8x16xf32>,
    %757 = vector.extract_strided_slice %442 {offsets = [1, 0, 0], sizes = [1, 8, 64], strides = [1, 1, 1]} : vector<8x8x64xf32> to vector<1x8x64xf32>
    %758 = vector.shape_cast %757 : vector<1x8x64xf32> to vector<8x64xf32>
    %cst_239 = arith.constant dense<0.000000e+00> : vector<8x64xf32>
    %759 = tpu.matmul %746, %437, %cst_239 {dimension_numbers = #tpu.dot_dimension_numbers<[1], [0], [0], [1], [0, 0, 1, 1], [], []>} : vector<8x16xf32>, vector<16x64xf32>, vector<8x64xf32> -> vector<8x64xf32>
    %760 = arith.addf %758, %759 : vector<8x64xf32>
    %761 = vector.extract_strided_slice %760 {offsets = [0, 0], sizes = [8, 16], strides = [1, 1]} : vector<8x64xf32> to vector<8x16xf32>
    %cst_240 = arith.constant 0.000000e+00 : f32
    %762 = vector.broadcast %cst_240 : f32 to vector<8x16xf32>
    %763 = arith.subf %762, %761 : vector<8x16xf32>
    %764 = math.exp %763 : vector<8x16xf32>
    %cst_241 = arith.constant 1.000000e+00 : f32
    %765 = vector.broadcast %cst_241 : f32 to vector<8x16xf32>
    %766 = arith.addf %765, %764 : vector<8x16xf32>
    %cst_242 = arith.constant 1.000000e+00 : f32
    %767 = vector.broadcast %cst_242 : f32 to vector<8x16xf32>
    %768 = arith.divf %767, %766 : vector<8x16xf32>
    %769 = vector.extract_strided_slice %760 {offsets = [0, 16], sizes = [8, 16], strides = [1, 1]} : vector<8x64xf32> to vector<8x16xf32>
    %cst_243 = arith.constant 0.000000e+00 : f32
    %770 = vector.broadcast %cst_243 : f32 to vector<8x16xf32>
    %771 = arith.subf %770, %769 : vector<8x16xf32>
    %772 = math.exp %771 : vector<8x16xf32>
    %cst_244 = arith.constant 1.000000e+00 : f32
    %773 = vector.broadcast %cst_244 : f32 to vector<8x16xf32>
    %774 = arith.addf %773, %772 : vector<8x16xf32>
    %cst_245 = arith.constant 1.000000e+00 : f32
    %775 = vector.broadcast %cst_245 : f32 to vector<8x16xf32>
    %776 = arith.divf %775, %774 : vector<8x16xf32>
    %777 = vector.extract_strided_slice %760 {offsets = [0, 32], sizes = [8, 16], strides = [1, 1]} : vector<8x64xf32> to vector<8x16xf32>
    %778 = math.tanh %777 : vector<8x16xf32>
    %779 = vector.extract_strided_slice %760 {offsets = [0, 48], sizes = [8, 16], strides = [1, 1]} : vector<8x64xf32> to vector<8x16xf32>
    %cst_246 = arith.constant 0.000000e+00 : f32
    %780 = vector.broadcast %cst_246 : f32 to vector<8x16xf32>
    %781 = arith.subf %780, %779 : vector<8x16xf32>
    %782 = math.exp %781 : vector<8x16xf32>
    %cst_247 = arith.constant 1.000000e+00 : f32
    %783 = vector.broadcast %cst_247 : f32 to vector<8x16xf32>
    %784 = arith.addf %783, %782 : vector<8x16xf32>
    %cst_248 = arith.constant 1.000000e+00 : f32
    %785 = vector.broadcast %cst_248 : f32 to vector<8x16xf32>
    %786 = arith.divf %785, %784 : vector<8x16xf32>
    %787 = arith.mulf %776, %753 : vector<8x16xf32>
    %788 = arith.mulf %768, %778 : vector<8x16xf32>
    %789 = arith.addf %787, %788 : vector<8x16xf32>
    %790 = math.tanh %789 : vector<8x16xf32>
    %791 = arith.mulf %786, %790 : vector<8x16xf32>
    %792 = vector.broadcast %3 : vector<8x1xf32> to vector<8x16xf32>
    %793 = arith.mulf %792, %791 : vector<8x16xf32>
    %cst_249 = arith.constant 1.000000e+00 : f32
    %794 = vector.broadcast %cst_249 : f32 to vector<8x1xf32>
    %795 = arith.subf %794, %3 : vector<8x1xf32>
    %796 = vector.broadcast %795 : vector<8x1xf32> to vector<8x16xf32>
    %797 = arith.mulf %796, %746 : vector<8x16xf32>
    %798 = arith.addf %793, %797 : vector<8x16xf32>
    %799 = vector.broadcast %3 : vector<8x1xf32> to vector<8x16xf32>
    %800 = arith.mulf %799, %789 : vector<8x16xf32>
    %cst_250 = arith.constant 1.000000e+00 : f32
    %801 = vector.broadcast %cst_250 : f32 to vector<8x1xf32>
    %802 = arith.subf %801, %3 : vector<8x1xf32>
    %803 = vector.broadcast %802 : vector<8x1xf32> to vector<8x16xf32>
    %804 = arith.mulf %803, %753 : vector<8x16xf32>
    %805 = arith.addf %800, %804 : vector<8x16xf32>
    %c9 = arith.constant 9 : index
    %c0_251 = arith.constant 0 : index
    %c0_252 = arith.constant 0 : index
    %806 = vector.load %arg19[%c9, %c0_251, %c0_252] : memref<32x8x16xf32, #tpu.memory_space<vmem>>, vector<1x8x16xf32>
    %807 = vector.shape_cast %806 : vector<1x8x16xf32> to vector<8x16xf32>
    %808 = vector.shape_cast %798 : vector<8x16xf32> to vector<1x8x16xf32>
    tpu.vector_store %arg19[%c9, %c0_251, %c0_252], %808 {strides = array<i32>} : memref<32x8x16xf32, #tpu.memory_space<vmem>>, vector<1x8x16xf32>,
    %809 = vector.extract_strided_slice %442 {offsets = [0, 0, 0], sizes = [1, 8, 64], strides = [1, 1, 1]} : vector<8x8x64xf32> to vector<1x8x64xf32>
    %810 = vector.shape_cast %809 : vector<1x8x64xf32> to vector<8x64xf32>
    %cst_253 = arith.constant dense<0.000000e+00> : vector<8x64xf32>
    %811 = tpu.matmul %798, %437, %cst_253 {dimension_numbers = #tpu.dot_dimension_numbers<[1], [0], [0], [1], [0, 0, 1, 1], [], []>} : vector<8x16xf32>, vector<16x64xf32>, vector<8x64xf32> -> vector<8x64xf32>
    %812 = arith.addf %810, %811 : vector<8x64xf32>
    %813 = vector.extract_strided_slice %812 {offsets = [0, 0], sizes = [8, 16], strides = [1, 1]} : vector<8x64xf32> to vector<8x16xf32>
    %cst_254 = arith.constant 0.000000e+00 : f32
    %814 = vector.broadcast %cst_254 : f32 to vector<8x16xf32>
    %815 = arith.subf %814, %813 : vector<8x16xf32>
    %816 = math.exp %815 : vector<8x16xf32>
    %cst_255 = arith.constant 1.000000e+00 : f32
    %817 = vector.broadcast %cst_255 : f32 to vector<8x16xf32>
    %818 = arith.addf %817, %816 : vector<8x16xf32>
    %cst_256 = arith.constant 1.000000e+00 : f32
    %819 = vector.broadcast %cst_256 : f32 to vector<8x16xf32>
    %820 = arith.divf %819, %818 : vector<8x16xf32>
    %821 = vector.extract_strided_slice %812 {offsets = [0, 16], sizes = [8, 16], strides = [1, 1]} : vector<8x64xf32> to vector<8x16xf32>
    %cst_257 = arith.constant 0.000000e+00 : f32
    %822 = vector.broadcast %cst_257 : f32 to vector<8x16xf32>
    %823 = arith.subf %822, %821 : vector<8x16xf32>
    %824 = math.exp %823 : vector<8x16xf32>
    %cst_258 = arith.constant 1.000000e+00 : f32
    %825 = vector.broadcast %cst_258 : f32 to vector<8x16xf32>
    %826 = arith.addf %825, %824 : vector<8x16xf32>
    %cst_259 = arith.constant 1.000000e+00 : f32
    %827 = vector.broadcast %cst_259 : f32 to vector<8x16xf32>
    %828 = arith.divf %827, %826 : vector<8x16xf32>
    %829 = vector.extract_strided_slice %812 {offsets = [0, 32], sizes = [8, 16], strides = [1, 1]} : vector<8x64xf32> to vector<8x16xf32>
    %830 = math.tanh %829 : vector<8x16xf32>
    %831 = vector.extract_strided_slice %812 {offsets = [0, 48], sizes = [8, 16], strides = [1, 1]} : vector<8x64xf32> to vector<8x16xf32>
    %cst_260 = arith.constant 0.000000e+00 : f32
    %832 = vector.broadcast %cst_260 : f32 to vector<8x16xf32>
    %833 = arith.subf %832, %831 : vector<8x16xf32>
    %834 = math.exp %833 : vector<8x16xf32>
    %cst_261 = arith.constant 1.000000e+00 : f32
    %835 = vector.broadcast %cst_261 : f32 to vector<8x16xf32>
    %836 = arith.addf %835, %834 : vector<8x16xf32>
    %cst_262 = arith.constant 1.000000e+00 : f32
    %837 = vector.broadcast %cst_262 : f32 to vector<8x16xf32>
    %838 = arith.divf %837, %836 : vector<8x16xf32>
    %839 = arith.mulf %828, %805 : vector<8x16xf32>
    %840 = arith.mulf %820, %830 : vector<8x16xf32>
    %841 = arith.addf %839, %840 : vector<8x16xf32>
    %842 = math.tanh %841 : vector<8x16xf32>
    %843 = arith.mulf %838, %842 : vector<8x16xf32>
    %844 = vector.broadcast %1 : vector<8x1xf32> to vector<8x16xf32>
    %845 = arith.mulf %844, %843 : vector<8x16xf32>
    %cst_263 = arith.constant 1.000000e+00 : f32
    %846 = vector.broadcast %cst_263 : f32 to vector<8x1xf32>
    %847 = arith.subf %846, %1 : vector<8x1xf32>
    %848 = vector.broadcast %847 : vector<8x1xf32> to vector<8x16xf32>
    %849 = arith.mulf %848, %798 : vector<8x16xf32>
    %850 = arith.addf %845, %849 : vector<8x16xf32>
    %c8 = arith.constant 8 : index
    %c0_264 = arith.constant 0 : index
    %c0_265 = arith.constant 0 : index
    %851 = vector.load %arg19[%c8, %c0_264, %c0_265] : memref<32x8x16xf32, #tpu.memory_space<vmem>>, vector<1x8x16xf32>
    %852 = vector.shape_cast %851 : vector<1x8x16xf32> to vector<8x16xf32>
    %853 = vector.shape_cast %850 : vector<8x16xf32> to vector<1x8x16xf32>
    tpu.vector_store %arg19[%c8, %c0_264, %c0_265], %853 {strides = array<i32>} : memref<32x8x16xf32, #tpu.memory_space<vmem>>, vector<1x8x16xf32>,
    %c0_266 = arith.constant 0 : index
    %c0_267 = arith.constant 0 : index
    %c0_268 = arith.constant 0 : index
    %854 = vector.load %arg19[%c0_266, %c0_267, %c0_268] : memref<32x8x16xf32, #tpu.memory_space<vmem>>, vector<8x8x16xf32>
    %855 = vector.shape_cast %854 : vector<8x8x16xf32> to vector<64x16xf32>
    %c8_269 = arith.constant 8 : index
    %c0_270 = arith.constant 0 : index
    %c0_271 = arith.constant 0 : index
    %856 = vector.load %arg19[%c8_269, %c0_270, %c0_271] : memref<32x8x16xf32, #tpu.memory_space<vmem>>, vector<8x8x16xf32>
    %857 = vector.shape_cast %856 : vector<8x8x16xf32> to vector<64x16xf32>
    %c0_272 = arith.constant 0 : index
    %c0_273 = arith.constant 0 : index
    %858 = vector.load %arg8[%c0_272, %c0_273] : memref<32x64xf32, #tpu.memory_space<vmem>>, vector<32x64xf32>
    %c0_274 = arith.constant 0 : index
    %c0_275 = arith.constant 0 : index
    %859 = vector.load %arg9[%c0_274, %c0_275] : memref<16x64xf32, #tpu.memory_space<vmem>>, vector<16x64xf32>
    %c0_276 = arith.constant 0 : index
    %c0_277 = arith.constant 0 : index
    %860 = vector.load %arg10[%c0_276, %c0_277] : memref<1x64xf32, #tpu.memory_space<vmem>>, vector<1x64xf32>
    %861 = vector.extract_strided_slice %858 {offsets = [0, 0], sizes = [16, 64], strides = [1, 1]} : vector<32x64xf32> to vector<16x64xf32>
    %cst_278 = arith.constant dense<0.000000e+00> : vector<64x64xf32>
    %862 = tpu.matmul %855, %861, %cst_278 {dimension_numbers = #tpu.dot_dimension_numbers<[1], [0], [0], [1], [0, 0, 1, 1], [], []>} : vector<64x16xf32>, vector<16x64xf32>, vector<64x64xf32> -> vector<64x64xf32>
    %863 = vector.broadcast %860 : vector<1x64xf32> to vector<64x64xf32>
    %864 = arith.addf %862, %863 : vector<64x64xf32>
    %865 = vector.extract_strided_slice %858 {offsets = [16, 0], sizes = [16, 64], strides = [1, 1]} : vector<32x64xf32> to vector<16x64xf32>
    %cst_279 = arith.constant dense<0.000000e+00> : vector<64x64xf32>
    %866 = tpu.matmul %857, %865, %cst_279 {dimension_numbers = #tpu.dot_dimension_numbers<[1], [0], [0], [1], [0, 0, 1, 1], [], []>} : vector<64x16xf32>, vector<16x64xf32>, vector<64x64xf32> -> vector<64x64xf32>
    %867 = arith.addf %864, %866 : vector<64x64xf32>
    %868 = vector.shape_cast %867 : vector<64x64xf32> to vector<8x8x64xf32>
    %cst_280 = arith.constant 0.000000e+00 : f32
    %869 = vector.broadcast %cst_280 : f32 to vector<8x16xf32>
    %cst_281 = arith.constant 0.000000e+00 : f32
    %870 = vector.broadcast %cst_281 : f32 to vector<8x16xf32>
    %871 = vector.extract_strided_slice %868 {offsets = [0, 0, 0], sizes = [1, 8, 64], strides = [1, 1, 1]} : vector<8x8x64xf32> to vector<1x8x64xf32>
    %872 = vector.shape_cast %871 : vector<1x8x64xf32> to vector<8x64xf32>
    %cst_282 = arith.constant dense<0.000000e+00> : vector<8x64xf32>
    %873 = tpu.matmul %869, %859, %cst_282 {dimension_numbers = #tpu.dot_dimension_numbers<[1], [0], [0], [1], [0, 0, 1, 1], [], []>} : vector<8x16xf32>, vector<16x64xf32>, vector<8x64xf32> -> vector<8x64xf32>
    %874 = arith.addf %872, %873 : vector<8x64xf32>
    %875 = vector.extract_strided_slice %874 {offsets = [0, 0], sizes = [8, 16], strides = [1, 1]} : vector<8x64xf32> to vector<8x16xf32>
    %cst_283 = arith.constant 0.000000e+00 : f32
    %876 = vector.broadcast %cst_283 : f32 to vector<8x16xf32>
    %877 = arith.subf %876, %875 : vector<8x16xf32>
    %878 = math.exp %877 : vector<8x16xf32>
    %cst_284 = arith.constant 1.000000e+00 : f32
    %879 = vector.broadcast %cst_284 : f32 to vector<8x16xf32>
    %880 = arith.addf %879, %878 : vector<8x16xf32>
    %cst_285 = arith.constant 1.000000e+00 : f32
    %881 = vector.broadcast %cst_285 : f32 to vector<8x16xf32>
    %882 = arith.divf %881, %880 : vector<8x16xf32>
    %883 = vector.extract_strided_slice %874 {offsets = [0, 16], sizes = [8, 16], strides = [1, 1]} : vector<8x64xf32> to vector<8x16xf32>
    %cst_286 = arith.constant 0.000000e+00 : f32
    %884 = vector.broadcast %cst_286 : f32 to vector<8x16xf32>
    %885 = arith.subf %884, %883 : vector<8x16xf32>
    %886 = math.exp %885 : vector<8x16xf32>
    %cst_287 = arith.constant 1.000000e+00 : f32
    %887 = vector.broadcast %cst_287 : f32 to vector<8x16xf32>
    %888 = arith.addf %887, %886 : vector<8x16xf32>
    %cst_288 = arith.constant 1.000000e+00 : f32
    %889 = vector.broadcast %cst_288 : f32 to vector<8x16xf32>
    %890 = arith.divf %889, %888 : vector<8x16xf32>
    %891 = vector.extract_strided_slice %874 {offsets = [0, 32], sizes = [8, 16], strides = [1, 1]} : vector<8x64xf32> to vector<8x16xf32>
    %892 = math.tanh %891 : vector<8x16xf32>
    %893 = vector.extract_strided_slice %874 {offsets = [0, 48], sizes = [8, 16], strides = [1, 1]} : vector<8x64xf32> to vector<8x16xf32>
    %cst_289 = arith.constant 0.000000e+00 : f32
    %894 = vector.broadcast %cst_289 : f32 to vector<8x16xf32>
    %895 = arith.subf %894, %893 : vector<8x16xf32>
    %896 = math.exp %895 : vector<8x16xf32>
    %cst_290 = arith.constant 1.000000e+00 : f32
    %897 = vector.broadcast %cst_290 : f32 to vector<8x16xf32>
    %898 = arith.addf %897, %896 : vector<8x16xf32>
    %cst_291 = arith.constant 1.000000e+00 : f32
    %899 = vector.broadcast %cst_291 : f32 to vector<8x16xf32>
    %900 = arith.divf %899, %898 : vector<8x16xf32>
    %901 = arith.mulf %890, %870 : vector<8x16xf32>
    %902 = arith.mulf %882, %892 : vector<8x16xf32>
    %903 = arith.addf %901, %902 : vector<8x16xf32>
    %904 = math.tanh %903 : vector<8x16xf32>
    %905 = arith.mulf %900, %904 : vector<8x16xf32>
    %906 = vector.broadcast %1 : vector<8x1xf32> to vector<8x16xf32>
    %907 = arith.mulf %906, %905 : vector<8x16xf32>
    %cst_292 = arith.constant 1.000000e+00 : f32
    %908 = vector.broadcast %cst_292 : f32 to vector<8x1xf32>
    %909 = arith.subf %908, %1 : vector<8x1xf32>
    %910 = vector.broadcast %909 : vector<8x1xf32> to vector<8x16xf32>
    %911 = arith.mulf %910, %869 : vector<8x16xf32>
    %912 = arith.addf %907, %911 : vector<8x16xf32>
    %913 = vector.broadcast %1 : vector<8x1xf32> to vector<8x16xf32>
    %914 = arith.mulf %913, %903 : vector<8x16xf32>
    %cst_293 = arith.constant 1.000000e+00 : f32
    %915 = vector.broadcast %cst_293 : f32 to vector<8x1xf32>
    %916 = arith.subf %915, %1 : vector<8x1xf32>
    %917 = vector.broadcast %916 : vector<8x1xf32> to vector<8x16xf32>
    %918 = arith.mulf %917, %870 : vector<8x16xf32>
    %919 = arith.addf %914, %918 : vector<8x16xf32>
    %920 = vector.extract_strided_slice %868 {offsets = [1, 0, 0], sizes = [1, 8, 64], strides = [1, 1, 1]} : vector<8x8x64xf32> to vector<1x8x64xf32>
    %921 = vector.shape_cast %920 : vector<1x8x64xf32> to vector<8x64xf32>
    %cst_294 = arith.constant dense<0.000000e+00> : vector<8x64xf32>
    %922 = tpu.matmul %912, %859, %cst_294 {dimension_numbers = #tpu.dot_dimension_numbers<[1], [0], [0], [1], [0, 0, 1, 1], [], []>} : vector<8x16xf32>, vector<16x64xf32>, vector<8x64xf32> -> vector<8x64xf32>
    %923 = arith.addf %921, %922 : vector<8x64xf32>
    %924 = vector.extract_strided_slice %923 {offsets = [0, 0], sizes = [8, 16], strides = [1, 1]} : vector<8x64xf32> to vector<8x16xf32>
    %cst_295 = arith.constant 0.000000e+00 : f32
    %925 = vector.broadcast %cst_295 : f32 to vector<8x16xf32>
    %926 = arith.subf %925, %924 : vector<8x16xf32>
    %927 = math.exp %926 : vector<8x16xf32>
    %cst_296 = arith.constant 1.000000e+00 : f32
    %928 = vector.broadcast %cst_296 : f32 to vector<8x16xf32>
    %929 = arith.addf %928, %927 : vector<8x16xf32>
    %cst_297 = arith.constant 1.000000e+00 : f32
    %930 = vector.broadcast %cst_297 : f32 to vector<8x16xf32>
    %931 = arith.divf %930, %929 : vector<8x16xf32>
    %932 = vector.extract_strided_slice %923 {offsets = [0, 16], sizes = [8, 16], strides = [1, 1]} : vector<8x64xf32> to vector<8x16xf32>
    %cst_298 = arith.constant 0.000000e+00 : f32
    %933 = vector.broadcast %cst_298 : f32 to vector<8x16xf32>
    %934 = arith.subf %933, %932 : vector<8x16xf32>
    %935 = math.exp %934 : vector<8x16xf32>
    %cst_299 = arith.constant 1.000000e+00 : f32
    %936 = vector.broadcast %cst_299 : f32 to vector<8x16xf32>
    %937 = arith.addf %936, %935 : vector<8x16xf32>
    %cst_300 = arith.constant 1.000000e+00 : f32
    %938 = vector.broadcast %cst_300 : f32 to vector<8x16xf32>
    %939 = arith.divf %938, %937 : vector<8x16xf32>
    %940 = vector.extract_strided_slice %923 {offsets = [0, 32], sizes = [8, 16], strides = [1, 1]} : vector<8x64xf32> to vector<8x16xf32>
    %941 = math.tanh %940 : vector<8x16xf32>
    %942 = vector.extract_strided_slice %923 {offsets = [0, 48], sizes = [8, 16], strides = [1, 1]} : vector<8x64xf32> to vector<8x16xf32>
    %cst_301 = arith.constant 0.000000e+00 : f32
    %943 = vector.broadcast %cst_301 : f32 to vector<8x16xf32>
    %944 = arith.subf %943, %942 : vector<8x16xf32>
    %945 = math.exp %944 : vector<8x16xf32>
    %cst_302 = arith.constant 1.000000e+00 : f32
    %946 = vector.broadcast %cst_302 : f32 to vector<8x16xf32>
    %947 = arith.addf %946, %945 : vector<8x16xf32>
    %cst_303 = arith.constant 1.000000e+00 : f32
    %948 = vector.broadcast %cst_303 : f32 to vector<8x16xf32>
    %949 = arith.divf %948, %947 : vector<8x16xf32>
    %950 = arith.mulf %939, %919 : vector<8x16xf32>
    %951 = arith.mulf %931, %941 : vector<8x16xf32>
    %952 = arith.addf %950, %951 : vector<8x16xf32>
    %953 = math.tanh %952 : vector<8x16xf32>
    %954 = arith.mulf %949, %953 : vector<8x16xf32>
    %955 = vector.broadcast %3 : vector<8x1xf32> to vector<8x16xf32>
    %956 = arith.mulf %955, %954 : vector<8x16xf32>
    %cst_304 = arith.constant 1.000000e+00 : f32
    %957 = vector.broadcast %cst_304 : f32 to vector<8x1xf32>
    %958 = arith.subf %957, %3 : vector<8x1xf32>
    %959 = vector.broadcast %958 : vector<8x1xf32> to vector<8x16xf32>
    %960 = arith.mulf %959, %912 : vector<8x16xf32>
    %961 = arith.addf %956, %960 : vector<8x16xf32>
    %962 = vector.broadcast %3 : vector<8x1xf32> to vector<8x16xf32>
    %963 = arith.mulf %962, %952 : vector<8x16xf32>
    %cst_305 = arith.constant 1.000000e+00 : f32
    %964 = vector.broadcast %cst_305 : f32 to vector<8x1xf32>
    %965 = arith.subf %964, %3 : vector<8x1xf32>
    %966 = vector.broadcast %965 : vector<8x1xf32> to vector<8x16xf32>
    %967 = arith.mulf %966, %919 : vector<8x16xf32>
    %968 = arith.addf %963, %967 : vector<8x16xf32>
    %969 = vector.extract_strided_slice %868 {offsets = [2, 0, 0], sizes = [1, 8, 64], strides = [1, 1, 1]} : vector<8x8x64xf32> to vector<1x8x64xf32>
    %970 = vector.shape_cast %969 : vector<1x8x64xf32> to vector<8x64xf32>
    %cst_306 = arith.constant dense<0.000000e+00> : vector<8x64xf32>
    %971 = tpu.matmul %961, %859, %cst_306 {dimension_numbers = #tpu.dot_dimension_numbers<[1], [0], [0], [1], [0, 0, 1, 1], [], []>} : vector<8x16xf32>, vector<16x64xf32>, vector<8x64xf32> -> vector<8x64xf32>
    %972 = arith.addf %970, %971 : vector<8x64xf32>
    %973 = vector.extract_strided_slice %972 {offsets = [0, 0], sizes = [8, 16], strides = [1, 1]} : vector<8x64xf32> to vector<8x16xf32>
    %cst_307 = arith.constant 0.000000e+00 : f32
    %974 = vector.broadcast %cst_307 : f32 to vector<8x16xf32>
    %975 = arith.subf %974, %973 : vector<8x16xf32>
    %976 = math.exp %975 : vector<8x16xf32>
    %cst_308 = arith.constant 1.000000e+00 : f32
    %977 = vector.broadcast %cst_308 : f32 to vector<8x16xf32>
    %978 = arith.addf %977, %976 : vector<8x16xf32>
    %cst_309 = arith.constant 1.000000e+00 : f32
    %979 = vector.broadcast %cst_309 : f32 to vector<8x16xf32>
    %980 = arith.divf %979, %978 : vector<8x16xf32>
    %981 = vector.extract_strided_slice %972 {offsets = [0, 16], sizes = [8, 16], strides = [1, 1]} : vector<8x64xf32> to vector<8x16xf32>
    %cst_310 = arith.constant 0.000000e+00 : f32
    %982 = vector.broadcast %cst_310 : f32 to vector<8x16xf32>
    %983 = arith.subf %982, %981 : vector<8x16xf32>
    %984 = math.exp %983 : vector<8x16xf32>
    %cst_311 = arith.constant 1.000000e+00 : f32
    %985 = vector.broadcast %cst_311 : f32 to vector<8x16xf32>
    %986 = arith.addf %985, %984 : vector<8x16xf32>
    %cst_312 = arith.constant 1.000000e+00 : f32
    %987 = vector.broadcast %cst_312 : f32 to vector<8x16xf32>
    %988 = arith.divf %987, %986 : vector<8x16xf32>
    %989 = vector.extract_strided_slice %972 {offsets = [0, 32], sizes = [8, 16], strides = [1, 1]} : vector<8x64xf32> to vector<8x16xf32>
    %990 = math.tanh %989 : vector<8x16xf32>
    %991 = vector.extract_strided_slice %972 {offsets = [0, 48], sizes = [8, 16], strides = [1, 1]} : vector<8x64xf32> to vector<8x16xf32>
    %cst_313 = arith.constant 0.000000e+00 : f32
    %992 = vector.broadcast %cst_313 : f32 to vector<8x16xf32>
    %993 = arith.subf %992, %991 : vector<8x16xf32>
    %994 = math.exp %993 : vector<8x16xf32>
    %cst_314 = arith.constant 1.000000e+00 : f32
    %995 = vector.broadcast %cst_314 : f32 to vector<8x16xf32>
    %996 = arith.addf %995, %994 : vector<8x16xf32>
    %cst_315 = arith.constant 1.000000e+00 : f32
    %997 = vector.broadcast %cst_315 : f32 to vector<8x16xf32>
    %998 = arith.divf %997, %996 : vector<8x16xf32>
    %999 = arith.mulf %988, %968 : vector<8x16xf32>
    %1000 = arith.mulf %980, %990 : vector<8x16xf32>
    %1001 = arith.addf %999, %1000 : vector<8x16xf32>
    %1002 = math.tanh %1001 : vector<8x16xf32>
    %1003 = arith.mulf %998, %1002 : vector<8x16xf32>
    %1004 = vector.broadcast %5 : vector<8x1xf32> to vector<8x16xf32>
    %1005 = arith.mulf %1004, %1003 : vector<8x16xf32>
    %cst_316 = arith.constant 1.000000e+00 : f32
    %1006 = vector.broadcast %cst_316 : f32 to vector<8x1xf32>
    %1007 = arith.subf %1006, %5 : vector<8x1xf32>
    %1008 = vector.broadcast %1007 : vector<8x1xf32> to vector<8x16xf32>
    %1009 = arith.mulf %1008, %961 : vector<8x16xf32>
    %1010 = arith.addf %1005, %1009 : vector<8x16xf32>
    %1011 = vector.broadcast %5 : vector<8x1xf32> to vector<8x16xf32>
    %1012 = arith.mulf %1011, %1001 : vector<8x16xf32>
    %cst_317 = arith.constant 1.000000e+00 : f32
    %1013 = vector.broadcast %cst_317 : f32 to vector<8x1xf32>
    %1014 = arith.subf %1013, %5 : vector<8x1xf32>
    %1015 = vector.broadcast %1014 : vector<8x1xf32> to vector<8x16xf32>
    %1016 = arith.mulf %1015, %968 : vector<8x16xf32>
    %1017 = arith.addf %1012, %1016 : vector<8x16xf32>
    %1018 = vector.extract_strided_slice %868 {offsets = [3, 0, 0], sizes = [1, 8, 64], strides = [1, 1, 1]} : vector<8x8x64xf32> to vector<1x8x64xf32>
    %1019 = vector.shape_cast %1018 : vector<1x8x64xf32> to vector<8x64xf32>
    %cst_318 = arith.constant dense<0.000000e+00> : vector<8x64xf32>
    %1020 = tpu.matmul %1010, %859, %cst_318 {dimension_numbers = #tpu.dot_dimension_numbers<[1], [0], [0], [1], [0, 0, 1, 1], [], []>} : vector<8x16xf32>, vector<16x64xf32>, vector<8x64xf32> -> vector<8x64xf32>
    %1021 = arith.addf %1019, %1020 : vector<8x64xf32>
    %1022 = vector.extract_strided_slice %1021 {offsets = [0, 0], sizes = [8, 16], strides = [1, 1]} : vector<8x64xf32> to vector<8x16xf32>
    %cst_319 = arith.constant 0.000000e+00 : f32
    %1023 = vector.broadcast %cst_319 : f32 to vector<8x16xf32>
    %1024 = arith.subf %1023, %1022 : vector<8x16xf32>
    %1025 = math.exp %1024 : vector<8x16xf32>
    %cst_320 = arith.constant 1.000000e+00 : f32
    %1026 = vector.broadcast %cst_320 : f32 to vector<8x16xf32>
    %1027 = arith.addf %1026, %1025 : vector<8x16xf32>
    %cst_321 = arith.constant 1.000000e+00 : f32
    %1028 = vector.broadcast %cst_321 : f32 to vector<8x16xf32>
    %1029 = arith.divf %1028, %1027 : vector<8x16xf32>
    %1030 = vector.extract_strided_slice %1021 {offsets = [0, 16], sizes = [8, 16], strides = [1, 1]} : vector<8x64xf32> to vector<8x16xf32>
    %cst_322 = arith.constant 0.000000e+00 : f32
    %1031 = vector.broadcast %cst_322 : f32 to vector<8x16xf32>
    %1032 = arith.subf %1031, %1030 : vector<8x16xf32>
    %1033 = math.exp %1032 : vector<8x16xf32>
    %cst_323 = arith.constant 1.000000e+00 : f32
    %1034 = vector.broadcast %cst_323 : f32 to vector<8x16xf32>
    %1035 = arith.addf %1034, %1033 : vector<8x16xf32>
    %cst_324 = arith.constant 1.000000e+00 : f32
    %1036 = vector.broadcast %cst_324 : f32 to vector<8x16xf32>
    %1037 = arith.divf %1036, %1035 : vector<8x16xf32>
    %1038 = vector.extract_strided_slice %1021 {offsets = [0, 32], sizes = [8, 16], strides = [1, 1]} : vector<8x64xf32> to vector<8x16xf32>
    %1039 = math.tanh %1038 : vector<8x16xf32>
    %1040 = vector.extract_strided_slice %1021 {offsets = [0, 48], sizes = [8, 16], strides = [1, 1]} : vector<8x64xf32> to vector<8x16xf32>
    %cst_325 = arith.constant 0.000000e+00 : f32
    %1041 = vector.broadcast %cst_325 : f32 to vector<8x16xf32>
    %1042 = arith.subf %1041, %1040 : vector<8x16xf32>
    %1043 = math.exp %1042 : vector<8x16xf32>
    %cst_326 = arith.constant 1.000000e+00 : f32
    %1044 = vector.broadcast %cst_326 : f32 to vector<8x16xf32>
    %1045 = arith.addf %1044, %1043 : vector<8x16xf32>
    %cst_327 = arith.constant 1.000000e+00 : f32
    %1046 = vector.broadcast %cst_327 : f32 to vector<8x16xf32>
    %1047 = arith.divf %1046, %1045 : vector<8x16xf32>
    %1048 = arith.mulf %1037, %1017 : vector<8x16xf32>
    %1049 = arith.mulf %1029, %1039 : vector<8x16xf32>
    %1050 = arith.addf %1048, %1049 : vector<8x16xf32>
    %1051 = math.tanh %1050 : vector<8x16xf32>
    %1052 = arith.mulf %1047, %1051 : vector<8x16xf32>
    %1053 = vector.broadcast %7 : vector<8x1xf32> to vector<8x16xf32>
    %1054 = arith.mulf %1053, %1052 : vector<8x16xf32>
    %cst_328 = arith.constant 1.000000e+00 : f32
    %1055 = vector.broadcast %cst_328 : f32 to vector<8x1xf32>
    %1056 = arith.subf %1055, %7 : vector<8x1xf32>
    %1057 = vector.broadcast %1056 : vector<8x1xf32> to vector<8x16xf32>
    %1058 = arith.mulf %1057, %1010 : vector<8x16xf32>
    %1059 = arith.addf %1054, %1058 : vector<8x16xf32>
    %1060 = vector.broadcast %7 : vector<8x1xf32> to vector<8x16xf32>
    %1061 = arith.mulf %1060, %1050 : vector<8x16xf32>
    %cst_329 = arith.constant 1.000000e+00 : f32
    %1062 = vector.broadcast %cst_329 : f32 to vector<8x1xf32>
    %1063 = arith.subf %1062, %7 : vector<8x1xf32>
    %1064 = vector.broadcast %1063 : vector<8x1xf32> to vector<8x16xf32>
    %1065 = arith.mulf %1064, %1017 : vector<8x16xf32>
    %1066 = arith.addf %1061, %1065 : vector<8x16xf32>
    %1067 = vector.extract_strided_slice %868 {offsets = [4, 0, 0], sizes = [1, 8, 64], strides = [1, 1, 1]} : vector<8x8x64xf32> to vector<1x8x64xf32>
    %1068 = vector.shape_cast %1067 : vector<1x8x64xf32> to vector<8x64xf32>
    %cst_330 = arith.constant dense<0.000000e+00> : vector<8x64xf32>
    %1069 = tpu.matmul %1059, %859, %cst_330 {dimension_numbers = #tpu.dot_dimension_numbers<[1], [0], [0], [1], [0, 0, 1, 1], [], []>} : vector<8x16xf32>, vector<16x64xf32>, vector<8x64xf32> -> vector<8x64xf32>
    %1070 = arith.addf %1068, %1069 : vector<8x64xf32>
    %1071 = vector.extract_strided_slice %1070 {offsets = [0, 0], sizes = [8, 16], strides = [1, 1]} : vector<8x64xf32> to vector<8x16xf32>
    %cst_331 = arith.constant 0.000000e+00 : f32
    %1072 = vector.broadcast %cst_331 : f32 to vector<8x16xf32>
    %1073 = arith.subf %1072, %1071 : vector<8x16xf32>
    %1074 = math.exp %1073 : vector<8x16xf32>
    %cst_332 = arith.constant 1.000000e+00 : f32
    %1075 = vector.broadcast %cst_332 : f32 to vector<8x16xf32>
    %1076 = arith.addf %1075, %1074 : vector<8x16xf32>
    %cst_333 = arith.constant 1.000000e+00 : f32
    %1077 = vector.broadcast %cst_333 : f32 to vector<8x16xf32>
    %1078 = arith.divf %1077, %1076 : vector<8x16xf32>
    %1079 = vector.extract_strided_slice %1070 {offsets = [0, 16], sizes = [8, 16], strides = [1, 1]} : vector<8x64xf32> to vector<8x16xf32>
    %cst_334 = arith.constant 0.000000e+00 : f32
    %1080 = vector.broadcast %cst_334 : f32 to vector<8x16xf32>
    %1081 = arith.subf %1080, %1079 : vector<8x16xf32>
    %1082 = math.exp %1081 : vector<8x16xf32>
    %cst_335 = arith.constant 1.000000e+00 : f32
    %1083 = vector.broadcast %cst_335 : f32 to vector<8x16xf32>
    %1084 = arith.addf %1083, %1082 : vector<8x16xf32>
    %cst_336 = arith.constant 1.000000e+00 : f32
    %1085 = vector.broadcast %cst_336 : f32 to vector<8x16xf32>
    %1086 = arith.divf %1085, %1084 : vector<8x16xf32>
    %1087 = vector.extract_strided_slice %1070 {offsets = [0, 32], sizes = [8, 16], strides = [1, 1]} : vector<8x64xf32> to vector<8x16xf32>
    %1088 = math.tanh %1087 : vector<8x16xf32>
    %1089 = vector.extract_strided_slice %1070 {offsets = [0, 48], sizes = [8, 16], strides = [1, 1]} : vector<8x64xf32> to vector<8x16xf32>
    %cst_337 = arith.constant 0.000000e+00 : f32
    %1090 = vector.broadcast %cst_337 : f32 to vector<8x16xf32>
    %1091 = arith.subf %1090, %1089 : vector<8x16xf32>
    %1092 = math.exp %1091 : vector<8x16xf32>
    %cst_338 = arith.constant 1.000000e+00 : f32
    %1093 = vector.broadcast %cst_338 : f32 to vector<8x16xf32>
    %1094 = arith.addf %1093, %1092 : vector<8x16xf32>
    %cst_339 = arith.constant 1.000000e+00 : f32
    %1095 = vector.broadcast %cst_339 : f32 to vector<8x16xf32>
    %1096 = arith.divf %1095, %1094 : vector<8x16xf32>
    %1097 = arith.mulf %1086, %1066 : vector<8x16xf32>
    %1098 = arith.mulf %1078, %1088 : vector<8x16xf32>
    %1099 = arith.addf %1097, %1098 : vector<8x16xf32>
    %1100 = math.tanh %1099 : vector<8x16xf32>
    %1101 = arith.mulf %1096, %1100 : vector<8x16xf32>
    %1102 = vector.broadcast %9 : vector<8x1xf32> to vector<8x16xf32>
    %1103 = arith.mulf %1102, %1101 : vector<8x16xf32>
    %cst_340 = arith.constant 1.000000e+00 : f32
    %1104 = vector.broadcast %cst_340 : f32 to vector<8x1xf32>
    %1105 = arith.subf %1104, %9 : vector<8x1xf32>
    %1106 = vector.broadcast %1105 : vector<8x1xf32> to vector<8x16xf32>
    %1107 = arith.mulf %1106, %1059 : vector<8x16xf32>
    %1108 = arith.addf %1103, %1107 : vector<8x16xf32>
    %1109 = vector.broadcast %9 : vector<8x1xf32> to vector<8x16xf32>
    %1110 = arith.mulf %1109, %1099 : vector<8x16xf32>
    %cst_341 = arith.constant 1.000000e+00 : f32
    %1111 = vector.broadcast %cst_341 : f32 to vector<8x1xf32>
    %1112 = arith.subf %1111, %9 : vector<8x1xf32>
    %1113 = vector.broadcast %1112 : vector<8x1xf32> to vector<8x16xf32>
    %1114 = arith.mulf %1113, %1066 : vector<8x16xf32>
    %1115 = arith.addf %1110, %1114 : vector<8x16xf32>
    %1116 = vector.extract_strided_slice %868 {offsets = [5, 0, 0], sizes = [1, 8, 64], strides = [1, 1, 1]} : vector<8x8x64xf32> to vector<1x8x64xf32>
    %1117 = vector.shape_cast %1116 : vector<1x8x64xf32> to vector<8x64xf32>
    %cst_342 = arith.constant dense<0.000000e+00> : vector<8x64xf32>
    %1118 = tpu.matmul %1108, %859, %cst_342 {dimension_numbers = #tpu.dot_dimension_numbers<[1], [0], [0], [1], [0, 0, 1, 1], [], []>} : vector<8x16xf32>, vector<16x64xf32>, vector<8x64xf32> -> vector<8x64xf32>
    %1119 = arith.addf %1117, %1118 : vector<8x64xf32>
    %1120 = vector.extract_strided_slice %1119 {offsets = [0, 0], sizes = [8, 16], strides = [1, 1]} : vector<8x64xf32> to vector<8x16xf32>
    %cst_343 = arith.constant 0.000000e+00 : f32
    %1121 = vector.broadcast %cst_343 : f32 to vector<8x16xf32>
    %1122 = arith.subf %1121, %1120 : vector<8x16xf32>
    %1123 = math.exp %1122 : vector<8x16xf32>
    %cst_344 = arith.constant 1.000000e+00 : f32
    %1124 = vector.broadcast %cst_344 : f32 to vector<8x16xf32>
    %1125 = arith.addf %1124, %1123 : vector<8x16xf32>
    %cst_345 = arith.constant 1.000000e+00 : f32
    %1126 = vector.broadcast %cst_345 : f32 to vector<8x16xf32>
    %1127 = arith.divf %1126, %1125 : vector<8x16xf32>
    %1128 = vector.extract_strided_slice %1119 {offsets = [0, 16], sizes = [8, 16], strides = [1, 1]} : vector<8x64xf32> to vector<8x16xf32>
    %cst_346 = arith.constant 0.000000e+00 : f32
    %1129 = vector.broadcast %cst_346 : f32 to vector<8x16xf32>
    %1130 = arith.subf %1129, %1128 : vector<8x16xf32>
    %1131 = math.exp %1130 : vector<8x16xf32>
    %cst_347 = arith.constant 1.000000e+00 : f32
    %1132 = vector.broadcast %cst_347 : f32 to vector<8x16xf32>
    %1133 = arith.addf %1132, %1131 : vector<8x16xf32>
    %cst_348 = arith.constant 1.000000e+00 : f32
    %1134 = vector.broadcast %cst_348 : f32 to vector<8x16xf32>
    %1135 = arith.divf %1134, %1133 : vector<8x16xf32>
    %1136 = vector.extract_strided_slice %1119 {offsets = [0, 32], sizes = [8, 16], strides = [1, 1]} : vector<8x64xf32> to vector<8x16xf32>
    %1137 = math.tanh %1136 : vector<8x16xf32>
    %1138 = vector.extract_strided_slice %1119 {offsets = [0, 48], sizes = [8, 16], strides = [1, 1]} : vector<8x64xf32> to vector<8x16xf32>
    %cst_349 = arith.constant 0.000000e+00 : f32
    %1139 = vector.broadcast %cst_349 : f32 to vector<8x16xf32>
    %1140 = arith.subf %1139, %1138 : vector<8x16xf32>
    %1141 = math.exp %1140 : vector<8x16xf32>
    %cst_350 = arith.constant 1.000000e+00 : f32
    %1142 = vector.broadcast %cst_350 : f32 to vector<8x16xf32>
    %1143 = arith.addf %1142, %1141 : vector<8x16xf32>
    %cst_351 = arith.constant 1.000000e+00 : f32
    %1144 = vector.broadcast %cst_351 : f32 to vector<8x16xf32>
    %1145 = arith.divf %1144, %1143 : vector<8x16xf32>
    %1146 = arith.mulf %1135, %1115 : vector<8x16xf32>
    %1147 = arith.mulf %1127, %1137 : vector<8x16xf32>
    %1148 = arith.addf %1146, %1147 : vector<8x16xf32>
    %1149 = math.tanh %1148 : vector<8x16xf32>
    %1150 = arith.mulf %1145, %1149 : vector<8x16xf32>
    %1151 = vector.broadcast %11 : vector<8x1xf32> to vector<8x16xf32>
    %1152 = arith.mulf %1151, %1150 : vector<8x16xf32>
    %cst_352 = arith.constant 1.000000e+00 : f32
    %1153 = vector.broadcast %cst_352 : f32 to vector<8x1xf32>
    %1154 = arith.subf %1153, %11 : vector<8x1xf32>
    %1155 = vector.broadcast %1154 : vector<8x1xf32> to vector<8x16xf32>
    %1156 = arith.mulf %1155, %1108 : vector<8x16xf32>
    %1157 = arith.addf %1152, %1156 : vector<8x16xf32>
    %1158 = vector.broadcast %11 : vector<8x1xf32> to vector<8x16xf32>
    %1159 = arith.mulf %1158, %1148 : vector<8x16xf32>
    %cst_353 = arith.constant 1.000000e+00 : f32
    %1160 = vector.broadcast %cst_353 : f32 to vector<8x1xf32>
    %1161 = arith.subf %1160, %11 : vector<8x1xf32>
    %1162 = vector.broadcast %1161 : vector<8x1xf32> to vector<8x16xf32>
    %1163 = arith.mulf %1162, %1115 : vector<8x16xf32>
    %1164 = arith.addf %1159, %1163 : vector<8x16xf32>
    %1165 = vector.extract_strided_slice %868 {offsets = [6, 0, 0], sizes = [1, 8, 64], strides = [1, 1, 1]} : vector<8x8x64xf32> to vector<1x8x64xf32>
    %1166 = vector.shape_cast %1165 : vector<1x8x64xf32> to vector<8x64xf32>
    %cst_354 = arith.constant dense<0.000000e+00> : vector<8x64xf32>
    %1167 = tpu.matmul %1157, %859, %cst_354 {dimension_numbers = #tpu.dot_dimension_numbers<[1], [0], [0], [1], [0, 0, 1, 1], [], []>} : vector<8x16xf32>, vector<16x64xf32>, vector<8x64xf32> -> vector<8x64xf32>
    %1168 = arith.addf %1166, %1167 : vector<8x64xf32>
    %1169 = vector.extract_strided_slice %1168 {offsets = [0, 0], sizes = [8, 16], strides = [1, 1]} : vector<8x64xf32> to vector<8x16xf32>
    %cst_355 = arith.constant 0.000000e+00 : f32
    %1170 = vector.broadcast %cst_355 : f32 to vector<8x16xf32>
    %1171 = arith.subf %1170, %1169 : vector<8x16xf32>
    %1172 = math.exp %1171 : vector<8x16xf32>
    %cst_356 = arith.constant 1.000000e+00 : f32
    %1173 = vector.broadcast %cst_356 : f32 to vector<8x16xf32>
    %1174 = arith.addf %1173, %1172 : vector<8x16xf32>
    %cst_357 = arith.constant 1.000000e+00 : f32
    %1175 = vector.broadcast %cst_357 : f32 to vector<8x16xf32>
    %1176 = arith.divf %1175, %1174 : vector<8x16xf32>
    %1177 = vector.extract_strided_slice %1168 {offsets = [0, 16], sizes = [8, 16], strides = [1, 1]} : vector<8x64xf32> to vector<8x16xf32>
    %cst_358 = arith.constant 0.000000e+00 : f32
    %1178 = vector.broadcast %cst_358 : f32 to vector<8x16xf32>
    %1179 = arith.subf %1178, %1177 : vector<8x16xf32>
    %1180 = math.exp %1179 : vector<8x16xf32>
    %cst_359 = arith.constant 1.000000e+00 : f32
    %1181 = vector.broadcast %cst_359 : f32 to vector<8x16xf32>
    %1182 = arith.addf %1181, %1180 : vector<8x16xf32>
    %cst_360 = arith.constant 1.000000e+00 : f32
    %1183 = vector.broadcast %cst_360 : f32 to vector<8x16xf32>
    %1184 = arith.divf %1183, %1182 : vector<8x16xf32>
    %1185 = vector.extract_strided_slice %1168 {offsets = [0, 32], sizes = [8, 16], strides = [1, 1]} : vector<8x64xf32> to vector<8x16xf32>
    %1186 = math.tanh %1185 : vector<8x16xf32>
    %1187 = vector.extract_strided_slice %1168 {offsets = [0, 48], sizes = [8, 16], strides = [1, 1]} : vector<8x64xf32> to vector<8x16xf32>
    %cst_361 = arith.constant 0.000000e+00 : f32
    %1188 = vector.broadcast %cst_361 : f32 to vector<8x16xf32>
    %1189 = arith.subf %1188, %1187 : vector<8x16xf32>
    %1190 = math.exp %1189 : vector<8x16xf32>
    %cst_362 = arith.constant 1.000000e+00 : f32
    %1191 = vector.broadcast %cst_362 : f32 to vector<8x16xf32>
    %1192 = arith.addf %1191, %1190 : vector<8x16xf32>
    %cst_363 = arith.constant 1.000000e+00 : f32
    %1193 = vector.broadcast %cst_363 : f32 to vector<8x16xf32>
    %1194 = arith.divf %1193, %1192 : vector<8x16xf32>
    %1195 = arith.mulf %1184, %1164 : vector<8x16xf32>
    %1196 = arith.mulf %1176, %1186 : vector<8x16xf32>
    %1197 = arith.addf %1195, %1196 : vector<8x16xf32>
    %1198 = math.tanh %1197 : vector<8x16xf32>
    %1199 = arith.mulf %1194, %1198 : vector<8x16xf32>
    %1200 = vector.broadcast %13 : vector<8x1xf32> to vector<8x16xf32>
    %1201 = arith.mulf %1200, %1199 : vector<8x16xf32>
    %cst_364 = arith.constant 1.000000e+00 : f32
    %1202 = vector.broadcast %cst_364 : f32 to vector<8x1xf32>
    %1203 = arith.subf %1202, %13 : vector<8x1xf32>
    %1204 = vector.broadcast %1203 : vector<8x1xf32> to vector<8x16xf32>
    %1205 = arith.mulf %1204, %1157 : vector<8x16xf32>
    %1206 = arith.addf %1201, %1205 : vector<8x16xf32>
    %1207 = vector.broadcast %13 : vector<8x1xf32> to vector<8x16xf32>
    %1208 = arith.mulf %1207, %1197 : vector<8x16xf32>
    %cst_365 = arith.constant 1.000000e+00 : f32
    %1209 = vector.broadcast %cst_365 : f32 to vector<8x1xf32>
    %1210 = arith.subf %1209, %13 : vector<8x1xf32>
    %1211 = vector.broadcast %1210 : vector<8x1xf32> to vector<8x16xf32>
    %1212 = arith.mulf %1211, %1164 : vector<8x16xf32>
    %1213 = arith.addf %1208, %1212 : vector<8x16xf32>
    %1214 = vector.extract_strided_slice %868 {offsets = [7, 0, 0], sizes = [1, 8, 64], strides = [1, 1, 1]} : vector<8x8x64xf32> to vector<1x8x64xf32>
    %1215 = vector.shape_cast %1214 : vector<1x8x64xf32> to vector<8x64xf32>
    %cst_366 = arith.constant dense<0.000000e+00> : vector<8x64xf32>
    %1216 = tpu.matmul %1206, %859, %cst_366 {dimension_numbers = #tpu.dot_dimension_numbers<[1], [0], [0], [1], [0, 0, 1, 1], [], []>} : vector<8x16xf32>, vector<16x64xf32>, vector<8x64xf32> -> vector<8x64xf32>
    %1217 = arith.addf %1215, %1216 : vector<8x64xf32>
    %1218 = vector.extract_strided_slice %1217 {offsets = [0, 0], sizes = [8, 16], strides = [1, 1]} : vector<8x64xf32> to vector<8x16xf32>
    %cst_367 = arith.constant 0.000000e+00 : f32
    %1219 = vector.broadcast %cst_367 : f32 to vector<8x16xf32>
    %1220 = arith.subf %1219, %1218 : vector<8x16xf32>
    %1221 = math.exp %1220 : vector<8x16xf32>
    %cst_368 = arith.constant 1.000000e+00 : f32
    %1222 = vector.broadcast %cst_368 : f32 to vector<8x16xf32>
    %1223 = arith.addf %1222, %1221 : vector<8x16xf32>
    %cst_369 = arith.constant 1.000000e+00 : f32
    %1224 = vector.broadcast %cst_369 : f32 to vector<8x16xf32>
    %1225 = arith.divf %1224, %1223 : vector<8x16xf32>
    %1226 = vector.extract_strided_slice %1217 {offsets = [0, 16], sizes = [8, 16], strides = [1, 1]} : vector<8x64xf32> to vector<8x16xf32>
    %cst_370 = arith.constant 0.000000e+00 : f32
    %1227 = vector.broadcast %cst_370 : f32 to vector<8x16xf32>
    %1228 = arith.subf %1227, %1226 : vector<8x16xf32>
    %1229 = math.exp %1228 : vector<8x16xf32>
    %cst_371 = arith.constant 1.000000e+00 : f32
    %1230 = vector.broadcast %cst_371 : f32 to vector<8x16xf32>
    %1231 = arith.addf %1230, %1229 : vector<8x16xf32>
    %cst_372 = arith.constant 1.000000e+00 : f32
    %1232 = vector.broadcast %cst_372 : f32 to vector<8x16xf32>
    %1233 = arith.divf %1232, %1231 : vector<8x16xf32>
    %1234 = vector.extract_strided_slice %1217 {offsets = [0, 32], sizes = [8, 16], strides = [1, 1]} : vector<8x64xf32> to vector<8x16xf32>
    %1235 = math.tanh %1234 : vector<8x16xf32>
    %1236 = vector.extract_strided_slice %1217 {offsets = [0, 48], sizes = [8, 16], strides = [1, 1]} : vector<8x64xf32> to vector<8x16xf32>
    %cst_373 = arith.constant 0.000000e+00 : f32
    %1237 = vector.broadcast %cst_373 : f32 to vector<8x16xf32>
    %1238 = arith.subf %1237, %1236 : vector<8x16xf32>
    %1239 = math.exp %1238 : vector<8x16xf32>
    %cst_374 = arith.constant 1.000000e+00 : f32
    %1240 = vector.broadcast %cst_374 : f32 to vector<8x16xf32>
    %1241 = arith.addf %1240, %1239 : vector<8x16xf32>
    %cst_375 = arith.constant 1.000000e+00 : f32
    %1242 = vector.broadcast %cst_375 : f32 to vector<8x16xf32>
    %1243 = arith.divf %1242, %1241 : vector<8x16xf32>
    %1244 = arith.mulf %1233, %1213 : vector<8x16xf32>
    %1245 = arith.mulf %1225, %1235 : vector<8x16xf32>
    %1246 = arith.addf %1244, %1245 : vector<8x16xf32>
    %1247 = math.tanh %1246 : vector<8x16xf32>
    %1248 = arith.mulf %1243, %1247 : vector<8x16xf32>
    %1249 = vector.broadcast %15 : vector<8x1xf32> to vector<8x16xf32>
    %1250 = arith.mulf %1249, %1248 : vector<8x16xf32>
    %cst_376 = arith.constant 1.000000e+00 : f32
    %1251 = vector.broadcast %cst_376 : f32 to vector<8x1xf32>
    %1252 = arith.subf %1251, %15 : vector<8x1xf32>
    %1253 = vector.broadcast %1252 : vector<8x1xf32> to vector<8x16xf32>
    %1254 = arith.mulf %1253, %1206 : vector<8x16xf32>
    %1255 = arith.addf %1250, %1254 : vector<8x16xf32>
    %c0_377 = arith.constant 0 : index
    %c0_378 = arith.constant 0 : index
    %1256 = vector.load %arg11[%c0_377, %c0_378] : memref<32x64xf32, #tpu.memory_space<vmem>>, vector<32x64xf32>
    %c0_379 = arith.constant 0 : index
    %c0_380 = arith.constant 0 : index
    %1257 = vector.load %arg12[%c0_379, %c0_380] : memref<16x64xf32, #tpu.memory_space<vmem>>, vector<16x64xf32>
    %c0_381 = arith.constant 0 : index
    %c0_382 = arith.constant 0 : index
    %1258 = vector.load %arg13[%c0_381, %c0_382] : memref<1x64xf32, #tpu.memory_space<vmem>>, vector<1x64xf32>
    %1259 = vector.extract_strided_slice %1256 {offsets = [0, 0], sizes = [16, 64], strides = [1, 1]} : vector<32x64xf32> to vector<16x64xf32>
    %cst_383 = arith.constant dense<0.000000e+00> : vector<64x64xf32>
    %1260 = tpu.matmul %855, %1259, %cst_383 {dimension_numbers = #tpu.dot_dimension_numbers<[1], [0], [0], [1], [0, 0, 1, 1], [], []>} : vector<64x16xf32>, vector<16x64xf32>, vector<64x64xf32> -> vector<64x64xf32>
    %1261 = vector.broadcast %1258 : vector<1x64xf32> to vector<64x64xf32>
    %1262 = arith.addf %1260, %1261 : vector<64x64xf32>
    %1263 = vector.extract_strided_slice %1256 {offsets = [16, 0], sizes = [16, 64], strides = [1, 1]} : vector<32x64xf32> to vector<16x64xf32>
    %cst_384 = arith.constant dense<0.000000e+00> : vector<64x64xf32>
    %1264 = tpu.matmul %857, %1263, %cst_384 {dimension_numbers = #tpu.dot_dimension_numbers<[1], [0], [0], [1], [0, 0, 1, 1], [], []>} : vector<64x16xf32>, vector<16x64xf32>, vector<64x64xf32> -> vector<64x64xf32>
    %1265 = arith.addf %1262, %1264 : vector<64x64xf32>
    %1266 = vector.shape_cast %1265 : vector<64x64xf32> to vector<8x8x64xf32>
    %cst_385 = arith.constant 0.000000e+00 : f32
    %1267 = vector.broadcast %cst_385 : f32 to vector<8x16xf32>
    %cst_386 = arith.constant 0.000000e+00 : f32
    %1268 = vector.broadcast %cst_386 : f32 to vector<8x16xf32>
    %1269 = vector.extract_strided_slice %1266 {offsets = [7, 0, 0], sizes = [1, 8, 64], strides = [1, 1, 1]} : vector<8x8x64xf32> to vector<1x8x64xf32>
    %1270 = vector.shape_cast %1269 : vector<1x8x64xf32> to vector<8x64xf32>
    %cst_387 = arith.constant dense<0.000000e+00> : vector<8x64xf32>
    %1271 = tpu.matmul %1267, %1257, %cst_387 {dimension_numbers = #tpu.dot_dimension_numbers<[1], [0], [0], [1], [0, 0, 1, 1], [], []>} : vector<8x16xf32>, vector<16x64xf32>, vector<8x64xf32> -> vector<8x64xf32>
    %1272 = arith.addf %1270, %1271 : vector<8x64xf32>
    %1273 = vector.extract_strided_slice %1272 {offsets = [0, 0], sizes = [8, 16], strides = [1, 1]} : vector<8x64xf32> to vector<8x16xf32>
    %cst_388 = arith.constant 0.000000e+00 : f32
    %1274 = vector.broadcast %cst_388 : f32 to vector<8x16xf32>
    %1275 = arith.subf %1274, %1273 : vector<8x16xf32>
    %1276 = math.exp %1275 : vector<8x16xf32>
    %cst_389 = arith.constant 1.000000e+00 : f32
    %1277 = vector.broadcast %cst_389 : f32 to vector<8x16xf32>
    %1278 = arith.addf %1277, %1276 : vector<8x16xf32>
    %cst_390 = arith.constant 1.000000e+00 : f32
    %1279 = vector.broadcast %cst_390 : f32 to vector<8x16xf32>
    %1280 = arith.divf %1279, %1278 : vector<8x16xf32>
    %1281 = vector.extract_strided_slice %1272 {offsets = [0, 16], sizes = [8, 16], strides = [1, 1]} : vector<8x64xf32> to vector<8x16xf32>
    %cst_391 = arith.constant 0.000000e+00 : f32
    %1282 = vector.broadcast %cst_391 : f32 to vector<8x16xf32>
    %1283 = arith.subf %1282, %1281 : vector<8x16xf32>
    %1284 = math.exp %1283 : vector<8x16xf32>
    %cst_392 = arith.constant 1.000000e+00 : f32
    %1285 = vector.broadcast %cst_392 : f32 to vector<8x16xf32>
    %1286 = arith.addf %1285, %1284 : vector<8x16xf32>
    %cst_393 = arith.constant 1.000000e+00 : f32
    %1287 = vector.broadcast %cst_393 : f32 to vector<8x16xf32>
    %1288 = arith.divf %1287, %1286 : vector<8x16xf32>
    %1289 = vector.extract_strided_slice %1272 {offsets = [0, 32], sizes = [8, 16], strides = [1, 1]} : vector<8x64xf32> to vector<8x16xf32>
    %1290 = math.tanh %1289 : vector<8x16xf32>
    %1291 = vector.extract_strided_slice %1272 {offsets = [0, 48], sizes = [8, 16], strides = [1, 1]} : vector<8x64xf32> to vector<8x16xf32>
    %cst_394 = arith.constant 0.000000e+00 : f32
    %1292 = vector.broadcast %cst_394 : f32 to vector<8x16xf32>
    %1293 = arith.subf %1292, %1291 : vector<8x16xf32>
    %1294 = math.exp %1293 : vector<8x16xf32>
    %cst_395 = arith.constant 1.000000e+00 : f32
    %1295 = vector.broadcast %cst_395 : f32 to vector<8x16xf32>
    %1296 = arith.addf %1295, %1294 : vector<8x16xf32>
    %cst_396 = arith.constant 1.000000e+00 : f32
    %1297 = vector.broadcast %cst_396 : f32 to vector<8x16xf32>
    %1298 = arith.divf %1297, %1296 : vector<8x16xf32>
    %1299 = arith.mulf %1288, %1268 : vector<8x16xf32>
    %1300 = arith.mulf %1280, %1290 : vector<8x16xf32>
    %1301 = arith.addf %1299, %1300 : vector<8x16xf32>
    %1302 = math.tanh %1301 : vector<8x16xf32>
    %1303 = arith.mulf %1298, %1302 : vector<8x16xf32>
    %1304 = vector.broadcast %15 : vector<8x1xf32> to vector<8x16xf32>
    %1305 = arith.mulf %1304, %1303 : vector<8x16xf32>
    %cst_397 = arith.constant 1.000000e+00 : f32
    %1306 = vector.broadcast %cst_397 : f32 to vector<8x1xf32>
    %1307 = arith.subf %1306, %15 : vector<8x1xf32>
    %1308 = vector.broadcast %1307 : vector<8x1xf32> to vector<8x16xf32>
    %1309 = arith.mulf %1308, %1267 : vector<8x16xf32>
    %1310 = arith.addf %1305, %1309 : vector<8x16xf32>
    %1311 = vector.broadcast %15 : vector<8x1xf32> to vector<8x16xf32>
    %1312 = arith.mulf %1311, %1301 : vector<8x16xf32>
    %cst_398 = arith.constant 1.000000e+00 : f32
    %1313 = vector.broadcast %cst_398 : f32 to vector<8x1xf32>
    %1314 = arith.subf %1313, %15 : vector<8x1xf32>
    %1315 = vector.broadcast %1314 : vector<8x1xf32> to vector<8x16xf32>
    %1316 = arith.mulf %1315, %1268 : vector<8x16xf32>
    %1317 = arith.addf %1312, %1316 : vector<8x16xf32>
    %1318 = vector.extract_strided_slice %1266 {offsets = [6, 0, 0], sizes = [1, 8, 64], strides = [1, 1, 1]} : vector<8x8x64xf32> to vector<1x8x64xf32>
    %1319 = vector.shape_cast %1318 : vector<1x8x64xf32> to vector<8x64xf32>
    %cst_399 = arith.constant dense<0.000000e+00> : vector<8x64xf32>
    %1320 = tpu.matmul %1310, %1257, %cst_399 {dimension_numbers = #tpu.dot_dimension_numbers<[1], [0], [0], [1], [0, 0, 1, 1], [], []>} : vector<8x16xf32>, vector<16x64xf32>, vector<8x64xf32> -> vector<8x64xf32>
    %1321 = arith.addf %1319, %1320 : vector<8x64xf32>
    %1322 = vector.extract_strided_slice %1321 {offsets = [0, 0], sizes = [8, 16], strides = [1, 1]} : vector<8x64xf32> to vector<8x16xf32>
    %cst_400 = arith.constant 0.000000e+00 : f32
    %1323 = vector.broadcast %cst_400 : f32 to vector<8x16xf32>
    %1324 = arith.subf %1323, %1322 : vector<8x16xf32>
    %1325 = math.exp %1324 : vector<8x16xf32>
    %cst_401 = arith.constant 1.000000e+00 : f32
    %1326 = vector.broadcast %cst_401 : f32 to vector<8x16xf32>
    %1327 = arith.addf %1326, %1325 : vector<8x16xf32>
    %cst_402 = arith.constant 1.000000e+00 : f32
    %1328 = vector.broadcast %cst_402 : f32 to vector<8x16xf32>
    %1329 = arith.divf %1328, %1327 : vector<8x16xf32>
    %1330 = vector.extract_strided_slice %1321 {offsets = [0, 16], sizes = [8, 16], strides = [1, 1]} : vector<8x64xf32> to vector<8x16xf32>
    %cst_403 = arith.constant 0.000000e+00 : f32
    %1331 = vector.broadcast %cst_403 : f32 to vector<8x16xf32>
    %1332 = arith.subf %1331, %1330 : vector<8x16xf32>
    %1333 = math.exp %1332 : vector<8x16xf32>
    %cst_404 = arith.constant 1.000000e+00 : f32
    %1334 = vector.broadcast %cst_404 : f32 to vector<8x16xf32>
    %1335 = arith.addf %1334, %1333 : vector<8x16xf32>
    %cst_405 = arith.constant 1.000000e+00 : f32
    %1336 = vector.broadcast %cst_405 : f32 to vector<8x16xf32>
    %1337 = arith.divf %1336, %1335 : vector<8x16xf32>
    %1338 = vector.extract_strided_slice %1321 {offsets = [0, 32], sizes = [8, 16], strides = [1, 1]} : vector<8x64xf32> to vector<8x16xf32>
    %1339 = math.tanh %1338 : vector<8x16xf32>
    %1340 = vector.extract_strided_slice %1321 {offsets = [0, 48], sizes = [8, 16], strides = [1, 1]} : vector<8x64xf32> to vector<8x16xf32>
    %cst_406 = arith.constant 0.000000e+00 : f32
    %1341 = vector.broadcast %cst_406 : f32 to vector<8x16xf32>
    %1342 = arith.subf %1341, %1340 : vector<8x16xf32>
    %1343 = math.exp %1342 : vector<8x16xf32>
    %cst_407 = arith.constant 1.000000e+00 : f32
    %1344 = vector.broadcast %cst_407 : f32 to vector<8x16xf32>
    %1345 = arith.addf %1344, %1343 : vector<8x16xf32>
    %cst_408 = arith.constant 1.000000e+00 : f32
    %1346 = vector.broadcast %cst_408 : f32 to vector<8x16xf32>
    %1347 = arith.divf %1346, %1345 : vector<8x16xf32>
    %1348 = arith.mulf %1337, %1317 : vector<8x16xf32>
    %1349 = arith.mulf %1329, %1339 : vector<8x16xf32>
    %1350 = arith.addf %1348, %1349 : vector<8x16xf32>
    %1351 = math.tanh %1350 : vector<8x16xf32>
    %1352 = arith.mulf %1347, %1351 : vector<8x16xf32>
    %1353 = vector.broadcast %13 : vector<8x1xf32> to vector<8x16xf32>
    %1354 = arith.mulf %1353, %1352 : vector<8x16xf32>
    %cst_409 = arith.constant 1.000000e+00 : f32
    %1355 = vector.broadcast %cst_409 : f32 to vector<8x1xf32>
    %1356 = arith.subf %1355, %13 : vector<8x1xf32>
    %1357 = vector.broadcast %1356 : vector<8x1xf32> to vector<8x16xf32>
    %1358 = arith.mulf %1357, %1310 : vector<8x16xf32>
    %1359 = arith.addf %1354, %1358 : vector<8x16xf32>
    %1360 = vector.broadcast %13 : vector<8x1xf32> to vector<8x16xf32>
    %1361 = arith.mulf %1360, %1350 : vector<8x16xf32>
    %cst_410 = arith.constant 1.000000e+00 : f32
    %1362 = vector.broadcast %cst_410 : f32 to vector<8x1xf32>
    %1363 = arith.subf %1362, %13 : vector<8x1xf32>
    %1364 = vector.broadcast %1363 : vector<8x1xf32> to vector<8x16xf32>
    %1365 = arith.mulf %1364, %1317 : vector<8x16xf32>
    %1366 = arith.addf %1361, %1365 : vector<8x16xf32>
    %1367 = vector.extract_strided_slice %1266 {offsets = [5, 0, 0], sizes = [1, 8, 64], strides = [1, 1, 1]} : vector<8x8x64xf32> to vector<1x8x64xf32>
    %1368 = vector.shape_cast %1367 : vector<1x8x64xf32> to vector<8x64xf32>
    %cst_411 = arith.constant dense<0.000000e+00> : vector<8x64xf32>
    %1369 = tpu.matmul %1359, %1257, %cst_411 {dimension_numbers = #tpu.dot_dimension_numbers<[1], [0], [0], [1], [0, 0, 1, 1], [], []>} : vector<8x16xf32>, vector<16x64xf32>, vector<8x64xf32> -> vector<8x64xf32>
    %1370 = arith.addf %1368, %1369 : vector<8x64xf32>
    %1371 = vector.extract_strided_slice %1370 {offsets = [0, 0], sizes = [8, 16], strides = [1, 1]} : vector<8x64xf32> to vector<8x16xf32>
    %cst_412 = arith.constant 0.000000e+00 : f32
    %1372 = vector.broadcast %cst_412 : f32 to vector<8x16xf32>
    %1373 = arith.subf %1372, %1371 : vector<8x16xf32>
    %1374 = math.exp %1373 : vector<8x16xf32>
    %cst_413 = arith.constant 1.000000e+00 : f32
    %1375 = vector.broadcast %cst_413 : f32 to vector<8x16xf32>
    %1376 = arith.addf %1375, %1374 : vector<8x16xf32>
    %cst_414 = arith.constant 1.000000e+00 : f32
    %1377 = vector.broadcast %cst_414 : f32 to vector<8x16xf32>
    %1378 = arith.divf %1377, %1376 : vector<8x16xf32>
    %1379 = vector.extract_strided_slice %1370 {offsets = [0, 16], sizes = [8, 16], strides = [1, 1]} : vector<8x64xf32> to vector<8x16xf32>
    %cst_415 = arith.constant 0.000000e+00 : f32
    %1380 = vector.broadcast %cst_415 : f32 to vector<8x16xf32>
    %1381 = arith.subf %1380, %1379 : vector<8x16xf32>
    %1382 = math.exp %1381 : vector<8x16xf32>
    %cst_416 = arith.constant 1.000000e+00 : f32
    %1383 = vector.broadcast %cst_416 : f32 to vector<8x16xf32>
    %1384 = arith.addf %1383, %1382 : vector<8x16xf32>
    %cst_417 = arith.constant 1.000000e+00 : f32
    %1385 = vector.broadcast %cst_417 : f32 to vector<8x16xf32>
    %1386 = arith.divf %1385, %1384 : vector<8x16xf32>
    %1387 = vector.extract_strided_slice %1370 {offsets = [0, 32], sizes = [8, 16], strides = [1, 1]} : vector<8x64xf32> to vector<8x16xf32>
    %1388 = math.tanh %1387 : vector<8x16xf32>
    %1389 = vector.extract_strided_slice %1370 {offsets = [0, 48], sizes = [8, 16], strides = [1, 1]} : vector<8x64xf32> to vector<8x16xf32>
    %cst_418 = arith.constant 0.000000e+00 : f32
    %1390 = vector.broadcast %cst_418 : f32 to vector<8x16xf32>
    %1391 = arith.subf %1390, %1389 : vector<8x16xf32>
    %1392 = math.exp %1391 : vector<8x16xf32>
    %cst_419 = arith.constant 1.000000e+00 : f32
    %1393 = vector.broadcast %cst_419 : f32 to vector<8x16xf32>
    %1394 = arith.addf %1393, %1392 : vector<8x16xf32>
    %cst_420 = arith.constant 1.000000e+00 : f32
    %1395 = vector.broadcast %cst_420 : f32 to vector<8x16xf32>
    %1396 = arith.divf %1395, %1394 : vector<8x16xf32>
    %1397 = arith.mulf %1386, %1366 : vector<8x16xf32>
    %1398 = arith.mulf %1378, %1388 : vector<8x16xf32>
    %1399 = arith.addf %1397, %1398 : vector<8x16xf32>
    %1400 = math.tanh %1399 : vector<8x16xf32>
    %1401 = arith.mulf %1396, %1400 : vector<8x16xf32>
    %1402 = vector.broadcast %11 : vector<8x1xf32> to vector<8x16xf32>
    %1403 = arith.mulf %1402, %1401 : vector<8x16xf32>
    %cst_421 = arith.constant 1.000000e+00 : f32
    %1404 = vector.broadcast %cst_421 : f32 to vector<8x1xf32>
    %1405 = arith.subf %1404, %11 : vector<8x1xf32>
    %1406 = vector.broadcast %1405 : vector<8x1xf32> to vector<8x16xf32>
    %1407 = arith.mulf %1406, %1359 : vector<8x16xf32>
    %1408 = arith.addf %1403, %1407 : vector<8x16xf32>
    %1409 = vector.broadcast %11 : vector<8x1xf32> to vector<8x16xf32>
    %1410 = arith.mulf %1409, %1399 : vector<8x16xf32>
    %cst_422 = arith.constant 1.000000e+00 : f32
    %1411 = vector.broadcast %cst_422 : f32 to vector<8x1xf32>
    %1412 = arith.subf %1411, %11 : vector<8x1xf32>
    %1413 = vector.broadcast %1412 : vector<8x1xf32> to vector<8x16xf32>
    %1414 = arith.mulf %1413, %1366 : vector<8x16xf32>
    %1415 = arith.addf %1410, %1414 : vector<8x16xf32>
    %1416 = vector.extract_strided_slice %1266 {offsets = [4, 0, 0], sizes = [1, 8, 64], strides = [1, 1, 1]} : vector<8x8x64xf32> to vector<1x8x64xf32>
    %1417 = vector.shape_cast %1416 : vector<1x8x64xf32> to vector<8x64xf32>
    %cst_423 = arith.constant dense<0.000000e+00> : vector<8x64xf32>
    %1418 = tpu.matmul %1408, %1257, %cst_423 {dimension_numbers = #tpu.dot_dimension_numbers<[1], [0], [0], [1], [0, 0, 1, 1], [], []>} : vector<8x16xf32>, vector<16x64xf32>, vector<8x64xf32> -> vector<8x64xf32>
    %1419 = arith.addf %1417, %1418 : vector<8x64xf32>
    %1420 = vector.extract_strided_slice %1419 {offsets = [0, 0], sizes = [8, 16], strides = [1, 1]} : vector<8x64xf32> to vector<8x16xf32>
    %cst_424 = arith.constant 0.000000e+00 : f32
    %1421 = vector.broadcast %cst_424 : f32 to vector<8x16xf32>
    %1422 = arith.subf %1421, %1420 : vector<8x16xf32>
    %1423 = math.exp %1422 : vector<8x16xf32>
    %cst_425 = arith.constant 1.000000e+00 : f32
    %1424 = vector.broadcast %cst_425 : f32 to vector<8x16xf32>
    %1425 = arith.addf %1424, %1423 : vector<8x16xf32>
    %cst_426 = arith.constant 1.000000e+00 : f32
    %1426 = vector.broadcast %cst_426 : f32 to vector<8x16xf32>
    %1427 = arith.divf %1426, %1425 : vector<8x16xf32>
    %1428 = vector.extract_strided_slice %1419 {offsets = [0, 16], sizes = [8, 16], strides = [1, 1]} : vector<8x64xf32> to vector<8x16xf32>
    %cst_427 = arith.constant 0.000000e+00 : f32
    %1429 = vector.broadcast %cst_427 : f32 to vector<8x16xf32>
    %1430 = arith.subf %1429, %1428 : vector<8x16xf32>
    %1431 = math.exp %1430 : vector<8x16xf32>
    %cst_428 = arith.constant 1.000000e+00 : f32
    %1432 = vector.broadcast %cst_428 : f32 to vector<8x16xf32>
    %1433 = arith.addf %1432, %1431 : vector<8x16xf32>
    %cst_429 = arith.constant 1.000000e+00 : f32
    %1434 = vector.broadcast %cst_429 : f32 to vector<8x16xf32>
    %1435 = arith.divf %1434, %1433 : vector<8x16xf32>
    %1436 = vector.extract_strided_slice %1419 {offsets = [0, 32], sizes = [8, 16], strides = [1, 1]} : vector<8x64xf32> to vector<8x16xf32>
    %1437 = math.tanh %1436 : vector<8x16xf32>
    %1438 = vector.extract_strided_slice %1419 {offsets = [0, 48], sizes = [8, 16], strides = [1, 1]} : vector<8x64xf32> to vector<8x16xf32>
    %cst_430 = arith.constant 0.000000e+00 : f32
    %1439 = vector.broadcast %cst_430 : f32 to vector<8x16xf32>
    %1440 = arith.subf %1439, %1438 : vector<8x16xf32>
    %1441 = math.exp %1440 : vector<8x16xf32>
    %cst_431 = arith.constant 1.000000e+00 : f32
    %1442 = vector.broadcast %cst_431 : f32 to vector<8x16xf32>
    %1443 = arith.addf %1442, %1441 : vector<8x16xf32>
    %cst_432 = arith.constant 1.000000e+00 : f32
    %1444 = vector.broadcast %cst_432 : f32 to vector<8x16xf32>
    %1445 = arith.divf %1444, %1443 : vector<8x16xf32>
    %1446 = arith.mulf %1435, %1415 : vector<8x16xf32>
    %1447 = arith.mulf %1427, %1437 : vector<8x16xf32>
    %1448 = arith.addf %1446, %1447 : vector<8x16xf32>
    %1449 = math.tanh %1448 : vector<8x16xf32>
    %1450 = arith.mulf %1445, %1449 : vector<8x16xf32>
    %1451 = vector.broadcast %9 : vector<8x1xf32> to vector<8x16xf32>
    %1452 = arith.mulf %1451, %1450 : vector<8x16xf32>
    %cst_433 = arith.constant 1.000000e+00 : f32
    %1453 = vector.broadcast %cst_433 : f32 to vector<8x1xf32>
    %1454 = arith.subf %1453, %9 : vector<8x1xf32>
    %1455 = vector.broadcast %1454 : vector<8x1xf32> to vector<8x16xf32>
    %1456 = arith.mulf %1455, %1408 : vector<8x16xf32>
    %1457 = arith.addf %1452, %1456 : vector<8x16xf32>
    %1458 = vector.broadcast %9 : vector<8x1xf32> to vector<8x16xf32>
    %1459 = arith.mulf %1458, %1448 : vector<8x16xf32>
    %cst_434 = arith.constant 1.000000e+00 : f32
    %1460 = vector.broadcast %cst_434 : f32 to vector<8x1xf32>
    %1461 = arith.subf %1460, %9 : vector<8x1xf32>
    %1462 = vector.broadcast %1461 : vector<8x1xf32> to vector<8x16xf32>
    %1463 = arith.mulf %1462, %1415 : vector<8x16xf32>
    %1464 = arith.addf %1459, %1463 : vector<8x16xf32>
    %1465 = vector.extract_strided_slice %1266 {offsets = [3, 0, 0], sizes = [1, 8, 64], strides = [1, 1, 1]} : vector<8x8x64xf32> to vector<1x8x64xf32>
    %1466 = vector.shape_cast %1465 : vector<1x8x64xf32> to vector<8x64xf32>
    %cst_435 = arith.constant dense<0.000000e+00> : vector<8x64xf32>
    %1467 = tpu.matmul %1457, %1257, %cst_435 {dimension_numbers = #tpu.dot_dimension_numbers<[1], [0], [0], [1], [0, 0, 1, 1], [], []>} : vector<8x16xf32>, vector<16x64xf32>, vector<8x64xf32> -> vector<8x64xf32>
    %1468 = arith.addf %1466, %1467 : vector<8x64xf32>
    %1469 = vector.extract_strided_slice %1468 {offsets = [0, 0], sizes = [8, 16], strides = [1, 1]} : vector<8x64xf32> to vector<8x16xf32>
    %cst_436 = arith.constant 0.000000e+00 : f32
    %1470 = vector.broadcast %cst_436 : f32 to vector<8x16xf32>
    %1471 = arith.subf %1470, %1469 : vector<8x16xf32>
    %1472 = math.exp %1471 : vector<8x16xf32>
    %cst_437 = arith.constant 1.000000e+00 : f32
    %1473 = vector.broadcast %cst_437 : f32 to vector<8x16xf32>
    %1474 = arith.addf %1473, %1472 : vector<8x16xf32>
    %cst_438 = arith.constant 1.000000e+00 : f32
    %1475 = vector.broadcast %cst_438 : f32 to vector<8x16xf32>
    %1476 = arith.divf %1475, %1474 : vector<8x16xf32>
    %1477 = vector.extract_strided_slice %1468 {offsets = [0, 16], sizes = [8, 16], strides = [1, 1]} : vector<8x64xf32> to vector<8x16xf32>
    %cst_439 = arith.constant 0.000000e+00 : f32
    %1478 = vector.broadcast %cst_439 : f32 to vector<8x16xf32>
    %1479 = arith.subf %1478, %1477 : vector<8x16xf32>
    %1480 = math.exp %1479 : vector<8x16xf32>
    %cst_440 = arith.constant 1.000000e+00 : f32
    %1481 = vector.broadcast %cst_440 : f32 to vector<8x16xf32>
    %1482 = arith.addf %1481, %1480 : vector<8x16xf32>
    %cst_441 = arith.constant 1.000000e+00 : f32
    %1483 = vector.broadcast %cst_441 : f32 to vector<8x16xf32>
    %1484 = arith.divf %1483, %1482 : vector<8x16xf32>
    %1485 = vector.extract_strided_slice %1468 {offsets = [0, 32], sizes = [8, 16], strides = [1, 1]} : vector<8x64xf32> to vector<8x16xf32>
    %1486 = math.tanh %1485 : vector<8x16xf32>
    %1487 = vector.extract_strided_slice %1468 {offsets = [0, 48], sizes = [8, 16], strides = [1, 1]} : vector<8x64xf32> to vector<8x16xf32>
    %cst_442 = arith.constant 0.000000e+00 : f32
    %1488 = vector.broadcast %cst_442 : f32 to vector<8x16xf32>
    %1489 = arith.subf %1488, %1487 : vector<8x16xf32>
    %1490 = math.exp %1489 : vector<8x16xf32>
    %cst_443 = arith.constant 1.000000e+00 : f32
    %1491 = vector.broadcast %cst_443 : f32 to vector<8x16xf32>
    %1492 = arith.addf %1491, %1490 : vector<8x16xf32>
    %cst_444 = arith.constant 1.000000e+00 : f32
    %1493 = vector.broadcast %cst_444 : f32 to vector<8x16xf32>
    %1494 = arith.divf %1493, %1492 : vector<8x16xf32>
    %1495 = arith.mulf %1484, %1464 : vector<8x16xf32>
    %1496 = arith.mulf %1476, %1486 : vector<8x16xf32>
    %1497 = arith.addf %1495, %1496 : vector<8x16xf32>
    %1498 = math.tanh %1497 : vector<8x16xf32>
    %1499 = arith.mulf %1494, %1498 : vector<8x16xf32>
    %1500 = vector.broadcast %7 : vector<8x1xf32> to vector<8x16xf32>
    %1501 = arith.mulf %1500, %1499 : vector<8x16xf32>
    %cst_445 = arith.constant 1.000000e+00 : f32
    %1502 = vector.broadcast %cst_445 : f32 to vector<8x1xf32>
    %1503 = arith.subf %1502, %7 : vector<8x1xf32>
    %1504 = vector.broadcast %1503 : vector<8x1xf32> to vector<8x16xf32>
    %1505 = arith.mulf %1504, %1457 : vector<8x16xf32>
    %1506 = arith.addf %1501, %1505 : vector<8x16xf32>
    %1507 = vector.broadcast %7 : vector<8x1xf32> to vector<8x16xf32>
    %1508 = arith.mulf %1507, %1497 : vector<8x16xf32>
    %cst_446 = arith.constant 1.000000e+00 : f32
    %1509 = vector.broadcast %cst_446 : f32 to vector<8x1xf32>
    %1510 = arith.subf %1509, %7 : vector<8x1xf32>
    %1511 = vector.broadcast %1510 : vector<8x1xf32> to vector<8x16xf32>
    %1512 = arith.mulf %1511, %1464 : vector<8x16xf32>
    %1513 = arith.addf %1508, %1512 : vector<8x16xf32>
    %1514 = vector.extract_strided_slice %1266 {offsets = [2, 0, 0], sizes = [1, 8, 64], strides = [1, 1, 1]} : vector<8x8x64xf32> to vector<1x8x64xf32>
    %1515 = vector.shape_cast %1514 : vector<1x8x64xf32> to vector<8x64xf32>
    %cst_447 = arith.constant dense<0.000000e+00> : vector<8x64xf32>
    %1516 = tpu.matmul %1506, %1257, %cst_447 {dimension_numbers = #tpu.dot_dimension_numbers<[1], [0], [0], [1], [0, 0, 1, 1], [], []>} : vector<8x16xf32>, vector<16x64xf32>, vector<8x64xf32> -> vector<8x64xf32>
    %1517 = arith.addf %1515, %1516 : vector<8x64xf32>
    %1518 = vector.extract_strided_slice %1517 {offsets = [0, 0], sizes = [8, 16], strides = [1, 1]} : vector<8x64xf32> to vector<8x16xf32>
    %cst_448 = arith.constant 0.000000e+00 : f32
    %1519 = vector.broadcast %cst_448 : f32 to vector<8x16xf32>
    %1520 = arith.subf %1519, %1518 : vector<8x16xf32>
    %1521 = math.exp %1520 : vector<8x16xf32>
    %cst_449 = arith.constant 1.000000e+00 : f32
    %1522 = vector.broadcast %cst_449 : f32 to vector<8x16xf32>
    %1523 = arith.addf %1522, %1521 : vector<8x16xf32>
    %cst_450 = arith.constant 1.000000e+00 : f32
    %1524 = vector.broadcast %cst_450 : f32 to vector<8x16xf32>
    %1525 = arith.divf %1524, %1523 : vector<8x16xf32>
    %1526 = vector.extract_strided_slice %1517 {offsets = [0, 16], sizes = [8, 16], strides = [1, 1]} : vector<8x64xf32> to vector<8x16xf32>
    %cst_451 = arith.constant 0.000000e+00 : f32
    %1527 = vector.broadcast %cst_451 : f32 to vector<8x16xf32>
    %1528 = arith.subf %1527, %1526 : vector<8x16xf32>
    %1529 = math.exp %1528 : vector<8x16xf32>
    %cst_452 = arith.constant 1.000000e+00 : f32
    %1530 = vector.broadcast %cst_452 : f32 to vector<8x16xf32>
    %1531 = arith.addf %1530, %1529 : vector<8x16xf32>
    %cst_453 = arith.constant 1.000000e+00 : f32
    %1532 = vector.broadcast %cst_453 : f32 to vector<8x16xf32>
    %1533 = arith.divf %1532, %1531 : vector<8x16xf32>
    %1534 = vector.extract_strided_slice %1517 {offsets = [0, 32], sizes = [8, 16], strides = [1, 1]} : vector<8x64xf32> to vector<8x16xf32>
    %1535 = math.tanh %1534 : vector<8x16xf32>
    %1536 = vector.extract_strided_slice %1517 {offsets = [0, 48], sizes = [8, 16], strides = [1, 1]} : vector<8x64xf32> to vector<8x16xf32>
    %cst_454 = arith.constant 0.000000e+00 : f32
    %1537 = vector.broadcast %cst_454 : f32 to vector<8x16xf32>
    %1538 = arith.subf %1537, %1536 : vector<8x16xf32>
    %1539 = math.exp %1538 : vector<8x16xf32>
    %cst_455 = arith.constant 1.000000e+00 : f32
    %1540 = vector.broadcast %cst_455 : f32 to vector<8x16xf32>
    %1541 = arith.addf %1540, %1539 : vector<8x16xf32>
    %cst_456 = arith.constant 1.000000e+00 : f32
    %1542 = vector.broadcast %cst_456 : f32 to vector<8x16xf32>
    %1543 = arith.divf %1542, %1541 : vector<8x16xf32>
    %1544 = arith.mulf %1533, %1513 : vector<8x16xf32>
    %1545 = arith.mulf %1525, %1535 : vector<8x16xf32>
    %1546 = arith.addf %1544, %1545 : vector<8x16xf32>
    %1547 = math.tanh %1546 : vector<8x16xf32>
    %1548 = arith.mulf %1543, %1547 : vector<8x16xf32>
    %1549 = vector.broadcast %5 : vector<8x1xf32> to vector<8x16xf32>
    %1550 = arith.mulf %1549, %1548 : vector<8x16xf32>
    %cst_457 = arith.constant 1.000000e+00 : f32
    %1551 = vector.broadcast %cst_457 : f32 to vector<8x1xf32>
    %1552 = arith.subf %1551, %5 : vector<8x1xf32>
    %1553 = vector.broadcast %1552 : vector<8x1xf32> to vector<8x16xf32>
    %1554 = arith.mulf %1553, %1506 : vector<8x16xf32>
    %1555 = arith.addf %1550, %1554 : vector<8x16xf32>
    %1556 = vector.broadcast %5 : vector<8x1xf32> to vector<8x16xf32>
    %1557 = arith.mulf %1556, %1546 : vector<8x16xf32>
    %cst_458 = arith.constant 1.000000e+00 : f32
    %1558 = vector.broadcast %cst_458 : f32 to vector<8x1xf32>
    %1559 = arith.subf %1558, %5 : vector<8x1xf32>
    %1560 = vector.broadcast %1559 : vector<8x1xf32> to vector<8x16xf32>
    %1561 = arith.mulf %1560, %1513 : vector<8x16xf32>
    %1562 = arith.addf %1557, %1561 : vector<8x16xf32>
    %1563 = vector.extract_strided_slice %1266 {offsets = [1, 0, 0], sizes = [1, 8, 64], strides = [1, 1, 1]} : vector<8x8x64xf32> to vector<1x8x64xf32>
    %1564 = vector.shape_cast %1563 : vector<1x8x64xf32> to vector<8x64xf32>
    %cst_459 = arith.constant dense<0.000000e+00> : vector<8x64xf32>
    %1565 = tpu.matmul %1555, %1257, %cst_459 {dimension_numbers = #tpu.dot_dimension_numbers<[1], [0], [0], [1], [0, 0, 1, 1], [], []>} : vector<8x16xf32>, vector<16x64xf32>, vector<8x64xf32> -> vector<8x64xf32>
    %1566 = arith.addf %1564, %1565 : vector<8x64xf32>
    %1567 = vector.extract_strided_slice %1566 {offsets = [0, 0], sizes = [8, 16], strides = [1, 1]} : vector<8x64xf32> to vector<8x16xf32>
    %cst_460 = arith.constant 0.000000e+00 : f32
    %1568 = vector.broadcast %cst_460 : f32 to vector<8x16xf32>
    %1569 = arith.subf %1568, %1567 : vector<8x16xf32>
    %1570 = math.exp %1569 : vector<8x16xf32>
    %cst_461 = arith.constant 1.000000e+00 : f32
    %1571 = vector.broadcast %cst_461 : f32 to vector<8x16xf32>
    %1572 = arith.addf %1571, %1570 : vector<8x16xf32>
    %cst_462 = arith.constant 1.000000e+00 : f32
    %1573 = vector.broadcast %cst_462 : f32 to vector<8x16xf32>
    %1574 = arith.divf %1573, %1572 : vector<8x16xf32>
    %1575 = vector.extract_strided_slice %1566 {offsets = [0, 16], sizes = [8, 16], strides = [1, 1]} : vector<8x64xf32> to vector<8x16xf32>
    %cst_463 = arith.constant 0.000000e+00 : f32
    %1576 = vector.broadcast %cst_463 : f32 to vector<8x16xf32>
    %1577 = arith.subf %1576, %1575 : vector<8x16xf32>
    %1578 = math.exp %1577 : vector<8x16xf32>
    %cst_464 = arith.constant 1.000000e+00 : f32
    %1579 = vector.broadcast %cst_464 : f32 to vector<8x16xf32>
    %1580 = arith.addf %1579, %1578 : vector<8x16xf32>
    %cst_465 = arith.constant 1.000000e+00 : f32
    %1581 = vector.broadcast %cst_465 : f32 to vector<8x16xf32>
    %1582 = arith.divf %1581, %1580 : vector<8x16xf32>
    %1583 = vector.extract_strided_slice %1566 {offsets = [0, 32], sizes = [8, 16], strides = [1, 1]} : vector<8x64xf32> to vector<8x16xf32>
    %1584 = math.tanh %1583 : vector<8x16xf32>
    %1585 = vector.extract_strided_slice %1566 {offsets = [0, 48], sizes = [8, 16], strides = [1, 1]} : vector<8x64xf32> to vector<8x16xf32>
    %cst_466 = arith.constant 0.000000e+00 : f32
    %1586 = vector.broadcast %cst_466 : f32 to vector<8x16xf32>
    %1587 = arith.subf %1586, %1585 : vector<8x16xf32>
    %1588 = math.exp %1587 : vector<8x16xf32>
    %cst_467 = arith.constant 1.000000e+00 : f32
    %1589 = vector.broadcast %cst_467 : f32 to vector<8x16xf32>
    %1590 = arith.addf %1589, %1588 : vector<8x16xf32>
    %cst_468 = arith.constant 1.000000e+00 : f32
    %1591 = vector.broadcast %cst_468 : f32 to vector<8x16xf32>
    %1592 = arith.divf %1591, %1590 : vector<8x16xf32>
    %1593 = arith.mulf %1582, %1562 : vector<8x16xf32>
    %1594 = arith.mulf %1574, %1584 : vector<8x16xf32>
    %1595 = arith.addf %1593, %1594 : vector<8x16xf32>
    %1596 = math.tanh %1595 : vector<8x16xf32>
    %1597 = arith.mulf %1592, %1596 : vector<8x16xf32>
    %1598 = vector.broadcast %3 : vector<8x1xf32> to vector<8x16xf32>
    %1599 = arith.mulf %1598, %1597 : vector<8x16xf32>
    %cst_469 = arith.constant 1.000000e+00 : f32
    %1600 = vector.broadcast %cst_469 : f32 to vector<8x1xf32>
    %1601 = arith.subf %1600, %3 : vector<8x1xf32>
    %1602 = vector.broadcast %1601 : vector<8x1xf32> to vector<8x16xf32>
    %1603 = arith.mulf %1602, %1555 : vector<8x16xf32>
    %1604 = arith.addf %1599, %1603 : vector<8x16xf32>
    %1605 = vector.broadcast %3 : vector<8x1xf32> to vector<8x16xf32>
    %1606 = arith.mulf %1605, %1595 : vector<8x16xf32>
    %cst_470 = arith.constant 1.000000e+00 : f32
    %1607 = vector.broadcast %cst_470 : f32 to vector<8x1xf32>
    %1608 = arith.subf %1607, %3 : vector<8x1xf32>
    %1609 = vector.broadcast %1608 : vector<8x1xf32> to vector<8x16xf32>
    %1610 = arith.mulf %1609, %1562 : vector<8x16xf32>
    %1611 = arith.addf %1606, %1610 : vector<8x16xf32>
    %1612 = vector.extract_strided_slice %1266 {offsets = [0, 0, 0], sizes = [1, 8, 64], strides = [1, 1, 1]} : vector<8x8x64xf32> to vector<1x8x64xf32>
    %1613 = vector.shape_cast %1612 : vector<1x8x64xf32> to vector<8x64xf32>
    %cst_471 = arith.constant dense<0.000000e+00> : vector<8x64xf32>
    %1614 = tpu.matmul %1604, %1257, %cst_471 {dimension_numbers = #tpu.dot_dimension_numbers<[1], [0], [0], [1], [0, 0, 1, 1], [], []>} : vector<8x16xf32>, vector<16x64xf32>, vector<8x64xf32> -> vector<8x64xf32>
    %1615 = arith.addf %1613, %1614 : vector<8x64xf32>
    %1616 = vector.extract_strided_slice %1615 {offsets = [0, 0], sizes = [8, 16], strides = [1, 1]} : vector<8x64xf32> to vector<8x16xf32>
    %cst_472 = arith.constant 0.000000e+00 : f32
    %1617 = vector.broadcast %cst_472 : f32 to vector<8x16xf32>
    %1618 = arith.subf %1617, %1616 : vector<8x16xf32>
    %1619 = math.exp %1618 : vector<8x16xf32>
    %cst_473 = arith.constant 1.000000e+00 : f32
    %1620 = vector.broadcast %cst_473 : f32 to vector<8x16xf32>
    %1621 = arith.addf %1620, %1619 : vector<8x16xf32>
    %cst_474 = arith.constant 1.000000e+00 : f32
    %1622 = vector.broadcast %cst_474 : f32 to vector<8x16xf32>
    %1623 = arith.divf %1622, %1621 : vector<8x16xf32>
    %1624 = vector.extract_strided_slice %1615 {offsets = [0, 16], sizes = [8, 16], strides = [1, 1]} : vector<8x64xf32> to vector<8x16xf32>
    %cst_475 = arith.constant 0.000000e+00 : f32
    %1625 = vector.broadcast %cst_475 : f32 to vector<8x16xf32>
    %1626 = arith.subf %1625, %1624 : vector<8x16xf32>
    %1627 = math.exp %1626 : vector<8x16xf32>
    %cst_476 = arith.constant 1.000000e+00 : f32
    %1628 = vector.broadcast %cst_476 : f32 to vector<8x16xf32>
    %1629 = arith.addf %1628, %1627 : vector<8x16xf32>
    %cst_477 = arith.constant 1.000000e+00 : f32
    %1630 = vector.broadcast %cst_477 : f32 to vector<8x16xf32>
    %1631 = arith.divf %1630, %1629 : vector<8x16xf32>
    %1632 = vector.extract_strided_slice %1615 {offsets = [0, 32], sizes = [8, 16], strides = [1, 1]} : vector<8x64xf32> to vector<8x16xf32>
    %1633 = math.tanh %1632 : vector<8x16xf32>
    %1634 = vector.extract_strided_slice %1615 {offsets = [0, 48], sizes = [8, 16], strides = [1, 1]} : vector<8x64xf32> to vector<8x16xf32>
    %cst_478 = arith.constant 0.000000e+00 : f32
    %1635 = vector.broadcast %cst_478 : f32 to vector<8x16xf32>
    %1636 = arith.subf %1635, %1634 : vector<8x16xf32>
    %1637 = math.exp %1636 : vector<8x16xf32>
    %cst_479 = arith.constant 1.000000e+00 : f32
    %1638 = vector.broadcast %cst_479 : f32 to vector<8x16xf32>
    %1639 = arith.addf %1638, %1637 : vector<8x16xf32>
    %cst_480 = arith.constant 1.000000e+00 : f32
    %1640 = vector.broadcast %cst_480 : f32 to vector<8x16xf32>
    %1641 = arith.divf %1640, %1639 : vector<8x16xf32>
    %1642 = arith.mulf %1631, %1611 : vector<8x16xf32>
    %1643 = arith.mulf %1623, %1633 : vector<8x16xf32>
    %1644 = arith.addf %1642, %1643 : vector<8x16xf32>
    %1645 = math.tanh %1644 : vector<8x16xf32>
    %1646 = arith.mulf %1641, %1645 : vector<8x16xf32>
    %1647 = vector.broadcast %1 : vector<8x1xf32> to vector<8x16xf32>
    %1648 = arith.mulf %1647, %1646 : vector<8x16xf32>
    %cst_481 = arith.constant 1.000000e+00 : f32
    %1649 = vector.broadcast %cst_481 : f32 to vector<8x1xf32>
    %1650 = arith.subf %1649, %1 : vector<8x1xf32>
    %1651 = vector.broadcast %1650 : vector<8x1xf32> to vector<8x16xf32>
    %1652 = arith.mulf %1651, %1604 : vector<8x16xf32>
    %1653 = arith.addf %1648, %1652 : vector<8x16xf32>
    %1654 = tpu.concatenate %1653, %1255 in 1 : vector<8x16xf32>, vector<8x16xf32> -> vector<8x32xf32>
    %c0_482 = arith.constant 0 : index
    %c0_483 = arith.constant 0 : index
    %1655 = vector.load %arg14[%c0_482, %c0_483] : memref<32x32xf32, #tpu.memory_space<vmem>>, vector<32x32xf32>
    %cst_484 = arith.constant dense<0.000000e+00> : vector<8x32xf32>
    %1656 = tpu.matmul %1654, %1655, %cst_484 {dimension_numbers = #tpu.dot_dimension_numbers<[1], [0], [0], [1], [0, 0, 1, 1], [], []>} : vector<8x32xf32>, vector<32x32xf32>, vector<8x32xf32> -> vector<8x32xf32>
    %c0_485 = arith.constant 0 : index
    %c0_486 = arith.constant 0 : index
    %1657 = vector.load %arg15[%c0_485, %c0_486] : memref<1x32xf32, #tpu.memory_space<vmem>>, vector<1x32xf32>
    %1658 = vector.broadcast %1657 : vector<1x32xf32> to vector<8x32xf32>
    %1659 = arith.addf %1656, %1658 : vector<8x32xf32>
    %1660 = math.tanh %1659 : vector<8x32xf32>
    %c0_487 = arith.constant 0 : index
    %c0_488 = arith.constant 0 : index
    %1661 = vector.load %arg16[%c0_487, %c0_488] : memref<32x2xf32, #tpu.memory_space<vmem>>, vector<32x2xf32>
    %cst_489 = arith.constant dense<0.000000e+00> : vector<8x2xf32>
    %1662 = tpu.matmul %1660, %1661, %cst_489 {dimension_numbers = #tpu.dot_dimension_numbers<[1], [0], [0], [1], [0, 0, 1, 1], [], []>} : vector<8x32xf32>, vector<32x2xf32>, vector<8x2xf32> -> vector<8x2xf32>
    %c0_490 = arith.constant 0 : index
    %c0_491 = arith.constant 0 : index
    %1663 = vector.load %arg17[%c0_490, %c0_491] : memref<1x2xf32, #tpu.memory_space<vmem>>, vector<1x2xf32>
    %1664 = vector.broadcast %1663 : vector<1x2xf32> to vector<8x2xf32>
    %1665 = arith.addf %1662, %1664 : vector<8x2xf32>
    %cst_492 = arith.constant dense<0xFF800000> : vector<8xf32>
    %1666 = vector.multi_reduction <maximumf>, %1665, %cst_492 [1] : vector<8x2xf32> to vector<8xf32>
    %1667 = vector.shape_cast %1666 : vector<8xf32> to vector<8x1xf32>
    %1668 = vector.broadcast %1667 : vector<8x1xf32> to vector<8x2xf32>
    %1669 = arith.subf %1665, %1668 : vector<8x2xf32>
    %1670 = math.exp %1669 : vector<8x2xf32>
    %cst_493 = arith.constant dense<0.000000e+00> : vector<8xf32>
    %1671 = vector.multi_reduction <add>, %1670, %cst_493 [1] : vector<8x2xf32> to vector<8xf32>
    %1672 = vector.shape_cast %1671 : vector<8xf32> to vector<8x1xf32>
    %1673 = tpu.reciprocal %1672 {approx = true} : vector<8x1xf32> -> vector<8x1xf32>
    %1674 = vector.broadcast %1673 : vector<8x1xf32> to vector<8x2xf32>
    %1675 = arith.mulf %1670, %1674 : vector<8x2xf32>
    %c0_494 = arith.constant 0 : index
    %c0_495 = arith.constant 0 : index
    %1676 = vector.load %arg18[%c0_494, %c0_495] : memref<8x2xf32, #tpu.memory_space<vmem>>, vector<8x2xf32>
    tpu.vector_store %arg18[%c0_494, %c0_495], %1675 {strides = array<i32>} : memref<8x2xf32, #tpu.memory_space<vmem>>, vector<8x2xf32>,
    return
  }
}

</mosaic_0001>

<bundles_post_ra>
// kernel: tpu_custom_call.1
= control target key start
LH: loop header
LB: loop body
LE: loop exit
PB: predicated region body
PF: predicated region fallthrough
CT: control target
= control target key end

     0   :  { %s6945_s0 = inlined_call_operand.vmem [shape: f32[8,8,8], index: 0, kind: input, shape index: {}]   ;;  %s6946_s1 = inlined_call_operand.vmem [shape: f32[8,8,1], index: 1, kind: input, shape index: {}]   ;;  %s6947_s2 = inlined_call_operand.hbm [shape: f32[8,64], index: 2, kind: input, shape index: {}]   ;;  %s6948_s3 = inlined_call_operand.hbm [shape: f32[16,64], index: 3, kind: input, shape index: {}]   ;;  %s6949_s4 = inlined_call_operand.hbm [shape: f32[1,64], index: 4, kind: input, shape index: {}]   ;;  %s6950_s5 = inlined_call_operand.hbm [shape: f32[8,64], index: 5, kind: input, shape index: {}]   ;;  %s6951_s6 = inlined_call_operand.hbm [shape: f32[16,64], index: 6, kind: input, shape index: {}]   ;;  %s6952_s7 = inlined_call_operand.vmem [shape: f32[1,64], index: 7, kind: input, shape index: {}]   ;;  %s6953_s8 = inlined_call_operand.vmem [shape: f32[32,64], index: 8, kind: input, shape index: {}]   ;;  %s6954_s9 = inlined_call_operand.hbm [shape: f32[16,64], index: 9, kind: input, shape index: {}]   ;;  %s6955_s10 = inlined_call_operand.hbm [shape: f32[1,64], index: 10, kind: input, shape index: {}]   ;;  %s6956_s11 = inlined_call_operand.vmem [shape: f32[32,64], index: 11, kind: input, shape index: {}]   ;;  %s6957_s12 = inlined_call_operand.vmem [shape: f32[16,64], index: 12, kind: input, shape index: {}]   ;;  %s6958_s13 = inlined_call_operand.vmem [shape: f32[1,64], index: 13, kind: input, shape index: {}]   ;;  %s6959_s14 = inlined_call_operand.hbm [shape: f32[32,32], index: 14, kind: input, shape index: {}]   ;;  %s6960_s15 = inlined_call_operand.vmem [shape: f32[1,32], index: 15, kind: input, shape index: {}]   ;;  %s6961_s16 = inlined_call_operand.vmem [shape: f32[32,2], index: 16, kind: input, shape index: {}]   ;;  %s6962_s17 = inlined_call_operand.vmem [shape: f32[1,2], index: 17, kind: input, shape index: {}]   ;;  %s6963_s18 = inlined_call_operand.vmem [shape: f32[8,2], index: 18, kind: output, shape index: {}]  }
   0x1   :  { %6967 = sst [smem:[#allocation21_spill]] %s6945_s0 }
   0x2   :  { %6968 = sst [smem:[#allocation22_spill]] %s6946_s1 }
   0x3   :  { %6969 = sst [smem:[#allocation23_spill]] %s6947_s2 }
   0x4   :  { %6970 = sst [smem:[#allocation24_spill]] %s6963_s18 }
   0x5   :  { %23 = vsyncpa [#allocation4], 0 }
   0x6   :  { %24 = vsyncpa [#allocation6], 0 }
   0x7   :  { %25 = vsyncpa [#allocation9], 0 }
   0x8   :  { %26 = vsyncpa [#allocation12], 0 }
   0x9   :  { %27 = vsyncpa [#allocation15], 0  ;;  %s5881_s27 = smov [#allocation5]   ;;  %s5695_s0 = scalar_lea.hbm %s6948_s3, 256 }
   0xa   :  { %s47_s28 = sshll.u32 %s5881_s27, 4  ;;  %p5696_p0 = scmp.ne.s32.totalorder %s6948_s3, %s5695_s0  ;;  %s48_s28 = int_to_ptr.vmem [resolvable:$true] %s47_s28 }
   0xb   :  { %p5699_p1 = scmp.lt.u32.totalorder %s5695_s0, %s6948_s3 }
   0xd   :  { %p5701_p2 = pnand %p5699_p1, %p5696_p0 }
   0xf   :  { %5704 = shalt.err (!%p5701_p2)
}
  0x10   :  { %s5705_s22 = scalar_lea.vmem %s48_s28, 256  ;;  %p5710_p4 = scmp.lt.s32.totalorder %s48_s28, %s48_s28 }
  0x11   :  { %p5706_p3 = scmp.ne.s32.totalorder %s48_s28, %s5705_s22  ;;  %p5711_p5 = scmp.lt.s32.totalorder %s5705_s22, %s5705_s22 }
  0x13   :  { %p5712_p6 = por %p5711_p5, %p5710_p4 }
  0x15   :  { %p5713_p7 = pnand %p5712_p6, %p5706_p3 }
  0x17   :  { %5716 = shalt.err (!%p5713_p7)
}
  0x18   :  { %s5882_s2 = smov 128   ;;  %s5883_s23 = smov 8  }
  0x19   :  { %53 = dma.hbm_to_vmem [thread:$0]  %s6948_s3, 256, %s48_s28, [#allocation6], %s5882_s2, %s5882_s2, %s5883_s23  }
  0x1a   :  { %s5884_s26 = smov [#allocation8]   ;;  %s5885_s29 = smov [#allocation11]  }
  0x1b   :  { %s70_s27 = sshll.u32 %s5884_s26, 4  ;;  %s95_s30 = sshll.u32 %s5885_s29, 4  ;;  %s71_s27 = int_to_ptr.vmem [resolvable:$true] %s70_s27  ;;  %s96_s30 = int_to_ptr.vmem [resolvable:$true] %s95_s30 }
  0x1c   :  { %s5717_s1 = scalar_lea.hbm %s6950_s5, 128 }
  0x1d   :  { %p5718_p8 = scmp.ne.s32.totalorder %s6950_s5, %s5717_s1  ;;  %p5721_p9 = scmp.lt.u32.totalorder %s5717_s1, %s6950_s5 }
  0x1f   :  { %p5723_p10 = pnand %p5721_p9, %p5718_p8 }
  0x21   :  { %5726 = shalt.err (!%p5723_p10)
}
  0x22   :  { %s5727_s3 = scalar_lea.vmem %s71_s27, 128  ;;  %p5732_p12 = scmp.lt.s32.totalorder %s71_s27, %s71_s27 }
  0x23   :  { %p5728_p11 = scmp.ne.s32.totalorder %s71_s27, %s5727_s3  ;;  %p5733_p13 = scmp.lt.s32.totalorder %s5727_s3, %s5727_s3 }
  0x25   :  { %p5734_p0 = por %p5733_p13, %p5732_p12 }
  0x27   :  { %p5735_p1 = pnand %p5734_p0, %p5728_p11 }
  0x29   :  { %5738 = shalt.err (!%p5735_p1)
}
  0x2a   :  { %73 = dma.hbm_to_vmem [thread:$0]  %s6950_s5, 128, %s71_s27, [#allocation9]  }
  0x2b   :  { %s5739_s29 = scalar_lea.hbm %s6954_s9, 256 }
  0x2c   :  { %p5740_p2 = scmp.ne.s32.totalorder %s6954_s9, %s5739_s29  ;;  %p5743_p3 = scmp.lt.u32.totalorder %s5739_s29, %s6954_s9 }
  0x2e   :  { %p5745_p4 = pnand %p5743_p3, %p5740_p2 }
  0x30   :  { %5748 = shalt.err (!%p5745_p4)
}
  0x31   :  { %s5749_s20 = scalar_lea.vmem %s96_s30, 256  ;;  %p5754_p6 = scmp.lt.s32.totalorder %s96_s30, %s96_s30 }
  0x32   :  { %p5750_p5 = scmp.ne.s32.totalorder %s96_s30, %s5749_s20  ;;  %p5755_p7 = scmp.lt.s32.totalorder %s5749_s20, %s5749_s20 }
  0x34   :  { %p5756_p8 = por %p5755_p7, %p5754_p6 }
  0x36   :  { %p5757_p9 = pnand %p5756_p8, %p5750_p5 }
  0x38   :  { %5760 = shalt.err (!%p5757_p9)
}
  0x39   :  { %101 = dma.hbm_to_vmem [thread:$0]  %s6954_s9, 256, %s96_s30, [#allocation12], %s5882_s2, %s5882_s2, %s5883_s23  }
  0x3a   :  { %s5886_s21 = smov [#allocation3]   ;;  %s5887_s3 = smov [#allocation7]  }
  0x3b   :  { %s38_s22 = sshll.u32 %s5886_s21, 4  ;;  %s60_s28 = sshll.u32 %s5887_s3, 4  ;;  %s39_s22 = int_to_ptr.vmem [resolvable:$true] %s38_s22  ;;  %s61_s28 = int_to_ptr.vmem [resolvable:$true] %s60_s28 }
  0x3c   :  { %s6971_s26 = sld [smem:[#allocation23_spill]] }
  0x42   :  { %s5761_s29 = scalar_lea.hbm %s6971_s26, 128 }
  0x43   :  { %p5762_p10 = scmp.ne.s32.totalorder %s6971_s26, %s5761_s29  ;;  %p5765_p11 = scmp.lt.u32.totalorder %s5761_s29, %s6971_s26 }
  0x45   :  { %p5767_p12 = pnand %p5765_p11, %p5762_p10 }
  0x47   :  { %5770 = shalt.err (!%p5767_p12)
}
  0x48   :  { %s5771_s9 = scalar_lea.vmem %s39_s22, 128  ;;  %p5776_p0 = scmp.lt.s32.totalorder %s39_s22, %s39_s22 }
  0x49   :  { %p5772_p13 = scmp.ne.s32.totalorder %s39_s22, %s5771_s9  ;;  %p5777_p1 = scmp.lt.s32.totalorder %s5771_s9, %s5771_s9 }
  0x4b   :  { %p5778_p2 = por %p5777_p1, %p5776_p0 }
  0x4d   :  { %p5779_p3 = pnand %p5778_p2, %p5772_p13 }
  0x4f   :  { %5782 = shalt.err (!%p5779_p3)
}
  0x50   :  { %41 = dma.hbm_to_vmem [thread:$0]  %s6971_s26, 128, %s39_s22, [#allocation4]  }
  0x51   :  { %s5783_s21 = scalar_lea.hbm %s6949_s4, 16 }
  0x52   :  { %p5784_p4 = scmp.ne.s32.totalorder %s6949_s4, %s5783_s21  ;;  %p5787_p5 = scmp.lt.u32.totalorder %s5783_s21, %s6949_s4 }
  0x54   :  { %p5789_p6 = pnand %p5787_p5, %p5784_p4 }
  0x56   :  { %5792 = shalt.err (!%p5789_p6)
}
  0x57   :  { %s5793_s18 = scalar_lea.vmem %s61_s28, 16  ;;  %s5797_s0 = scalar_lea.vmem %s61_s28, 32 }
  0x58   :  { %p5794_p7 = scmp.ne.s32.totalorder %s61_s28, %s5793_s18  ;;  %p5798_p8 = scmp.lt.s32.totalorder %s61_s28, %s61_s28 }
  0x59   :  { %p5799_p9 = scmp.lt.s32.totalorder %s5797_s0, %s5793_s18 }
  0x5b   :  { %p5800_p10 = por %p5799_p9, %p5798_p8 }
  0x5d   :  { %p5801_p11 = pnand %p5800_p10, %p5794_p7 }
  0x5f   :  { %5804 = shalt.err (!%p5801_p11)
}
  0x60   :  { %63 = dma.hbm_to_vmem [thread:$0]  %s6949_s4, 16, %s61_s28, [#allocation6]  }
  0x61   :  { %s5888_s19 = smov [#allocation10]   ;;  %s5889_s9 = smov [#allocation13]  }
  0x62   :  { %s79_s1 = sshll.u32 %s5888_s19, 4  ;;  %s108_s30 = sshll.u32 %s5889_s9, 4  ;;  %s80_s1 = int_to_ptr.vmem [resolvable:$true] %s79_s1  ;;  %s109_s30 = int_to_ptr.vmem [resolvable:$true] %s108_s30 }
  0x63   :  { %s5805_s27 = scalar_lea.hbm %s6951_s6, 256 }
  0x64   :  { %p5806_p12 = scmp.ne.s32.totalorder %s6951_s6, %s5805_s27  ;;  %p5809_p13 = scmp.lt.u32.totalorder %s5805_s27, %s6951_s6 }
  0x66   :  { %p5811_p0 = pnand %p5809_p13, %p5806_p12 }
  0x68   :  { %5814 = shalt.err (!%p5811_p0)
}
  0x69   :  { %s5815_s4 = scalar_lea.vmem %s80_s1, 256  ;;  %p5820_p2 = scmp.lt.s32.totalorder %s80_s1, %s80_s1 }
  0x6a   :  { %p5816_p1 = scmp.ne.s32.totalorder %s80_s1, %s5815_s4  ;;  %p5821_p3 = scmp.lt.s32.totalorder %s5815_s4, %s5815_s4 }
  0x6c   :  { %p5822_p4 = por %p5821_p3, %p5820_p2 }
  0x6e   :  { %p5823_p5 = pnand %p5822_p4, %p5816_p1 }
  0x70   :  { %5826 = shalt.err (!%p5823_p5)
}
  0x71   :  { %85 = dma.hbm_to_vmem [thread:$0]  %s6951_s6, 256, %s80_s1, [#allocation9], %s5882_s2, %s5882_s2, %s5883_s23  }
  0x72   :  { %s5827_s22 = scalar_lea.hbm %s6955_s10, 16 }
  0x73   :  { %p5828_p6 = scmp.ne.s32.totalorder %s6955_s10, %s5827_s22  ;;  %p5831_p7 = scmp.lt.u32.totalorder %s5827_s22, %s6955_s10 }
  0x75   :  { %p5833_p8 = pnand %p5831_p7, %p5828_p6 }
  0x77   :  { %5836 = shalt.err (!%p5833_p8)
}
  0x78   :  { %s5837_s5 = scalar_lea.vmem %s109_s30, 16  ;;  %s5841_s27 = scalar_lea.vmem %s109_s30, 32 }
  0x79   :  { %p5838_p9 = scmp.ne.s32.totalorder %s109_s30, %s5837_s5  ;;  %p5842_p10 = scmp.lt.s32.totalorder %s109_s30, %s109_s30 }
  0x7a   :  { %p5843_p11 = scmp.lt.s32.totalorder %s5841_s27, %s5837_s5 }
  0x7c   :  { %p5844_p12 = por %p5843_p11, %p5842_p10 }
  0x7e   :  { %p5845_p13 = pnand %p5844_p12, %p5838_p9 }
  0x80   :  { %5848 = shalt.err (!%p5845_p13)
}
  0x81   :  { %111 = dma.hbm_to_vmem [thread:$0]  %s6955_s10, 16, %s109_s30, [#allocation12]  }
  0x82   :  { %s5890_s21 = smov [#allocation14]   ;;  %s5849_s4 = scalar_lea.hbm %s6959_s14, 512 }
  0x83   :  { %s123_s3 = sshll.u32 %s5890_s21, 4  ;;  %p5850_p0 = scmp.ne.s32.totalorder %s6959_s14, %s5849_s4  ;;  %s124_s3 = int_to_ptr.vmem [resolvable:$true] %s123_s3 }
  0x84   :  { %p5853_p1 = scmp.lt.u32.totalorder %s5849_s4, %s6959_s14 }
  0x86   :  { %p5855_p2 = pnand %p5853_p1, %p5850_p0 }
  0x88   :  { %5858 = shalt.err (!%p5855_p2)
}
  0x89   :  { %s5859_s22 = scalar_lea.vmem %s124_s3, 512  ;;  %p5864_p4 = scmp.lt.s32.totalorder %s124_s3, %s124_s3 }
  0x8a   :  { %p5860_p3 = scmp.ne.s32.totalorder %s124_s3, %s5859_s22  ;;  %p5865_p5 = scmp.lt.s32.totalorder %s5859_s22, %s5859_s22 }
  0x8c   :  { %p5866_p6 = por %p5865_p5, %p5864_p4 }
  0x8e   :  { %p5867_p7 = pnand %p5866_p6, %p5860_p3 }
  0x90   :  { %5870 = shalt.err (!%p5867_p7)
}
  0x91   :  { %129 = dma.hbm_to_vmem [thread:$0]  %s6959_s14, 512, %s124_s3, [#allocation15], %s5882_s2, %s5882_s2, %s5883_s23  }
  0x92   :  { %5871 = dma.done.wait [#allocation4], 128  }
  0x93   :  { %5872 = vsyncadd [#allocation4], 4294967168 }
  0x94   :  { %5873 = dma.done.wait [#allocation6], 272  }
  0x95   :  { %5874 = vsyncadd [#allocation6], 4294967024 }
  0x96   :  { %5875 = dma.done.wait [#allocation9], 384  }
  0x97   :  { %5876 = vsyncadd [#allocation9], 4294966912 }
  0x98   :  { %5877 = dma.done.wait [#allocation12], 272  }
  0x99   :  { %5878 = vsyncadd [#allocation12], 4294967024 }
  0x9a   :  { %5879 = dma.done.wait [#allocation15], 512  }
  0x9b   :  { %5880 = vsyncadd [#allocation15], 4294966784  ;;  %v5891_v0 = vmov 0.0|0.0   ;;  %vm5892_vm0 = vmmov 0   ;;  %v5893_v1 = vmov 0.0   ;;  %vm193_vm1 = vcmask 64512  }
  0x9c   :  { %5260 = vmatprep.subr.bf16.mxu1 %v5891_v0  ;;  %4944 = vmatprep.mubr.msk.f32.mxu1 %vm5892_vm0, %v5893_v1  ;;  %v183_v2 = vld [vmem:[#allocation3] sm:$0xff]  ;;  %s6972_s23 = sld [smem:[#allocation21_spill]]  ;;  %v184_v5 = vld [vmem:[#allocation5] sm:$0xff]  ;;  %v185_v6 = vld [vmem:[#allocation5 + $0x8] sm:$0xff]  ;;  %s6973_s0 = sld [smem:[#allocation22_spill]]  ;;  %v5894_v15 = vmov 0  }
  0x9d   :  { %4919 = vmatprep.subr.mxu0 %v183_v2  ;;  %v6122_v8 = vpack.c.bf16 %v185_v6, %v184_v5  ;;  %5431 = vset.pattern.permute.xlu1 %v5894_v15  ;;  %v4671_v17 = vld [vmem:[#allocation7] ss:$0 sm:$0xff]  ;;  %s5895_s22 = smov 96   ;;  %s5896_s10 = smov 16   ;;  %vm323_vm2 = vcmask 130048   ;;  %vm4483_vm3 = vcmask 261120  }
  0x9e   :  { %4920 = vmatpush3.msra.mxu0 %v183_v2  ;;  %5432 = vset.pattern.permute.xlu0 %v5894_v15  ;;  %s5897_s30 = smov 32   ;;  %s5898_s14 = smov 80   ;;  %vm4642_vm4 = vcmask 15360  }
  0x9f   :  { %5257 = vmatprep.subr.bf16.mxu0 %v5891_v0  ;;  %5262 = vmatpush3.bf16.msra.mxu1 %v6122_v8 }
  0xa0   :  { %5263 = vmatprep.subr.bf16.mxu1 %v5891_v0 }
  0xa2   :  { %v6108_v3 = vld [vmem:[%s6972_s23] sm:$0xff]  ;;  %v6113_v4 = vld [vmem:[%s6972_s23 + $0x8] sm:$0xff]  ;;  %v6120_v7 = vld [vmem:[%s6972_s23 + $0x10] sm:$0xff] }
  0xa3   :  { %4921 = vmatprep.mubr.msk.f32.mxu0 %vm193_vm1, %v6108_v3  ;;  %v6133_v9 = vld [vmem:[%s6972_s23 + $0x18] sm:$0xff]  ;;  %v6138_v10 = vld [vmem:[%s6972_s23 + $0x20] sm:$0xff]  ;;  %v6150_v11 = vld [vmem:[%s6972_s23 + $0x28] sm:$0xff] }
  0xa4   :  { %4922 = vmatmul.mubr.msk.f32.vlgmr.msra.gmra.mrb[0].mxu0 %vm193_vm1, %v6113_v4  ;;  %v6155_v12 = vld [vmem:[%s6972_s23 + $0x30] sm:$0xff]  ;;  %v6164_v13 = vld [vmem:[%s6972_s23 + $0x38] sm:$0xff]  ;;  %v160_v14 = vld [vmem:[%s6973_s0] sm:$0xff] }
  0xa5   :  { %5259 = vmatpush3.bf16.msra.mxu0 %v6122_v8  ;;  %4924 = vmatprep.mubr.msk.f32.mxu0 %vm193_vm1, %v6120_v7  ;;  %v428_v16 = vsub.f32 1.0, %v160_v14  ;;  %v4664_v61 = vld [vmem:[%s6973_s0 + $0x8] sm:$0xff] }
  0xa6   :  { %5269 = vmatprep.subr.bf16.mxu0 %v5891_v0  ;;  %424 = vperm.xlu1 %5431, %v160_v14  }
  0xa8   :  { %4925 = vmatmul.mubr.msk.f32.gmra.mrb[2].mxu0 %vm193_vm1, %v6133_v9 }
  0xa9   :  { %4927 = vmatprep.mubr.msk.f32.mxu0 %vm193_vm1, %v6138_v10 }
  0xaa   :  { %431 = vperm.xlu1 %5431, %v428_v16   ;;  %v546_v16 = vsub.f32 1.0, %v4664_v61 }
  0xac   :  { %4928 = vmatmul.mubr.msk.f32.gmra.mrb[4].mxu0 %vm193_vm1, %v6150_v11 }
  0xad   :  { %4930 = vmatprep.mubr.msk.f32.mxu0 %vm193_vm1, %v6155_v12 }
  0xb0   :  { %4931 = vmatmul.mubr.msk.f32.gmra.mrb[6].mxu0 %vm193_vm1, %v6164_v13 }
  0xb1   :  { %4937 = vmatprep.mubr.msk.f32.mxu0 %vm5892_vm0, %v5893_v1 }
  0xb4   :  { %4938 = vmatmul.mubr.f32.vlgmr.msra.gmra.mrb[8].mxu0 %v5893_v1 }
  0xb5   :  { %5271 = vmatpush3.bf16.msra.mxu0 %v6122_v8  ;;  %4965 = vmatprep.mubr.msk.f32.mxu0 %vm5892_vm0, %v5893_v1 }
  0xb6   :  { %5275 = vmatprep.subr.bf16.mxu0 %v5891_v0 }
 0x125   :  { %v6193_v49 = vpop.permute.xlu1 %424 }
 0x129   :  { %v6195_v50 = vpop.permute.xlu1 %431 }
 0x12a   :  { %v6198_v53 = vmul.f32 0.0, %v6195_v50 }
 0x177   :  { %v4923_v18 = vpop.f32.mrb[0].mxu0 }
 0x178   :  { %v290_v19 = vadd.f32 %v4923_v18, %v4671_v17  ;;  %v284_v20 = vpop.f32.mrb[1].mxu0 }
 0x179   :  { %v285_v33 = vadd.f32 %v4671_v17, %v284_v20 }
 0x17b   :  { %v4926_v21 = vpop.f32.mrb[2].mxu0 }
 0x17c   :  { %v6178_v22 = vadd.f32 %v4926_v21, %v4671_v17  ;;  %v294_v23 = vpop.f32.mrb[3].mxu0 }
 0x17d   :  { %v6180_v24 = vadd.f32 %v4671_v17, %v294_v23 }
 0x17f   :  { %v4929_v25 = vpop.f32.mrb[4].mxu0 }
 0x180   :  { %v6182_v26 = vadd.f32 %v4929_v25, %v4671_v17  ;;  %v304_v27 = vpop.f32.mrb[5].mxu0 }
 0x181   :  { %v6184_v28 = vadd.f32 %v4671_v17, %v304_v27 }
 0x183   :  { %v4932_v29 = vpop.f32.mrb[6].mxu0 }
 0x184   :  { %v6186_v30 = vadd.f32 %v4932_v29, %v4671_v17  ;;  %v314_v31 = vpop.f32.mrb[7].mxu0 }
 0x185   :  { %v6188_v32 = vadd.f32 %v4671_v17, %v314_v31 }
 0x187   :  { %v393_v34 = vpop.f32.mrb[8].mxu0 }
 0x188   :  { %v397_v35 = vadd.f32 %v393_v34, %v285_v33  ;;  %v4939_v36 = vpop.f32.mrb[9].mxu0 }
 0x18a   :  { %5433 = vtanh.f32 %v397_v35  ;;  %v398_v38 = vsub.f32 0.0, %v397_v35 }
 0x18c   :  { %v399_v39 = vmul.f32 1.442695, %v398_v38 }
 0x18e   :  { %5435 = vpow2.f32 %v399_v39 }
 0x194   :  { %v5434_v37 = vpop.eup %5433 }
 0x195   :  { %407 = vrot.lane.b32.xlu0 %v5434_v37, %s5895_s22 }
 0x198   :  { %v5436_v40 = vpop.eup %5435 }
 0x199   :  { %v401_v41 = vadd.f32 1.0, %v5436_v40 }
 0x19b   :  { %5437 = vrcp.f32 %v401_v41  ;;  %v4665_v41 = vld [vmem:[%s6973_s0 + $0x10] sm:$0xff] }
 0x1a5   :  { %v5438_v42 = vpop.eup %5437 }
 0x1a6   :  { %v405_v45 = vmul.f32 0.0, %v5438_v42 }
 0x207   :  { %v408_v43 = vpop.permute.xlu0 %407 }
 0x208   :  { %v410_v44 = vmul.f32 %v5438_v42, %v408_v43 }
 0x20a   :  { %412 = vrot.lane.b32.xlu0 %v410_v44, %s5896_s10 }
 0x27c   :  { %v413_v46 = vpop.permute.xlu0 %412 }
 0x27d   :  { %v415_v47 = vadd.f32 %v413_v46, %v405_v45 }
 0x27f   :  { %5439 = vtanh.f32 %v415_v47  ;;  %v436_v17 = vmul.f32 %v6193_v49, %v415_v47 }
 0x281   :  { %v437_v18 = vadd.f32 %v436_v17, %v6198_v53 }
 0x289   :  { %v5440_v48 = vpop.eup %5439 }
 0x28a   :  { %418 = vrot.lane.b32.xlu0 %v5440_v48, %s5897_s30 }
 0x2fc   :  { %v419_v51 = vpop.permute.xlu0 %418 }
 0x2fd   :  { %v421_v52 = vmul.f32 %v5438_v42, %v419_v51 }
 0x2ff   :  { %v427_v54 = vmul.f32 %v6193_v49, %v421_v52 }
 0x301   :  { %v435_v55 = vadd.f32 %v6198_v53, %v427_v54 }
 0x303   :  { %439 = vrot.lane.b32.xlu1 %v435_v55, %s5898_s14 }
 0x375   :  { %v440_v56 = vpop.permute.xlu1 %439 }
 0x376   :  { %442 = vst.msk [vmem:[#allocation2] sm:$0xff] %vm323_vm2, %v440_v56  ;;  %4945 = vmatmul.mubr.msk.f32.vlgmr.msra.gmra.mrb[0].mxu1 %vm323_vm2, %v440_v56 }
 0x377   :  { %5265 = vmatpush3.bf16.msra.mxu1 %v6122_v8  ;;  %4951 = vmatprep.mubr.msk.f32.mxu1 %vm5892_vm0, %v5893_v1 }
 0x378   :  { %5266 = vmatprep.subr.bf16.mxu1 %v5891_v0 }
 0x449   :  { %v511_v57 = vpop.f32.mrb[0].mxu1 }
 0x44a   :  { %v515_v58 = vadd.f32 %v511_v57, %v290_v19  ;;  %v4946_v59 = vpop.f32.mrb[1].mxu1 }
 0x44c   :  { %5441 = vtanh.f32 %v515_v58  ;;  %v516_v62 = vsub.f32 0.0, %v515_v58 }
 0x44e   :  { %v517_v63 = vmul.f32 1.442695, %v516_v62 }
 0x450   :  { %5443 = vpow2.f32 %v517_v63 }
 0x456   :  { %v5442_v60 = vpop.eup %5441 }
 0x457   :  { %525 = vrot.lane.b32.xlu0 %v5442_v60, %s5895_s22 }
 0x45a   :  { %v5444_v2 = vpop.eup %5443 }
 0x45b   :  { %542 = vperm.xlu0 %5432, %v4664_v61   ;;  %v519_v5 = vadd.f32 1.0, %v5444_v2 }
 0x45d   :  { %5445 = vrcp.f32 %v519_v5 }
 0x467   :  { %v5446_v6 = vpop.eup %5445 }
 0x468   :  { %v523_v19 = vmul.f32 %v5446_v6, %v437_v18 }
 0x4c9   :  { %v526_v14 = vpop.permute.xlu0 %525 }
 0x4ca   :  { %v528_v15 = vmul.f32 %v5446_v6, %v526_v14 }
 0x4cc   :  { %530 = vrot.lane.b32.xlu1 %v528_v15, %s5896_s10 }
 0x4d0   :  { %549 = vperm.xlu1 %5431, %v546_v16  }
 0x4da   :  { %v6219_v31 = vpop.permute.xlu0 %542 }
 0x53e   :  { %v531_v20 = vpop.permute.xlu1 %530 }
 0x53f   :  { %v533_v21 = vadd.f32 %v531_v20, %v523_v19 }
 0x541   :  { %5447 = vtanh.f32 %v533_v21  ;;  %v554_v52 = vmul.f32 %v6219_v31, %v533_v21 }
 0x54b   :  { %v5448_v23 = vpop.eup %5447 }
 0x54c   :  { %536 = vrot.lane.b32.xlu1 %v5448_v23, %s5897_s30 }
 0x54f   :  { %v6217_v25 = vpop.permute.xlu1 %549 }
 0x550   :  { %v552_v34 = vmul.f32 %v6217_v25, %v435_v55  ;;  %v555_v51 = vmul.f32 %v6217_v25, %v437_v18  ;;  %v4666_v18 = vld [vmem:[%s6973_s0 + $0x18] sm:$0xff] }
 0x552   :  { %v556_v54 = vadd.f32 %v555_v51, %v554_v52 }
 0x5be   :  { %v537_v27 = vpop.permute.xlu1 %536 }
 0x5bf   :  { %v539_v29 = vmul.f32 %v5446_v6, %v537_v27 }
 0x5c1   :  { %v545_v33 = vmul.f32 %v6219_v31, %v539_v29 }
 0x5c3   :  { %v553_v35 = vadd.f32 %v552_v34, %v545_v33 }
 0x5c5   :  { %558 = vrot.lane.b32.xlu0 %v553_v35, %s5898_s14 }
 0x637   :  { %v559_v36 = vpop.permute.xlu0 %558 }
 0x638   :  { %562 = vst.msk [vmem:[#allocation2 + $0x8] sm:$0xff] %vm323_vm2, %v559_v36  ;;  %4952 = vmatmul.mubr.msk.f32.vlgmr.msra.gmra.mrb[2].mxu1 %vm323_vm2, %v559_v36 }
 0x639   :  { %5268 = vmatpush3.bf16.msra.mxu1 %v6122_v8  ;;  %4958 = vmatprep.mubr.msk.f32.mxu1 %vm5892_vm0, %v5893_v1 }
 0x63a   :  { %5272 = vmatprep.subr.bf16.mxu1 %v5891_v0 }
 0x70b   :  { %v631_v37 = vpop.f32.mrb[2].mxu1 }
 0x70c   :  { %v635_v38 = vadd.f32 %v631_v37, %v6180_v24  ;;  %v4953_v39 = vpop.f32.mrb[3].mxu1  ;;  %v666_v24 = vsub.f32 1.0, %v4665_v41 }
 0x70e   :  { %5449 = vtanh.f32 %v635_v38  ;;  %v636_v42 = vsub.f32 0.0, %v635_v38 }
 0x710   :  { %v637_v43 = vmul.f32 1.442695, %v636_v42 }
 0x712   :  { %5451 = vpow2.f32 %v637_v43 }
 0x718   :  { %v5450_v40 = vpop.eup %5449 }
 0x719   :  { %645 = vrot.lane.b32.xlu1 %v5450_v40, %s5895_s22 }
 0x71c   :  { %v5452_v44 = vpop.eup %5451 }
 0x71d   :  { %662 = vperm.xlu1 %5431, %v4665_v41   ;;  %v639_v45 = vadd.f32 1.0, %v5452_v44 }
 0x71f   :  { %5453 = vrcp.f32 %v639_v45 }
 0x729   :  { %v5454_v46 = vpop.eup %5453 }
 0x72a   :  { %v643_v55 = vmul.f32 %v5454_v46, %v556_v54 }
 0x78b   :  { %v646_v47 = vpop.permute.xlu1 %645 }
 0x78c   :  { %v648_v48 = vmul.f32 %v5454_v46, %v646_v47 }
 0x78e   :  { %650 = vrot.lane.b32.xlu0 %v648_v48, %s5896_s10 }
 0x792   :  { %669 = vperm.xlu0 %5432, %v666_v24  }
 0x79c   :  { %v6239_v59 = vpop.permute.xlu1 %662 }
 0x800   :  { %v651_v56 = vpop.permute.xlu0 %650 }
 0x801   :  { %v653_v57 = vadd.f32 %v651_v56, %v643_v55  ;;  %v4667_v55 = vld [vmem:[%s6973_s0 + $0x20] sm:$0xff] }
 0x803   :  { %5455 = vtanh.f32 %v653_v57 }
 0x80d   :  { %v5456_v58 = vpop.eup %5455 }
 0x80e   :  { %656 = vrot.lane.b32.xlu1 %v5456_v58, %s5897_s30 }
 0x811   :  { %v6241_v60 = vpop.permute.xlu0 %669 }
 0x812   :  { %v672_v2 = vmul.f32 %v6241_v60, %v553_v35  ;;  %v675_v34 = vmul.f32 %v6241_v60, %v556_v54  ;;  %v674_v35 = vmul.f32 %v6239_v59, %v653_v57 }
 0x814   :  { %v676_v36 = vadd.f32 %v675_v34, %v674_v35 }
 0x880   :  { %v657_v61 = vpop.permute.xlu1 %656 }
 0x881   :  { %v659_v62 = vmul.f32 %v5454_v46, %v657_v61 }
 0x883   :  { %v665_v63 = vmul.f32 %v6239_v59, %v659_v62 }
 0x885   :  { %v673_v5 = vadd.f32 %v672_v2, %v665_v63 }
 0x887   :  { %678 = vrot.lane.b32.xlu0 %v673_v5, %s5898_s14 }
 0x8f9   :  { %v679_v6 = vpop.permute.xlu0 %678 }
 0x8fa   :  { %682 = vst.msk [vmem:[#allocation2 + $0x10] sm:$0xff] %vm323_vm2, %v679_v6  ;;  %4959 = vmatmul.mubr.msk.f32.vlgmr.msra.gmra.mrb[4].mxu1 %vm323_vm2, %v679_v6 }
 0x8fb   :  { %5274 = vmatpush3.bf16.msra.mxu1 %v6122_v8  ;;  %4972 = vmatprep.mubr.msk.f32.mxu1 %vm5892_vm0, %v5893_v1 }
 0x8fc   :  { %5278 = vmatprep.subr.bf16.mxu1 %v5891_v0 }
 0x9cd   :  { %v751_v14 = vpop.f32.mrb[4].mxu1 }
 0x9ce   :  { %v755_v15 = vadd.f32 %v751_v14, %v6178_v22  ;;  %v4960_v16 = vpop.f32.mrb[5].mxu1  ;;  %v786_v22 = vsub.f32 1.0, %v4666_v18 }
 0x9d0   :  { %5457 = vtanh.f32 %v755_v15  ;;  %v756_v19 = vsub.f32 0.0, %v755_v15 }
 0x9d2   :  { %v757_v20 = vmul.f32 1.442695, %v756_v19 }
 0x9d4   :  { %5459 = vpow2.f32 %v757_v20 }
 0x9da   :  { %v5458_v17 = vpop.eup %5457 }
 0x9db   :  { %765 = vrot.lane.b32.xlu1 %v5458_v17, %s5895_s22 }
 0x9de   :  { %v5460_v21 = vpop.eup %5459 }
 0x9df   :  { %782 = vperm.xlu1 %5431, %v4666_v18   ;;  %v759_v23 = vadd.f32 1.0, %v5460_v21 }
 0x9e1   :  { %5461 = vrcp.f32 %v759_v23 }
 0x9eb   :  { %v5462_v27 = vpop.eup %5461 }
 0x9ec   :  { %v763_v37 = vmul.f32 %v5462_v27, %v676_v36 }
 0xa4d   :  { %v766_v29 = vpop.permute.xlu1 %765 }
 0xa4e   :  { %v768_v33 = vmul.f32 %v5462_v27, %v766_v29 }
 0xa50   :  { %770 = vrot.lane.b32.xlu0 %v768_v33, %s5896_s10 }
 0xa54   :  { %789 = vperm.xlu0 %5432, %v786_v22  }
 0xa5e   :  { %v6261_v41 = vpop.permute.xlu1 %782 }
 0xac2   :  { %v771_v38 = vpop.permute.xlu0 %770 }
 0xac3   :  { %v773_v39 = vadd.f32 %v771_v38, %v763_v37  ;;  %v4668_v38 = vld [vmem:[%s6973_s0 + $0x28] sm:$0xff] }
 0xac5   :  { %5463 = vtanh.f32 %v773_v39  ;;  %v794_v6 = vmul.f32 %v6261_v41, %v773_v39 }
 0xacf   :  { %v5464_v40 = vpop.eup %5463 }
 0xad0   :  { %776 = vrot.lane.b32.xlu1 %v5464_v40, %s5897_s30 }
 0xad3   :  { %v6263_v42 = vpop.permute.xlu0 %789 }
 0xad4   :  { %v792_v46 = vmul.f32 %v6263_v42, %v673_v5  ;;  %v795_v5 = vmul.f32 %v6263_v42, %v676_v36 }
 0xad6   :  { %v796_v14 = vadd.f32 %v795_v5, %v794_v6 }
 0xb42   :  { %v777_v43 = vpop.permute.xlu1 %776 }
 0xb43   :  { %v779_v44 = vmul.f32 %v5462_v27, %v777_v43 }
 0xb45   :  { %v785_v45 = vmul.f32 %v6261_v41, %v779_v44 }
 0xb47   :  { %v793_v47 = vadd.f32 %v792_v46, %v785_v45 }
 0xb49   :  { %798 = vrot.lane.b32.xlu0 %v793_v47, %s5898_s14 }
 0xbbb   :  { %v799_v48 = vpop.permute.xlu0 %798 }
 0xbbc   :  { %802 = vst.msk [vmem:[#allocation2 + $0x18] sm:$0xff] %vm323_vm2, %v799_v48  ;;  %4966 = vmatmul.mubr.msk.f32.vlgmr.msra.gmra.mrb[10].mxu0 %vm323_vm2, %v799_v48 }
 0xbbd   :  { %5277 = vmatpush3.bf16.msra.mxu0 %v6122_v8  ;;  %4979 = vmatprep.mubr.msk.f32.mxu0 %vm5892_vm0, %v5893_v1 }
 0xc8f   :  { %v871_v24 = vpop.f32.mrb[10].mxu0 }
 0xc90   :  { %v875_v51 = vadd.f32 %v871_v24, %v6184_v28  ;;  %v4967_v52 = vpop.f32.mrb[11].mxu0  ;;  %v906_v28 = vsub.f32 1.0, %v4667_v55 }
 0xc92   :  { %5465 = vtanh.f32 %v875_v51  ;;  %v876_v56 = vsub.f32 0.0, %v875_v51 }
 0xc94   :  { %v877_v57 = vmul.f32 1.442695, %v876_v56 }
 0xc96   :  { %5467 = vpow2.f32 %v877_v57 }
 0xc9c   :  { %v5466_v54 = vpop.eup %5465 }
 0xc9d   :  { %885 = vrot.lane.b32.xlu1 %v5466_v54, %s5895_s22 }
 0xca0   :  { %v5468_v58 = vpop.eup %5467 }
 0xca1   :  { %902 = vperm.xlu1 %5431, %v4667_v55   ;;  %v879_v61 = vadd.f32 1.0, %v5468_v58 }
 0xca3   :  { %5469 = vrcp.f32 %v879_v61 }
 0xcad   :  { %v5470_v62 = vpop.eup %5469 }
 0xcae   :  { %v883_v15 = vmul.f32 %v5470_v62, %v796_v14 }
 0xd0f   :  { %v886_v63 = vpop.permute.xlu1 %885 }
 0xd10   :  { %v888_v2 = vmul.f32 %v5470_v62, %v886_v63 }
 0xd12   :  { %890 = vrot.lane.b32.xlu0 %v888_v2, %s5896_s10 }
 0xd16   :  { %909 = vperm.xlu0 %5432, %v906_v28  }
 0xd20   :  { %v6282_v19 = vpop.permute.xlu1 %902 }
 0xd84   :  { %v891_v16 = vpop.permute.xlu0 %890 }
 0xd85   :  { %v893_v17 = vadd.f32 %v891_v16, %v883_v15  ;;  %v4669_v16 = vld [vmem:[%s6973_s0 + $0x30] sm:$0xff] }
 0xd87   :  { %5471 = vtanh.f32 %v893_v17  ;;  %v914_v48 = vmul.f32 %v6282_v19, %v893_v17 }
 0xd91   :  { %v5472_v18 = vpop.eup %5471 }
 0xd92   :  { %896 = vrot.lane.b32.xlu1 %v5472_v18, %s5897_s30 }
 0xd95   :  { %v6284_v20 = vpop.permute.xlu0 %909 }
 0xd96   :  { %v912_v29 = vmul.f32 %v6284_v20, %v793_v47  ;;  %v915_v47 = vmul.f32 %v6284_v20, %v796_v14 }
 0xd98   :  { %v916_v24 = vadd.f32 %v915_v47, %v914_v48 }
 0xe04   :  { %v897_v21 = vpop.permute.xlu1 %896 }
 0xe05   :  { %v899_v23 = vmul.f32 %v5470_v62, %v897_v21 }
 0xe07   :  { %v905_v27 = vmul.f32 %v6282_v19, %v899_v23 }
 0xe09   :  { %v913_v33 = vadd.f32 %v912_v29, %v905_v27 }
 0xe0b   :  { %918 = vrot.lane.b32.xlu0 %v913_v33, %s5898_s14 }
 0xe7d   :  { %v919_v22 = vpop.permute.xlu0 %918 }
 0xe7e   :  { %922 = vst.msk [vmem:[#allocation2 + $0x20] sm:$0xff] %vm323_vm2, %v919_v22  ;;  %4973 = vmatmul.mubr.msk.f32.vlgmr.msra.gmra.mrb[6].mxu1 %vm323_vm2, %v919_v22 }
 0xe7f   :  { %5280 = vmatpush3.bf16.msra.mxu1 %v6122_v8  ;;  %4986 = vmatprep.mubr.msk.f32.mxu1 %vm5892_vm0, %v5893_v1 }
 0xe80   :  { %5281 = vmatprep.subr.bf16.mxu1 %v5891_v0 }
 0xf51   :  { %v991_v34 = vpop.f32.mrb[6].mxu1 }
 0xf52   :  { %v995_v35 = vadd.f32 %v991_v34, %v6182_v26  ;;  %v4974_v36 = vpop.f32.mrb[7].mxu1  ;;  %v1026_v26 = vsub.f32 1.0, %v4668_v38 }
 0xf54   :  { %5473 = vtanh.f32 %v995_v35  ;;  %v996_v39 = vsub.f32 0.0, %v995_v35 }
 0xf56   :  { %v997_v8 = vmul.f32 1.442695, %v996_v39 }
 0xf58   :  { %5475 = vpow2.f32 %v997_v8 }
 0xf5e   :  { %v5474_v37 = vpop.eup %5473 }
 0xf5f   :  { %1005 = vrot.lane.b32.xlu1 %v5474_v37, %s5895_s22 }
 0xf62   :  { %v5476_v40 = vpop.eup %5475 }
 0xf63   :  { %1022 = vperm.xlu1 %5431, %v4668_v38   ;;  %v999_v43 = vadd.f32 1.0, %v5476_v40  ;;  %v1280_v38 = vld [vmem:[#allocation8] sm:$0xff] }
 0xf64   :  { %4989 = vmatprep.subr.mxu0 %v1280_v38 }
 0xf65   :  { %5477 = vrcp.f32 %v999_v43 }
 0xf6f   :  { %v5478_v44 = vpop.eup %5477 }
 0xf70   :  { %v1003_v51 = vmul.f32 %v5478_v44, %v916_v24 }
 0xfd1   :  { %v1006_v45 = vpop.permute.xlu1 %1005 }
 0xfd2   :  { %v1008_v46 = vmul.f32 %v5478_v44, %v1006_v45 }
 0xfd4   :  { %1010 = vrot.lane.b32.xlu0 %v1008_v46, %s5896_s10 }
 0xfd8   :  { %1029 = vperm.xlu0 %5432, %v1026_v26  }
 0xfe2   :  { %v6304_v56 = vpop.permute.xlu1 %1022 }
0x1046   :  { %v1011_v52 = vpop.permute.xlu0 %1010 }
0x1047   :  { %v1013_v54 = vadd.f32 %v1011_v52, %v1003_v51 }
0x1049   :  { %5479 = vtanh.f32 %v1013_v54  ;;  %v1034_v22 = vmul.f32 %v6304_v56, %v1013_v54  ;;  %v6387_v54 = vld [vmem:[%s6952_s7] ss:$0 sm:$0xff] }
0x1053   :  { %v5480_v55 = vpop.eup %5479 }
0x1054   :  { %1016 = vrot.lane.b32.xlu1 %v5480_v55, %s5897_s30 }
0x1057   :  { %v6306_v57 = vpop.permute.xlu0 %1029 }
0x1058   :  { %v1032_v63 = vmul.f32 %v6306_v57, %v913_v33  ;;  %v1035_v33 = vmul.f32 %v6306_v57, %v916_v24 }
0x105a   :  { %v6323_v34 = vadd.f32 %v1035_v33, %v1034_v22 }
0x10c6   :  { %v1017_v58 = vpop.permute.xlu1 %1016 }
0x10c7   :  { %v1019_v61 = vmul.f32 %v5478_v44, %v1017_v58 }
0x10c9   :  { %v1025_v62 = vmul.f32 %v6304_v56, %v1019_v61 }
0x10cb   :  { %v1033_v2 = vadd.f32 %v1032_v63, %v1025_v62 }
0x10cd   :  { %1038 = vrot.lane.b32.xlu0 %v1033_v2, %s5898_s14 }
0x113f   :  { %v1039_v28 = vpop.permute.xlu0 %1038 }
0x1140   :  { %1042 = vst.msk [vmem:[#allocation2 + $0x28] sm:$0xff] %vm323_vm2, %v1039_v28  ;;  %4980 = vmatmul.mubr.msk.f32.vlgmr.msra.gmra.mrb[12].mxu0 %vm323_vm2, %v1039_v28 }
0x1141   :  { %4991 = vmatprep.mubr.msk.f32.mxu0 %vm193_vm1, %v6108_v3  ;;  %4990 = vmatpush3.msra.mxu0 %v1280_v38 }
0x1142   :  { %5293 = vmatprep.subr.bf16.mxu0 %v5891_v0 }
0x1144   :  { %4992 = vmatmul.mubr.msk.f32.vlgmr.msra.gmra.mrb[14].mxu0 %vm193_vm1, %v6113_v4  ;;  %v1281_v4 = vld [vmem:[#allocation10] sm:$0xff] }
0x1145   :  { %4994 = vmatprep.mubr.msk.f32.mxu0 %vm193_vm1, %v6120_v7  ;;  %v1282_v7 = vld [vmem:[#allocation10 + $0x8] sm:$0xff] }
0x1146   :  { %v6347_v8 = vpack.c.bf16 %v1282_v7, %v1281_v4 }
0x1148   :  { %4995 = vmatmul.mubr.msk.f32.gmra.mrb[16].mxu0 %vm193_vm1, %v6133_v9 }
0x1149   :  { %4997 = vmatprep.mubr.msk.f32.mxu0 %vm193_vm1, %v6138_v10  ;;  %5295 = vmatpush3.bf16.msra.mxu0 %v6347_v8 }
0x114a   :  { %5299 = vmatprep.subr.bf16.mxu0 %v5891_v0 }
0x114c   :  { %4998 = vmatmul.mubr.msk.f32.gmra.mrb[18].mxu0 %vm193_vm1, %v6150_v11 }
0x114d   :  { %5000 = vmatprep.mubr.msk.f32.mxu0 %vm193_vm1, %v6155_v12 }
0x1150   :  { %5001 = vmatmul.mubr.msk.f32.gmra.mrb[20].mxu0 %vm193_vm1, %v6164_v13 }
0x1151   :  { %5035 = vmatprep.mubr.msk.f32.mxu0 %vm5892_vm0, %v5893_v1 }
0x1213   :  { %v1111_v5 = vpop.f32.mrb[12].mxu0 }
0x1214   :  { %v1115_v6 = vadd.f32 %v1111_v5, %v6188_v32  ;;  %v4981_v14 = vpop.f32.mrb[13].mxu0  ;;  %v1146_v32 = vsub.f32 1.0, %v4669_v16 }
0x1216   :  { %5481 = vtanh.f32 %v1115_v6  ;;  %v1116_v17 = vsub.f32 0.0, %v1115_v6  ;;  %v4670_v6 = vld [vmem:[%s6973_s0 + $0x38] sm:$0xff] }
0x1217   :  { %v6361_v44 = vpop.f32.mrb[14].mxu0 }
0x1218   :  { %v1117_v18 = vmul.f32 1.442695, %v1116_v17  ;;  %v6363_v45 = vpop.f32.mrb[15].mxu0 }
0x121a   :  { %5483 = vpow2.f32 %v1117_v18 }
0x121b   :  { %v6365_v46 = vpop.f32.mrb[16].mxu0 }
0x121c   :  { %v6367_v26 = vpop.f32.mrb[17].mxu0 }
0x121f   :  { %v6369_v47 = vpop.f32.mrb[18].mxu0 }
0x1220   :  { %v5482_v15 = vpop.eup %5481  ;;  %v6371_v48 = vpop.f32.mrb[19].mxu0 }
0x1221   :  { %1125 = vrot.lane.b32.xlu1 %v5482_v15, %s5895_s22 }
0x1223   :  { %v5002_v51 = vpop.f32.mrb[20].mxu0 }
0x1224   :  { %v5484_v21 = vpop.eup %5483  ;;  %v1386_v52 = vpop.f32.mrb[21].mxu0  ;;  %v1392_v62 = vadd.f32 %v5002_v51, %v6387_v54 }
0x1225   :  { %1142 = vperm.xlu1 %5431, %v4669_v16   ;;  %v1119_v23 = vadd.f32 1.0, %v5484_v21 }
0x1227   :  { %5485 = vrcp.f32 %v1119_v23  ;;  %v1266_v23 = vsub.f32 1.0, %v4670_v6 }
0x1231   :  { %v5486_v3 = vpop.eup %5485 }
0x1232   :  { %v1123_v35 = vmul.f32 %v5486_v3, %v6323_v34 }
0x1293   :  { %v1126_v27 = vpop.permute.xlu1 %1125 }
0x1294   :  { %v1128_v29 = vmul.f32 %v5486_v3, %v1126_v27 }
0x1296   :  { %1130 = vrot.lane.b32.xlu0 %v1128_v29, %s5896_s10 }
0x129a   :  { %1149 = vperm.xlu0 %5432, %v1146_v32  }
0x12a4   :  { %v6350_v9 = vpop.permute.xlu1 %1142 }
0x1308   :  { %v1131_v36 = vpop.permute.xlu0 %1130 }
0x1309   :  { %v6326_v37 = vadd.f32 %v1131_v36, %v1123_v35 }
0x130b   :  { %5487 = vtanh.f32 %v6326_v37 }
0x1315   :  { %v5488_v39 = vpop.eup %5487 }
0x1316   :  { %1136 = vrot.lane.b32.xlu1 %v5488_v39, %s5897_s30 }
0x1319   :  { %v6353_v10 = vpop.permute.xlu0 %1149 }
0x131a   :  { %v1152_v13 = vmul.f32 %v6353_v10, %v1033_v2 }
0x1388   :  { %v1137_v11 = vpop.permute.xlu1 %1136 }
0x1389   :  { %v1139_v12 = vmul.f32 %v5486_v3, %v1137_v11  ;;  %v1387_v11 = vadd.f32 %v6387_v54, %v1386_v52 }
0x138b   :  { %v1145_v40 = vmul.f32 %v6350_v9, %v1139_v12 }
0x138d   :  { %v6357_v43 = vadd.f32 %v1152_v13, %v1145_v40 }
0x138f   :  { %1158 = vrot.lane.b32.xlu0 %v6357_v43, %s5898_s14 }
0x1401   :  { %v1159_v24 = vpop.permute.xlu0 %1158 }
0x1402   :  { %1162 = vst.msk [vmem:[#allocation2 + $0x30] sm:$0xff] %vm323_vm2, %v1159_v24  ;;  %4987 = vmatmul.mubr.msk.f32.vlgmr.msra.gmra.mrb[8].mxu1 %vm323_vm2, %v1159_v24 }
0x1403   :  { %5283 = vmatpush3.bf16.msra.mxu1 %v6347_v8  ;;  %5007 = vmatprep.mubr.msk.f32.mxu1 %vm5892_vm0, %v5893_v1 }
0x1404   :  { %5284 = vmatprep.subr.bf16.mxu1 %v5891_v0 }
0x1406   :  { %5008 = vmatmul.mubr.f32.vlgmr.msra.gmra.mrb[10].mxu1 %v5893_v1 }
0x1407   :  { %5286 = vmatpush3.bf16.msra.mxu1 %v6347_v8  ;;  %5014 = vmatprep.mubr.msk.f32.mxu1 %vm5892_vm0, %v5893_v1 }
0x1408   :  { %5287 = vmatprep.subr.bf16.mxu1 %v5891_v0 }
0x14d5   :  { %v1231_v55 = vpop.f32.mrb[8].mxu1 }
0x14d6   :  { %v6390_v58 = vadd.f32 %v1231_v55, %v6186_v30  ;;  %v4988_v61 = vpop.f32.mrb[9].mxu1 }
0x14d9   :  { %v1461_v63 = vpop.f32.mrb[10].mxu1 }
0x14da   :  { %v1465_v2 = vadd.f32 %v1461_v63, %v1392_v62  ;;  %v5009_v28 = vpop.f32.mrb[11].mxu1 }
0x14dc   :  { %5489 = vtanh.f32 %v1465_v2  ;;  %v1466_v14 = vsub.f32 0.0, %v1465_v2 }
0x14de   :  { %v1467_v15 = vmul.f32 1.442695, %v1466_v14 }
0x14e0   :  { %5491 = vpow2.f32 %v1467_v15 }
0x14e6   :  { %v5490_v5 = vpop.eup %5489 }
0x14e7   :  { %1475 = vrot.lane.b32.xlu1 %v5490_v5, %s5895_s22 }
0x14ea   :  { %v5492_v30 = vpop.eup %5491 }
0x14eb   :  { %1262 = vperm.xlu1 %5431, %v4670_v6   ;;  %v1469_v16 = vadd.f32 1.0, %v5492_v30 }
0x14ed   :  { %5493 = vrcp.f32 %v1469_v16 }
0x14f7   :  { %v5494_v17 = vpop.eup %5493 }
0x14f8   :  { %v1473_v3 = vmul.f32 0.0, %v5494_v17 }
0x1559   :  { %v1476_v18 = vpop.permute.xlu1 %1475 }
0x155a   :  { %v1478_v21 = vmul.f32 %v5494_v17, %v1476_v18 }
0x155c   :  { %1480 = vrot.lane.b32.xlu0 %v1478_v21, %s5896_s10 }
0x1560   :  { %1269 = vperm.xlu0 %5432, %v1266_v23  }
0x156a   :  { %v6399_v33 = vpop.permute.xlu1 %1262 }
0x15ce   :  { %v1481_v27 = vpop.permute.xlu0 %1480 }
0x15cf   :  { %v1483_v29 = vadd.f32 %v1481_v27, %v1473_v3  ;;  %v1382_v27 = vadd.f32 %v6369_v47, %v6387_v54 }
0x15d1   :  { %5495 = vtanh.f32 %v1483_v29  ;;  %v1493_v52 = vmul.f32 %v1483_v29, %v6399_v33 }
0x15db   :  { %v5496_v32 = vpop.eup %5495 }
0x15dc   :  { %1486 = vrot.lane.b32.xlu1 %v5496_v32, %s5897_s30 }
0x15df   :  { %v6401_v22 = vpop.permute.xlu0 %1269 }
0x15e0   :  { %v6404_v38 = vmul.f32 0.0, %v6401_v22 }
0x15e2   :  { %v1494_v5 = vadd.f32 %v1493_v52, %v6404_v38 }
0x164e   :  { %v1487_v35 = vpop.permute.xlu1 %1486 }
0x164f   :  { %v1489_v36 = vmul.f32 %v5494_v17, %v1487_v35 }
0x1651   :  { %v1490_v39 = vmul.f32 %v1489_v36, %v6399_v33 }
0x1653   :  { %v1492_v4 = vadd.f32 %v6404_v38, %v1490_v39 }
0x1655   :  { %1496 = vrot.lane.b32.xlu0 %v1492_v4, %s5898_s14  ;;  %v1599_v21 = vmul.f32 %v1492_v4, %v6353_v10 }
0x16c7   :  { %v1497_v7 = vpop.permute.xlu0 %1496 }
0x16c8   :  { %1500 = vst.msk [vmem:[#allocation2 + $0x78] sm:$0xff] %vm323_vm2, %v1497_v7  ;;  %5015 = vmatmul.mubr.msk.f32.vlgmr.msra.gmra.mrb[12].mxu1 %vm323_vm2, %v1497_v7 }
0x16c9   :  { %5289 = vmatpush3.bf16.msra.mxu1 %v6347_v8  ;;  %5021 = vmatprep.mubr.msk.f32.mxu1 %vm5892_vm0, %v5893_v1 }
0x16ca   :  { %5290 = vmatprep.subr.bf16.mxu1 %v5891_v0 }
0x179b   :  { %v1569_v12 = vpop.f32.mrb[12].mxu1 }
0x179c   :  { %v1573_v40 = vadd.f32 %v1569_v12, %v1387_v11  ;;  %v5016_v13 = vpop.f32.mrb[13].mxu1 }
0x179e   :  { %5497 = vtanh.f32 %v1573_v40  ;;  %v1574_v51 = vsub.f32 0.0, %v1573_v40 }
0x17a0   :  { %v1575_v55 = vmul.f32 1.442695, %v1574_v51 }
0x17a2   :  { %5499 = vpow2.f32 %v1575_v55 }
0x17a8   :  { %v5498_v24 = vpop.eup %5497 }
0x17a9   :  { %1583 = vrot.lane.b32.xlu1 %v5498_v24, %s5895_s22  ;;  %v1602_v24 = vmul.f32 %v1494_v5, %v6353_v10 }
0x17ac   :  { %v5500_v61 = vpop.eup %5499 }
0x17ad   :  { %v1577_v62 = vadd.f32 1.0, %v5500_v61 }
0x17af   :  { %5501 = vrcp.f32 %v1577_v62 }
0x17b9   :  { %v5502_v63 = vpop.eup %5501 }
0x17ba   :  { %v1581_v6 = vmul.f32 %v5502_v63, %v1494_v5  ;;  %v1377_v5 = vadd.f32 %v6387_v54, %v6371_v48 }
0x181b   :  { %v1584_v2 = vpop.permute.xlu1 %1583 }
0x181c   :  { %v1586_v28 = vmul.f32 %v5502_v63, %v1584_v2 }
0x181e   :  { %1588 = vrot.lane.b32.xlu0 %v1586_v28, %s5896_s10 }
0x1890   :  { %v1589_v14 = vpop.permute.xlu0 %1588 }
0x1891   :  { %v1591_v15 = vadd.f32 %v1589_v14, %v1581_v6 }
0x1893   :  { %5503 = vtanh.f32 %v1591_v15  ;;  %v1601_v47 = vmul.f32 %v1591_v15, %v6350_v9 }
0x1895   :  { %v1603_v51 = vadd.f32 %v1602_v24, %v1601_v47 }
0x189d   :  { %v5504_v30 = vpop.eup %5503 }
0x189e   :  { %1594 = vrot.lane.b32.xlu1 %v5504_v30, %s5897_s30 }
0x1910   :  { %v1595_v16 = vpop.permute.xlu1 %1594 }
0x1911   :  { %v1597_v17 = vmul.f32 %v5502_v63, %v1595_v16 }
0x1913   :  { %v1598_v18 = vmul.f32 %v1597_v17, %v6350_v9 }
0x1915   :  { %v1600_v23 = vadd.f32 %v1599_v21, %v1598_v18 }
0x1917   :  { %1605 = vrot.lane.b32.xlu0 %v1600_v23, %s5898_s14  ;;  %v1708_v6 = vmul.f32 %v1600_v23, %v6306_v57 }
0x1989   :  { %v1606_v3 = vpop.permute.xlu0 %1605 }
0x198a   :  { %1609 = vst.msk [vmem:[#allocation2 + $0x70] sm:$0xff] %vm323_vm2, %v1606_v3  ;;  %5022 = vmatmul.mubr.msk.f32.vlgmr.msra.gmra.mrb[14].mxu1 %vm323_vm2, %v1606_v3 }
0x198b   :  { %5292 = vmatpush3.bf16.msra.mxu1 %v6347_v8  ;;  %5028 = vmatprep.mubr.msk.f32.mxu1 %vm5892_vm0, %v5893_v1 }
0x198c   :  { %5296 = vmatprep.subr.bf16.mxu1 %v5891_v0 }
0x1a5d   :  { %v1678_v29 = vpop.f32.mrb[14].mxu1 }
0x1a5e   :  { %v1682_v32 = vadd.f32 %v1678_v29, %v1382_v27  ;;  %v5023_v35 = vpop.f32.mrb[15].mxu1 }
0x1a60   :  { %5505 = vtanh.f32 %v1682_v32  ;;  %v1683_v39 = vsub.f32 0.0, %v1682_v32 }
0x1a62   :  { %v1684_v4 = vmul.f32 1.442695, %v1683_v39 }
0x1a64   :  { %5507 = vpow2.f32 %v1684_v4 }
0x1a6a   :  { %v5506_v36 = vpop.eup %5505 }
0x1a6b   :  { %1692 = vrot.lane.b32.xlu1 %v5506_v36, %s5895_s22  ;;  %v1711_v36 = vmul.f32 %v1603_v51, %v6306_v57 }
0x1a6e   :  { %v5508_v7 = vpop.eup %5507 }
0x1a6f   :  { %v1686_v11 = vadd.f32 1.0, %v5508_v7 }
0x1a71   :  { %5509 = vrcp.f32 %v1686_v11 }
0x1a7b   :  { %v5510_v12 = vpop.eup %5509 }
0x1a7c   :  { %v1690_v55 = vmul.f32 %v5510_v12, %v1603_v51  ;;  %v1372_v51 = vadd.f32 %v6365_v46, %v6387_v54 }
0x1add   :  { %v1693_v40 = vpop.permute.xlu1 %1692 }
0x1ade   :  { %v1695_v13 = vmul.f32 %v5510_v12, %v1693_v40 }
0x1ae0   :  { %1697 = vrot.lane.b32.xlu0 %v1695_v13, %s5896_s10 }
0x1b52   :  { %v1698_v61 = vpop.permute.xlu0 %1697 }
0x1b53   :  { %v1700_v62 = vadd.f32 %v1698_v61, %v1690_v55 }
0x1b55   :  { %5511 = vtanh.f32 %v1700_v62  ;;  %v1710_v48 = vmul.f32 %v1700_v62, %v6304_v56 }
0x1b57   :  { %v1712_v39 = vadd.f32 %v1711_v36, %v1710_v48 }
0x1b5f   :  { %v5512_v63 = vpop.eup %5511 }
0x1b60   :  { %1703 = vrot.lane.b32.xlu1 %v5512_v63, %s5897_s30 }
0x1bd2   :  { %v1704_v2 = vpop.permute.xlu1 %1703 }
0x1bd3   :  { %v1706_v28 = vmul.f32 %v5510_v12, %v1704_v2 }
0x1bd5   :  { %v1707_v52 = vmul.f32 %v1706_v28, %v6304_v56 }
0x1bd7   :  { %v1709_v14 = vadd.f32 %v1708_v6, %v1707_v52 }
0x1bd9   :  { %1714 = vrot.lane.b32.xlu0 %v1709_v14, %s5898_s14  ;;  %v1817_v24 = vmul.f32 %v1709_v14, %v6284_v20 }
0x1c4b   :  { %v1715_v15 = vpop.permute.xlu0 %1714 }
0x1c4c   :  { %1718 = vst.msk [vmem:[#allocation2 + $0x68] sm:$0xff] %vm323_vm2, %v1715_v15  ;;  %5029 = vmatmul.mubr.msk.f32.vlgmr.msra.gmra.mrb[16].mxu1 %vm323_vm2, %v1715_v15 }
0x1c4d   :  { %5298 = vmatpush3.bf16.msra.mxu1 %v6347_v8  ;;  %5042 = vmatprep.mubr.msk.f32.mxu1 %vm5892_vm0, %v5893_v1 }
0x1c4e   :  { %5302 = vmatprep.subr.bf16.mxu1 %v5891_v0 }
0x1d1f   :  { %v1787_v30 = vpop.f32.mrb[16].mxu1 }
0x1d20   :  { %v1791_v16 = vadd.f32 %v1787_v30, %v1377_v5  ;;  %v5030_v17 = vpop.f32.mrb[17].mxu1 }
0x1d21   :  { %v1820_v17 = vmul.f32 %v1712_v39, %v6284_v20 }
0x1d22   :  { %5513 = vtanh.f32 %v1791_v16  ;;  %v1792_v21 = vsub.f32 0.0, %v1791_v16 }
0x1d24   :  { %v1793_v23 = vmul.f32 1.442695, %v1792_v21 }
0x1d26   :  { %5515 = vpow2.f32 %v1793_v23 }
0x1d2c   :  { %v5514_v18 = vpop.eup %5513 }
0x1d2d   :  { %1801 = vrot.lane.b32.xlu1 %v5514_v18, %s5895_s22 }
0x1d30   :  { %v5516_v3 = vpop.eup %5515 }
0x1d31   :  { %v1795_v27 = vadd.f32 1.0, %v5516_v3 }
0x1d33   :  { %5517 = vrcp.f32 %v1795_v27 }
0x1d3d   :  { %v5518_v29 = vpop.eup %5517 }
0x1d3e   :  { %v1799_v4 = vmul.f32 %v5518_v29, %v1712_v39  ;;  %v1367_v39 = vadd.f32 %v6387_v54, %v6367_v26 }
0x1d9f   :  { %v1802_v32 = vpop.permute.xlu1 %1801 }
0x1da0   :  { %v1804_v35 = vmul.f32 %v5518_v29, %v1802_v32 }
0x1da2   :  { %1806 = vrot.lane.b32.xlu0 %v1804_v35, %s5896_s10 }
0x1e14   :  { %v1807_v7 = vpop.permute.xlu0 %1806 }
0x1e15   :  { %v1809_v11 = vadd.f32 %v1807_v7, %v1799_v4 }
0x1e17   :  { %5519 = vtanh.f32 %v1809_v11  ;;  %v1819_v46 = vmul.f32 %v1809_v11, %v6282_v19 }
0x1e19   :  { %v1821_v18 = vadd.f32 %v1820_v17, %v1819_v46 }
0x1e21   :  { %v5520_v12 = vpop.eup %5519 }
0x1e22   :  { %1812 = vrot.lane.b32.xlu1 %v5520_v12, %s5897_s30 }
0x1e94   :  { %v1813_v40 = vpop.permute.xlu1 %1812 }
0x1e95   :  { %v1815_v13 = vmul.f32 %v5518_v29, %v1813_v40 }
0x1e97   :  { %v1816_v47 = vmul.f32 %v1815_v13, %v6282_v19 }
0x1e99   :  { %v1818_v55 = vadd.f32 %v1817_v24, %v1816_v47 }
0x1e9b   :  { %1823 = vrot.lane.b32.xlu0 %v1818_v55, %s5898_s14  ;;  %v1926_v48 = vmul.f32 %v1818_v55, %v6263_v42 }
0x1f0d   :  { %v1824_v61 = vpop.permute.xlu0 %1823 }
0x1f0e   :  { %1827 = vst.msk [vmem:[#allocation2 + $0x60] sm:$0xff] %vm323_vm2, %v1824_v61  ;;  %5036 = vmatmul.mubr.msk.f32.vlgmr.msra.gmra.mrb[22].mxu0 %vm323_vm2, %v1824_v61 }
0x1f0f   :  { %5301 = vmatpush3.bf16.msra.mxu0 %v6347_v8  ;;  %5049 = vmatprep.mubr.msk.f32.mxu0 %vm5892_vm0, %v5893_v1 }
0x1fe1   :  { %v1896_v62 = vpop.f32.mrb[22].mxu0 }
0x1fe2   :  { %v1900_v63 = vadd.f32 %v1896_v62, %v1372_v51  ;;  %v5037_v2 = vpop.f32.mrb[23].mxu0  ;;  %v1929_v62 = vmul.f32 %v1821_v18, %v6263_v42 }
0x1fe4   :  { %5521 = vtanh.f32 %v1900_v63  ;;  %v1901_v52 = vsub.f32 0.0, %v1900_v63 }
0x1fe6   :  { %v1902_v6 = vmul.f32 1.442695, %v1901_v52 }
0x1fe8   :  { %5523 = vpow2.f32 %v1902_v6 }
0x1fee   :  { %v5522_v28 = vpop.eup %5521 }
0x1fef   :  { %1910 = vrot.lane.b32.xlu1 %v5522_v28, %s5895_s22 }
0x1ff2   :  { %v5524_v14 = vpop.eup %5523 }
0x1ff3   :  { %v1904_v15 = vadd.f32 1.0, %v5524_v14  ;;  %v2277_v14 = vld [vmem:[%s6953_s8] sm:$0xff] }
0x1ff5   :  { %5525 = vrcp.f32 %v1904_v15  ;;  %v2278_v15 = vld [vmem:[%s6953_s8 + $0x8] sm:$0xff] }
0x1fff   :  { %v5526_v5 = vpop.eup %5525 }
0x2000   :  { %v1908_v21 = vmul.f32 %v5526_v5, %v1821_v18 }
0x2061   :  { %v1911_v30 = vpop.permute.xlu1 %1910 }
0x2062   :  { %v1913_v16 = vmul.f32 %v5526_v5, %v1911_v30 }
0x2064   :  { %1915 = vrot.lane.b32.xlu0 %v1913_v16, %s5896_s10 }
0x20d6   :  { %v1916_v23 = vpop.permute.xlu0 %1915 }
0x20d7   :  { %v1918_v3 = vadd.f32 %v1916_v23, %v1908_v21  ;;  %v6495_v23 = vld [vmem:[#allocation2] sm:$0xff] }
0x20d9   :  { %5527 = vtanh.f32 %v1918_v3  ;;  %v1928_v26 = vmul.f32 %v1918_v3, %v6261_v41  ;;  %v6499_v3 = vld [vmem:[#allocation2 + $0x8] sm:$0xff] }
0x20db   :  { %v1930_v63 = vadd.f32 %v1929_v62, %v1928_v26 }
0x20e3   :  { %v5528_v27 = vpop.eup %5527 }
0x20e4   :  { %1921 = vrot.lane.b32.xlu1 %v5528_v27, %s5897_s30  ;;  %v6503_v27 = vld [vmem:[#allocation2 + $0x10] sm:$0xff] }
0x2156   :  { %v1922_v29 = vpop.permute.xlu1 %1921 }
0x2157   :  { %v1924_v32 = vmul.f32 %v5526_v5, %v1922_v29  ;;  %v5305_v5 = vpack.c.bf16 %v2278_v15, %v2277_v14  ;;  %v6507_v29 = vld [vmem:[#allocation2 + $0x18] sm:$0xff] }
0x2159   :  { %v1925_v35 = vmul.f32 %v1924_v32, %v6261_v41  ;;  %5306 = vmatprep.subr.bf16.mxu0 %v5305_v5  ;;  %v6511_v32 = vld [vmem:[#allocation2 + $0x20] sm:$0xff] }
0x215b   :  { %v1927_v36 = vadd.f32 %v1926_v48, %v1925_v35  ;;  %v6515_v35 = vld [vmem:[#allocation2 + $0x28] sm:$0xff]  ;;  %v6519_v48 = vld [vmem:[#allocation2 + $0x30] sm:$0xff] }
0x215d   :  { %1932 = vrot.lane.b32.xlu0 %v1927_v36, %s5898_s14  ;;  %v2035_v17 = vmul.f32 %v1927_v36, %v6241_v60  ;;  %v1362_v36 = vadd.f32 %v6361_v44, %v6387_v54 }
0x21cf   :  { %v1933_v4 = vpop.permute.xlu0 %1932 }
0x21d0   :  { %1936 = vst.msk [vmem:[#allocation2 + $0x58] sm:$0xff] %vm323_vm2, %v1933_v4  ;;  %5043 = vmatmul.mubr.msk.f32.vlgmr.msra.gmra.mrb[18].mxu1 %vm323_vm2, %v1933_v4 }
0x21d1   :  { %5304 = vmatpush3.bf16.msra.mxu1 %v6347_v8  ;;  %5056 = vmatprep.mubr.msk.f32.mxu1 %vm5892_vm0, %v5893_v1 }
0x21d2   :  { %5313 = vmatprep.subr.bf16.mxu1 %v5891_v0 }
0x22a3   :  { %v2005_v7 = vpop.f32.mrb[18].mxu1 }
0x22a4   :  { %v2009_v11 = vadd.f32 %v2005_v7, %v1367_v39  ;;  %v5044_v12 = vpop.f32.mrb[19].mxu1 }
0x22a6   :  { %5529 = vtanh.f32 %v2009_v11  ;;  %v2010_v13 = vsub.f32 0.0, %v2009_v11 }
0x22a8   :  { %v2011_v47 = vmul.f32 1.442695, %v2010_v13 }
0x22aa   :  { %5531 = vpow2.f32 %v2011_v47 }
0x22b0   :  { %v5530_v40 = vpop.eup %5529 }
0x22b1   :  { %2019 = vrot.lane.b32.xlu1 %v5530_v40, %s5895_s22 }
0x22b4   :  { %v5532_v24 = vpop.eup %5531 }
0x22b5   :  { %v2013_v8 = vadd.f32 1.0, %v5532_v24 }
0x22b7   :  { %5533 = vrcp.f32 %v2013_v8 }
0x22c1   :  { %v5534_v55 = vpop.eup %5533 }
0x22c2   :  { %v2017_v2 = vmul.f32 %v5534_v55, %v1930_v63 }
0x2323   :  { %v2020_v61 = vpop.permute.xlu1 %2019 }
0x2324   :  { %v2022_v51 = vmul.f32 %v5534_v55, %v2020_v61  ;;  %v2038_v61 = vmul.f32 %v1930_v63, %v6241_v60 }
0x2326   :  { %2024 = vrot.lane.b32.xlu0 %v2022_v51, %s5896_s10 }
0x2398   :  { %v2025_v28 = vpop.permute.xlu0 %2024 }
0x2399   :  { %v2027_v52 = vadd.f32 %v2025_v28, %v2017_v2 }
0x239b   :  { %5535 = vtanh.f32 %v2027_v52  ;;  %v2037_v44 = vmul.f32 %v2027_v52, %v6239_v59  ;;  %v1236_v52 = vsub.f32 0.0, %v6390_v58 }
0x239d   :  { %v6529_v51 = vadd.f32 %v2038_v61, %v2037_v44  ;;  %v1237_v63 = vmul.f32 1.442695, %v1236_v52 }
0x23a5   :  { %v5536_v6 = vpop.eup %5535 }
0x23a6   :  { %2030 = vrot.lane.b32.xlu1 %v5536_v6, %s5897_s30 }
0x2418   :  { %v2031_v30 = vpop.permute.xlu1 %2030 }
0x2419   :  { %v2033_v16 = vmul.f32 %v5534_v55, %v2031_v30 }
0x241b   :  { %v2034_v46 = vmul.f32 %v2033_v16, %v6239_v59 }
0x241d   :  { %v2036_v18 = vadd.f32 %v2035_v17, %v2034_v46 }
0x241f   :  { %2041 = vrot.lane.b32.xlu0 %v2036_v18, %s5898_s14  ;;  %v2144_v46 = vmul.f32 %v2036_v18, %v6217_v25 }
0x2491   :  { %v2042_v21 = vpop.permute.xlu0 %2041 }
0x2492   :  { %2045 = vst.msk [vmem:[#allocation2 + $0x50] sm:$0xff] %vm323_vm2, %v2042_v21  ;;  %5050 = vmatmul.mubr.msk.f32.vlgmr.msra.gmra.mrb[24].mxu0 %vm323_vm2, %v2042_v21 }
0x2493   :  { %5308 = vmatpush3.bf16.msra.mxu0 %v5305_v5  ;;  %5063 = vmatprep.mubr.msk.f32.mxu0 %vm323_vm2, %v6495_v23 }
0x2496   :  { %5064 = vmatmul.mubr.msk.f32.vlgmr.msra.gmra.mrb[26].mxu0 %vm323_vm2, %v6499_v3 }
0x2497   :  { %5066 = vmatprep.mubr.msk.f32.mxu0 %vm323_vm2, %v6503_v27 }
0x249a   :  { %5067 = vmatmul.mubr.msk.f32.gmra.mrb[28].mxu0 %vm323_vm2, %v6507_v29 }
0x249b   :  { %5069 = vmatprep.mubr.msk.f32.mxu0 %vm323_vm2, %v6511_v32 }
0x249e   :  { %5070 = vmatmul.mubr.msk.f32.gmra.mrb[30].mxu0 %vm323_vm2, %v6515_v35 }
0x249f   :  { %5072 = vmatprep.mubr.msk.f32.mxu0 %vm323_vm2, %v6519_v48 }
0x2565   :  { %v2114_v4 = vpop.f32.mrb[24].mxu0 }
0x2566   :  { %v2118_v39 = vadd.f32 %v2114_v4, %v1362_v36  ;;  %v5051_v7 = vpop.f32.mrb[25].mxu0 }
0x2568   :  { %5537 = vtanh.f32 %v2118_v39  ;;  %v2119_v12 = vsub.f32 0.0, %v2118_v39  ;;  %v1154_v39 = vmul.f32 %v6350_v9, %v6326_v37  ;;  %v1272_v37 = vmul.f32 %v6401_v22, %v6357_v43 }
0x256a   :  { %v2120_v40 = vmul.f32 1.442695, %v2119_v12 }
0x256c   :  { %5539 = vpow2.f32 %v2120_v40 }
0x2572   :  { %v5538_v11 = vpop.eup %5537 }
0x2573   :  { %2128 = vrot.lane.b32.xlu1 %v5538_v11, %s5895_s22 }
0x2576   :  { %v5540_v13 = vpop.eup %5539 }
0x2577   :  { %v2122_v47 = vadd.f32 1.0, %v5540_v13 }
0x2579   :  { %5541 = vrcp.f32 %v2122_v47 }
0x2583   :  { %v5542_v24 = vpop.eup %5541 }
0x2584   :  { %v2126_v26 = vmul.f32 %v5542_v24, %v6529_v51 }
0x25e5   :  { %v2129_v8 = vpop.permute.xlu1 %2128 }
0x25e6   :  { %v2131_v55 = vmul.f32 %v5542_v24, %v2129_v8 }
0x25e8   :  { %2133 = vrot.lane.b32.xlu0 %v2131_v55, %s5896_s10  ;;  %v1357_v55 = vadd.f32 %v6387_v54, %v6363_v45 }
0x265a   :  { %v2134_v62 = vpop.permute.xlu0 %2133 }
0x265b   :  { %v6532_v2 = vadd.f32 %v2134_v62, %v2126_v26 }
0x265d   :  { %5543 = vtanh.f32 %v6532_v2 }
0x265e   :  { %5545 = vtanh.f32 %v6390_v58  ;;  %v1155_v58 = vmul.f32 %v6353_v10, %v6323_v34 }
0x265f   :  { %5547 = vpow2.f32 %v1237_v63 }
0x2660   :  { %v1156_v7 = vadd.f32 %v1155_v58, %v1154_v39  ;;  %v2280_v58 = vld [vmem:[%s6953_s8 + $0x18] sm:$0xff] }
0x2667   :  { %v5544_v28 = vpop.eup %5543 }
0x2668   :  { %2139 = vrot.lane.b32.xlu1 %v5544_v28, %s5897_s30  ;;  %v5546_v6 = vpop.eup %5545 }
0x2669   :  { %v5548_v14 = vpop.eup %5547 }
0x266a   :  { %v1239_v15 = vadd.f32 1.0, %v5548_v14 }
0x266c   :  { %1245 = vrot.lane.b32.xlu1 %v5546_v6, %s5895_s22  ;;  %5549 = vrcp.f32 %v1239_v15 }
0x2676   :  { %v5550_v17 = vpop.eup %5549 }
0x2677   :  { %v1243_v11 = vmul.f32 %v5550_v17, %v1156_v7  ;;  %v2282_v7 = vld [vmem:[#allocation11 + $0x8] sm:$0xff] }
0x26da   :  { %v2140_v5 = vpop.permute.xlu1 %2139 }
0x26db   :  { %v2142_v30 = vmul.f32 %v5542_v24, %v2140_v5  ;;  %v2146_v5 = vmul.f32 %v6532_v2, %v6219_v31 }
0x26dd   :  { %v2143_v16 = vmul.f32 %v2142_v30, %v6219_v31  ;;  %v2147_v30 = vmul.f32 %v6529_v51, %v6217_v25  ;;  %v2281_v51 = vld [vmem:[#allocation11] sm:$0xff] }
0x26de   :  { %v1246_v21 = vpop.permute.xlu1 %1245 }
0x26df   :  { %v1248_v36 = vmul.f32 %v5550_v17, %v1246_v21  ;;  %v6541_v4 = vadd.f32 %v2144_v46, %v2143_v16  ;;  %v2148_v16 = vadd.f32 %v2147_v30, %v2146_v5 }
0x26e1   :  { %1250 = vrot.lane.b32.xlu1 %v1248_v36, %s5896_s10  ;;  %2150 = vrot.lane.b32.xlu0 %v6541_v4, %s5898_s14  ;;  %v2279_v36 = vld [vmem:[%s6953_s8 + $0x10] sm:$0xff] }
0x26e2   :  { %v5309_v39 = vpack.c.bf16 %v2280_v58, %v2279_v36 }
0x26e4   :  { %5310 = vmatprep.subr.bf16.mxu0 %v5309_v39 }
0x26e5   :  { %5312 = vmatpush3.bf16.msra.mxu0 %v5309_v39 }
0x2753   :  { %v1251_v12 = vpop.permute.xlu1 %1250  ;;  %v2151_v18 = vpop.permute.xlu0 %2150 }
0x2754   :  { %v1253_v40 = vadd.f32 %v1251_v12, %v1243_v11  ;;  %2154 = vst.msk [vmem:[#allocation2 + $0x48] sm:$0xff] %vm323_vm2, %v2151_v18  ;;  %5057 = vmatmul.mubr.msk.f32.vlgmr.msra.gmra.mrb[20].mxu1 %vm323_vm2, %v2151_v18  ;;  %v6579_v12 = vpack.c.bf16 %v2282_v7, %v2281_v51  ;;  %v6656_v51 = vld [vmem:[%s6958_s13] ss:$0 sm:$0xff] }
0x2755   :  { %5095 = vmatprep.mubr.msk.f32.mxu1 %vm5892_vm0, %v5893_v1 }
0x2756   :  { %5551 = vtanh.f32 %v1253_v40  ;;  %5315 = vmatpush3.bf16.msra.mxu1 %v6579_v12 }
0x2757   :  { %5316 = vmatprep.subr.bf16.mxu1 %v5891_v0 }
0x2759   :  { %5096 = vmatmul.mubr.f32.vlgmr.msra.gmra.mrb[22].mxu1 %v5893_v1 }
0x275a   :  { %5318 = vmatpush3.bf16.msra.mxu1 %v6579_v12  ;;  %5102 = vmatprep.mubr.msk.f32.mxu1 %vm5892_vm0, %v5893_v1 }
0x275b   :  { %5319 = vmatprep.subr.bf16.mxu1 %v5891_v0 }
0x2760   :  { %v5552_v13 = vpop.eup %5551 }
0x2761   :  { %1256 = vrot.lane.b32.xlu1 %v5552_v13, %s5897_s30  ;;  %v2253_v13 = vmul.f32 %v6541_v4, %v6195_v50  ;;  %v3395_v4 = vld [vmem:[%s6956_s11 + $0x8] sm:$0xff] }
0x27d3   :  { %v1257_v34 = vpop.permute.xlu1 %1256 }
0x27d4   :  { %v1259_v47 = vmul.f32 %v5550_v17, %v1257_v34 }
0x27d6   :  { %v1265_v24 = vmul.f32 %v6399_v33, %v1259_v47  ;;  %v3394_v47 = vld [vmem:[%s6956_s11] sm:$0xff] }
0x27d8   :  { %v1273_v8 = vadd.f32 %v1272_v37, %v1265_v24  ;;  %v5337_v37 = vpack.c.bf16 %v3395_v4, %v3394_v47 }
0x27da   :  { %1275 = vrot.lane.b32.xlu1 %v1273_v8, %s5898_s14  ;;  %5338 = vmatprep.subr.bf16.mxu0 %v5337_v37  ;;  %v3396_v8 = vld [vmem:[%s6956_s11 + $0x10] sm:$0xff] }
0x2827   :  { %v2223_v44 = vpop.f32.mrb[20].mxu1 }
0x2828   :  { %v2227_v61 = vadd.f32 %v2223_v44, %v1357_v55  ;;  %v5058_v26 = vpop.f32.mrb[21].mxu1  ;;  %v3397_v55 = vld [vmem:[%s6956_s11 + $0x18] sm:$0xff] }
0x2829   :  { %v2270_v26 = vld [vmem:[#allocation2 + $0x48] sm:$0xff] }
0x282a   :  { %5553 = vtanh.f32 %v2227_v61  ;;  %v2228_v43 = vsub.f32 0.0, %v2227_v61  ;;  %v5341_v61 = vpack.c.bf16 %v3397_v55, %v3396_v8 }
0x282c   :  { %v2229_v52 = vmul.f32 1.442695, %v2228_v43  ;;  %v2273_v43 = vld [vmem:[#allocation2 + $0x60] sm:$0xff] }
0x282e   :  { %5555 = vpow2.f32 %v2229_v52  ;;  %v2274_v52 = vld [vmem:[#allocation2 + $0x68] sm:$0xff] }
0x2834   :  { %v5554_v62 = vpop.eup %5553 }
0x2835   :  { %2237 = vrot.lane.b32.xlu0 %v5554_v62, %s5895_s22  ;;  %v2271_v62 = vld [vmem:[#allocation2 + $0x50] sm:$0xff] }
0x2838   :  { %v5556_v63 = vpop.eup %5555 }
0x2839   :  { %v2231_v45 = vadd.f32 1.0, %v5556_v63  ;;  %v2275_v63 = vld [vmem:[#allocation2 + $0x70] sm:$0xff] }
0x283b   :  { %5557 = vrcp.f32 %v2231_v45  ;;  %v2276_v45 = vld [vmem:[#allocation2 + $0x78] sm:$0xff] }
0x2845   :  { %v5558_v54 = vpop.eup %5557 }
0x2846   :  { %v2235_v46 = vmul.f32 %v5558_v54, %v2148_v16 }
0x284c   :  { %v1276_v28 = vpop.permute.xlu1 %1275 }
0x284d   :  { %1279 = vst.msk [vmem:[#allocation2 + $0x38] sm:$0xff] %vm323_vm2, %v1276_v28  ;;  %v2272_v28 = vld [vmem:[#allocation2 + $0x58] sm:$0xff] }
0x2854   :  { %v6563_v6 = vld [vmem:[#allocation2 + $0x38] sm:$0xff] }
0x2855   :  { %5073 = vmatmul.mubr.msk.f32.gmra.mrb[32].mxu0 %vm323_vm2, %v6563_v6 }
0x28a7   :  { %v2238_v14 = vpop.permute.xlu0 %2237 }
0x28a8   :  { %v2240_v15 = vmul.f32 %v5558_v54, %v2238_v14 }
0x28aa   :  { %2242 = vrot.lane.b32.xlu0 %v2240_v15, %s5896_s10 }
0x291c   :  { %v2243_v17 = vpop.permute.xlu0 %2242 }
0x291d   :  { %v2245_v21 = vadd.f32 %v2243_v17, %v2235_v46 }
0x291f   :  { %5559 = vtanh.f32 %v2245_v21 }
0x2929   :  { %v5560_v2 = vpop.eup %5559 }
0x292a   :  { %2248 = vrot.lane.b32.xlu0 %v5560_v2, %s5897_s30 }
0x299c   :  { %v2249_v11 = vpop.permute.xlu0 %2248 }
0x299d   :  { %v2251_v18 = vmul.f32 %v5558_v54, %v2249_v11 }
0x299f   :  { %v2252_v40 = vmul.f32 %v2251_v18, %v6193_v49 }
0x29a1   :  { %v2254_v34 = vadd.f32 %v2253_v13, %v2252_v40 }
0x29a3   :  { %2256 = vrot.lane.b32.xlu0 %v2254_v34, %s5898_s14 }
0x2a15   :  { %v2257_v24 = vpop.permute.xlu0 %2256 }
0x2a16   :  { %2260 = vst.msk [vmem:[#allocation2 + $0x40] sm:$0xff] %vm323_vm2, %v2257_v24 }
0x2a1d   :  { %v2269_v44 = vld [vmem:[#allocation2 + $0x40] sm:$0xff] }
0x2a1e   :  { %5079 = vmatprep.mubr.msk.f32.mxu0 %vm323_vm2, %v2269_v44 }
0x2a1f   :  { %5080 = vmatmul.mubr.msk.f32.vlgmr.msra.gmra.mrb[26].mxu0 %vm323_vm2, %v2270_v26 }
0x2a20   :  { %5082 = vmatprep.mubr.msk.f32.mxu0 %vm323_vm2, %v2271_v62  ;;  %5340 = vmatpush3.bf16.msra.mxu0 %v5337_v37 }
0x2a21   :  { %5342 = vmatprep.subr.bf16.mxu0 %v5341_v61 }
0x2a23   :  { %5083 = vmatmul.mubr.msk.f32.gmra.mrb[28].mxu0 %vm323_vm2, %v2272_v28 }
0x2a24   :  { %5085 = vmatprep.mubr.msk.f32.mxu0 %vm323_vm2, %v2273_v43 }
0x2a27   :  { %5086 = vmatmul.mubr.msk.f32.gmra.mrb[30].mxu0 %vm323_vm2, %v2274_v52 }
0x2a28   :  { %5088 = vmatprep.mubr.msk.f32.mxu0 %vm323_vm2, %v2275_v63 }
0x2a2b   :  { %5089 = vmatmul.mubr.msk.f32.gmra.mrb[32].mxu0 %vm323_vm2, %v2276_v45 }
0x2a2c   :  { %5151 = vmatprep.mubr.msk.f32.mxu0 %vm323_vm2, %v6495_v23  ;;  %v2622_v23 = vpop.f32.mrb[22].mxu1 }
0x2a2f   :  { %5152 = vmatmul.mubr.msk.f32.vlgmr.msra.gmra.mrb[34].mxu0 %vm323_vm2, %v6499_v3  ;;  %v5097_v3 = vpop.f32.mrb[23].mxu1 }
0x2a30   :  { %5154 = vmatprep.mubr.msk.f32.mxu0 %vm323_vm2, %v6503_v27  ;;  %5344 = vmatpush3.bf16.msra.mxu0 %v5341_v61  ;;  %v4703_v27 = vld [vmem:[#allocation13] ss:$0 sm:$0xff] }
0x2a31   :  { %5369 = vmatprep.subr.bf16.mxu0 %v5891_v0 }
0x2a33   :  { %5155 = vmatmul.mubr.msk.f32.gmra.mrb[36].mxu0 %vm323_vm2, %v6507_v29 }
0x2a34   :  { %5157 = vmatprep.mubr.msk.f32.mxu0 %vm323_vm2, %v6511_v32 }
0x2a37   :  { %5158 = vmatmul.mubr.msk.f32.gmra.mrb[38].mxu0 %vm323_vm2, %v6515_v35 }
0x2a38   :  { %5160 = vmatprep.mubr.msk.f32.mxu0 %vm323_vm2, %v6519_v48 }
0x2a3b   :  { %5161 = vmatmul.mubr.msk.f32.gmra.mrb[40].mxu0 %vm323_vm2, %v6563_v6 }
0x2a3c   :  { %5167 = vmatprep.mubr.msk.f32.mxu0 %vm323_vm2, %v2269_v44 }
0x2a3f   :  { %5168 = vmatmul.mubr.msk.f32.vlgmr.msra.gmra.mrb[34].mxu0 %vm323_vm2, %v2270_v26 }
0x2a40   :  { %5170 = vmatprep.mubr.msk.f32.mxu0 %vm323_vm2, %v2271_v62 }
0x2a43   :  { %5171 = vmatmul.mubr.msk.f32.gmra.mrb[36].mxu0 %vm323_vm2, %v2272_v28 }
0x2a44   :  { %5173 = vmatprep.mubr.msk.f32.mxu0 %vm323_vm2, %v2273_v43 }
0x2a47   :  { %5174 = vmatmul.mubr.msk.f32.gmra.mrb[38].mxu0 %vm323_vm2, %v2274_v52 }
0x2a48   :  { %5176 = vmatprep.mubr.msk.f32.mxu0 %vm323_vm2, %v2275_v63 }
0x2a4b   :  { %5177 = vmatmul.mubr.msk.f32.gmra.mrb[40].mxu0 %vm323_vm2, %v2276_v45 }
0x2a4c   :  { %5243 = vmatprep.mubr.msk.f32.mxu0 %vm5892_vm0, %v5893_v1 }
0x2af2   :  { %v5081_v29 = vpop.f32.mrb[26].mxu0 }
0x2af3   :  { %v5381_v32 = vadd.f32 %v5081_v29, %v4703_v27  ;;  %v2509_v35 = vpop.f32.mrb[27].mxu0 }
0x2af4   :  { %v5382_v48 = vadd.f32 %v4703_v27, %v2509_v35 }
0x2af6   :  { %v2626_v6 = vadd.f32 %v5382_v48, %v2622_v23  ;;  %v5084_v54 = vpop.f32.mrb[28].mxu0 }
0x2af7   :  { %v6640_v14 = vadd.f32 %v5084_v54, %v4703_v27  ;;  %v2519_v15 = vpop.f32.mrb[29].mxu0 }
0x2af8   :  { %5561 = vtanh.f32 %v2626_v6  ;;  %v6642_v5 = vadd.f32 %v4703_v27, %v2519_v15  ;;  %v2627_v62 = vsub.f32 0.0, %v2626_v6 }
0x2afa   :  { %v5087_v30 = vpop.f32.mrb[30].mxu0  ;;  %v2628_v28 = vmul.f32 1.442695, %v2627_v62 }
0x2afb   :  { %v6644_v16 = vadd.f32 %v5087_v30, %v4703_v27  ;;  %v2529_v46 = vpop.f32.mrb[31].mxu0 }
0x2afc   :  { %v6646_v17 = vadd.f32 %v4703_v27, %v2529_v46  ;;  %5563 = vpow2.f32 %v2628_v28 }
0x2afe   :  { %v5090_v21 = vpop.f32.mrb[32].mxu0 }
0x2aff   :  { %v6648_v36 = vadd.f32 %v5090_v21, %v4703_v27  ;;  %v2539_v58 = vpop.f32.mrb[33].mxu0 }
0x2b00   :  { %v6650_v39 = vadd.f32 %v4703_v27, %v2539_v58 }
0x2b02   :  { %v5562_v2 = vpop.eup %5561 }
0x2b03   :  { %2636 = vrot.lane.b32.xlu1 %v5562_v2, %s5895_s22 }
0x2b06   :  { %v5564_v43 = vpop.eup %5563 }
0x2b07   :  { %v2630_v52 = vadd.f32 1.0, %v5564_v43 }
0x2b09   :  { %5565 = vrcp.f32 %v2630_v52 }
0x2b12   :  { %v5169_v7 = vpop.f32.mrb[34].mxu0 }
0x2b13   :  { %v6659_v11 = vadd.f32 %v5169_v7, %v6656_v51  ;;  %v3578_v18 = vpop.f32.mrb[35].mxu0  ;;  %v5566_v63 = vpop.eup %5565 }
0x2b14   :  { %v6662_v40 = vadd.f32 %v6656_v51, %v3578_v18  ;;  %v2634_v3 = vmul.f32 0.0, %v5566_v63 }
0x2b16   :  { %v5172_v13 = vpop.f32.mrb[36].mxu0 }
0x2b17   :  { %v6665_v34 = vadd.f32 %v5172_v13, %v6656_v51  ;;  %v3588_v47 = vpop.f32.mrb[37].mxu0 }
0x2b18   :  { %v6668_v4 = vadd.f32 %v6656_v51, %v3588_v47 }
0x2b1a   :  { %v5175_v37 = vpop.f32.mrb[38].mxu0 }
0x2b1b   :  { %v6671_v24 = vadd.f32 %v5175_v37, %v6656_v51  ;;  %v3598_v8 = vpop.f32.mrb[39].mxu0 }
0x2b1c   :  { %v6674_v55 = vadd.f32 %v6656_v51, %v3598_v8 }
0x2b1e   :  { %v6676_v44 = vpop.f32.mrb[40].mxu0 }
0x2b1f   :  { %v3608_v61 = vpop.f32.mrb[41].mxu0 }
0x2b20   :  { %v6679_v26 = vadd.f32 %v6656_v51, %v3608_v61 }
0x2b75   :  { %v2637_v45 = vpop.permute.xlu1 %2636 }
0x2b76   :  { %v2639_v23 = vmul.f32 %v5566_v63, %v2637_v45 }
0x2b78   :  { %2641 = vrot.lane.b32.xlu0 %v2639_v23, %s5896_s10 }
0x2bea   :  { %v2642_v27 = vpop.permute.xlu0 %2641 }
0x2beb   :  { %v2644_v29 = vadd.f32 %v2642_v27, %v2634_v3 }
0x2bed   :  { %5567 = vtanh.f32 %v2644_v29  ;;  %v2653_v62 = vmul.f32 %v2644_v29, %v6193_v49 }
0x2bf7   :  { %v5568_v35 = vpop.eup %5567 }
0x2bf8   :  { %2647 = vrot.lane.b32.xlu1 %v5568_v35, %s5897_s30 }
0x2c6a   :  { %v2648_v48 = vpop.permute.xlu1 %2647 }
0x2c6b   :  { %v2650_v54 = vmul.f32 %v5566_v63, %v2648_v48 }
0x2c6d   :  { %v2651_v6 = vmul.f32 %v2650_v54, %v6193_v49 }
0x2c6f   :  { %v2652_v15 = vadd.f32 %v2651_v6, %v6198_v53 }
0x2c71   :  { %2656 = vrot.lane.b32.xlu0 %v2652_v15, %s5898_s14  ;;  %v2756_v27 = vmul.f32 %v2652_v15, %v6217_v25 }
0x2ce3   :  { %v2657_v30 = vpop.permute.xlu0 %2656 }
0x2ce4   :  { %5103 = vmatmul.mubr.msk.f32.vlgmr.msra.gmra.mrb[24].mxu1 %vm323_vm2, %v2657_v30 }
0x2ce5   :  { %5321 = vmatpush3.bf16.msra.mxu1 %v6579_v12  ;;  %5109 = vmatprep.mubr.msk.f32.mxu1 %vm5892_vm0, %v5893_v1 }
0x2ce6   :  { %5322 = vmatprep.subr.bf16.mxu1 %v5891_v0 }
0x2db7   :  { %v2726_v46 = vpop.f32.mrb[24].mxu1 }
0x2db8   :  { %v2730_v21 = vadd.f32 %v5381_v32, %v2726_v46  ;;  %v5104_v58 = vpop.f32.mrb[25].mxu1  ;;  %v2654_v32 = vadd.f32 %v2653_v62, %v6198_v53 }
0x2dba   :  { %5569 = vtanh.f32 %v2730_v21  ;;  %v2731_v7 = vsub.f32 0.0, %v2730_v21 }
0x2dbc   :  { %v2732_v18 = vmul.f32 1.442695, %v2731_v7 }
0x2dbe   :  { %5571 = vpow2.f32 %v2732_v18 }
0x2dc4   :  { %v5570_v2 = vpop.eup %5569 }
0x2dc5   :  { %2740 = vrot.lane.b32.xlu1 %v5570_v2, %s5895_s22 }
0x2dc8   :  { %v5572_v13 = vpop.eup %5571 }
0x2dc9   :  { %v2734_v47 = vadd.f32 1.0, %v5572_v13 }
0x2dcb   :  { %5573 = vrcp.f32 %v2734_v47 }
0x2dd5   :  { %v5574_v37 = vpop.eup %5573 }
0x2dd6   :  { %v2738_v28 = vmul.f32 %v5574_v37, %v2654_v32 }
0x2e37   :  { %v2741_v8 = vpop.permute.xlu1 %2740 }
0x2e38   :  { %v2743_v61 = vmul.f32 %v5574_v37, %v2741_v8 }
0x2e3a   :  { %2745 = vrot.lane.b32.xlu0 %v2743_v61, %s5896_s10 }
0x2eac   :  { %v2746_v43 = vpop.permute.xlu0 %2745 }
0x2ead   :  { %v2748_v52 = vadd.f32 %v2746_v43, %v2738_v28 }
0x2eaf   :  { %5575 = vtanh.f32 %v2748_v52  ;;  %v2758_v18 = vmul.f32 %v2748_v52, %v6219_v31 }
0x2eb9   :  { %v5576_v63 = vpop.eup %5575 }
0x2eba   :  { %2751 = vrot.lane.b32.xlu1 %v5576_v63, %s5897_s30 }
0x2f2c   :  { %v2752_v45 = vpop.permute.xlu1 %2751 }
0x2f2d   :  { %v2754_v23 = vmul.f32 %v5574_v37, %v2752_v45 }
0x2f2f   :  { %v2755_v3 = vmul.f32 %v2754_v23, %v6219_v31 }
0x2f31   :  { %v2757_v35 = vadd.f32 %v2756_v27, %v2755_v3 }
0x2f33   :  { %2762 = vrot.lane.b32.xlu0 %v2757_v35, %s5898_s14  ;;  %v2862_v63 = vmul.f32 %v2757_v35, %v6241_v60 }
0x2fa5   :  { %v2763_v48 = vpop.permute.xlu0 %2762 }
0x2fa6   :  { %5110 = vmatmul.mubr.msk.f32.vlgmr.msra.gmra.mrb[26].mxu1 %vm323_vm2, %v2763_v48 }
0x2fa7   :  { %5324 = vmatpush3.bf16.msra.mxu1 %v6579_v12  ;;  %5116 = vmatprep.mubr.msk.f32.mxu1 %vm5892_vm0, %v5893_v1 }
0x2fa8   :  { %5325 = vmatprep.subr.bf16.mxu1 %v5891_v0 }
0x3079   :  { %v2832_v53 = vpop.f32.mrb[26].mxu1 }
0x307a   :  { %v2836_v29 = vadd.f32 %v6642_v5, %v2832_v53  ;;  %v5111_v54 = vpop.f32.mrb[27].mxu1  ;;  %v2759_v5 = vmul.f32 %v2654_v32, %v6217_v25 }
0x307c   :  { %5577 = vtanh.f32 %v2836_v29  ;;  %v2837_v15 = vsub.f32 0.0, %v2836_v29  ;;  %v2760_v13 = vadd.f32 %v2759_v5, %v2758_v18 }
0x307e   :  { %v2838_v30 = vmul.f32 1.442695, %v2837_v15 }
0x3080   :  { %5579 = vpow2.f32 %v2838_v30 }
0x3086   :  { %v5578_v6 = vpop.eup %5577 }
0x3087   :  { %2846 = vrot.lane.b32.xlu1 %v5578_v6, %s5895_s22 }
0x308a   :  { %v5580_v46 = vpop.eup %5579 }
0x308b   :  { %v2840_v21 = vadd.f32 1.0, %v5580_v46 }
0x308d   :  { %5581 = vrcp.f32 %v2840_v21 }
0x3097   :  { %v5582_v58 = vpop.eup %5581 }
0x3098   :  { %v2844_v47 = vmul.f32 %v5582_v58, %v2760_v13 }
0x30f9   :  { %v2847_v2 = vpop.permute.xlu1 %2846 }
0x30fa   :  { %v2849_v7 = vmul.f32 %v5582_v58, %v2847_v2 }
0x30fc   :  { %2851 = vrot.lane.b32.xlu0 %v2849_v7, %s5896_s10 }
0x316e   :  { %v2852_v37 = vpop.permute.xlu0 %2851 }
0x316f   :  { %v2854_v8 = vadd.f32 %v2852_v37, %v2844_v47 }
0x3171   :  { %5583 = vtanh.f32 %v2854_v8  ;;  %v2864_v30 = vmul.f32 %v2854_v8, %v6239_v59 }
0x317b   :  { %v5584_v61 = vpop.eup %5583 }
0x317c   :  { %2857 = vrot.lane.b32.xlu1 %v5584_v61, %s5897_s30 }
0x31ee   :  { %v2858_v62 = vpop.permute.xlu1 %2857 }
0x31ef   :  { %v2860_v28 = vmul.f32 %v5582_v58, %v2858_v62 }
0x31f1   :  { %v2861_v43 = vmul.f32 %v2860_v28, %v6239_v59 }
0x31f3   :  { %v2863_v45 = vadd.f32 %v2862_v63, %v2861_v43 }
0x31f5   :  { %2868 = vrot.lane.b32.xlu0 %v2863_v45, %s5898_s14  ;;  %v2968_v37 = vmul.f32 %v2863_v45, %v6263_v42 }
0x3267   :  { %v2869_v52 = vpop.permute.xlu0 %2868 }
0x3268   :  { %5117 = vmatmul.mubr.msk.f32.vlgmr.msra.gmra.mrb[28].mxu1 %vm323_vm2, %v2869_v52 }
0x3269   :  { %5327 = vmatpush3.bf16.msra.mxu1 %v6579_v12  ;;  %5123 = vmatprep.mubr.msk.f32.mxu1 %vm5892_vm0, %v5893_v1 }
0x326a   :  { %5328 = vmatprep.subr.bf16.mxu1 %v5891_v0 }
0x333b   :  { %v2938_v32 = vpop.f32.mrb[28].mxu1 }
0x333c   :  { %v2942_v23 = vadd.f32 %v6640_v14, %v2938_v32  ;;  %v5118_v3 = vpop.f32.mrb[29].mxu1  ;;  %v2865_v14 = vmul.f32 %v2760_v13, %v6241_v60 }
0x333e   :  { %5585 = vtanh.f32 %v2942_v23  ;;  %v2943_v35 = vsub.f32 0.0, %v2942_v23  ;;  %v2866_v46 = vadd.f32 %v2865_v14, %v2864_v30 }
0x3340   :  { %v2944_v48 = vmul.f32 1.442695, %v2943_v35 }
0x3342   :  { %5587 = vpow2.f32 %v2944_v48 }
0x3348   :  { %v5586_v27 = vpop.eup %5585 }
0x3349   :  { %2952 = vrot.lane.b32.xlu1 %v5586_v27, %s5895_s22 }
0x334c   :  { %v5588_v53 = vpop.eup %5587 }
0x334d   :  { %v2946_v29 = vadd.f32 1.0, %v5588_v53 }
0x334f   :  { %5589 = vrcp.f32 %v2946_v29 }
0x3359   :  { %v5590_v54 = vpop.eup %5589 }
0x335a   :  { %v2950_v21 = vmul.f32 %v5590_v54, %v2866_v46 }
0x33bb   :  { %v2953_v6 = vpop.permute.xlu1 %2952 }
0x33bc   :  { %v2955_v15 = vmul.f32 %v5590_v54, %v2953_v6 }
0x33be   :  { %2957 = vrot.lane.b32.xlu0 %v2955_v15, %s5896_s10 }
0x3430   :  { %v2958_v58 = vpop.permute.xlu0 %2957 }
0x3431   :  { %v2960_v2 = vadd.f32 %v2958_v58, %v2950_v21 }
0x3433   :  { %5591 = vtanh.f32 %v2960_v2  ;;  %v2970_v35 = vmul.f32 %v2960_v2, %v6261_v41 }
0x343d   :  { %v5592_v7 = vpop.eup %5591 }
0x343e   :  { %2963 = vrot.lane.b32.xlu1 %v5592_v7, %s5897_s30 }
0x34b0   :  { %v2964_v18 = vpop.permute.xlu1 %2963 }
0x34b1   :  { %v2966_v5 = vmul.f32 %v5590_v54, %v2964_v18 }
0x34b3   :  { %v2967_v47 = vmul.f32 %v2966_v5, %v6261_v41 }
0x34b5   :  { %v2969_v61 = vadd.f32 %v2968_v37, %v2967_v47 }
0x34b7   :  { %2974 = vrot.lane.b32.xlu0 %v2969_v61, %s5898_s14  ;;  %v3074_v14 = vmul.f32 %v2969_v61, %v6284_v20 }
0x3529   :  { %v2975_v8 = vpop.permute.xlu0 %2974 }
0x352a   :  { %5124 = vmatmul.mubr.msk.f32.vlgmr.msra.gmra.mrb[30].mxu1 %vm323_vm2, %v2975_v8 }
0x352b   :  { %5330 = vmatpush3.bf16.msra.mxu1 %v6579_v12  ;;  %5130 = vmatprep.mubr.msk.f32.mxu1 %vm5892_vm0, %v5893_v1 }
0x352c   :  { %5331 = vmatprep.subr.bf16.mxu1 %v5891_v0 }
0x35fd   :  { %v3044_v13 = vpop.f32.mrb[30].mxu1 }
0x35fe   :  { %v3048_v62 = vadd.f32 %v6646_v17, %v3044_v13  ;;  %v5125_v28 = vpop.f32.mrb[31].mxu1  ;;  %v2971_v17 = vmul.f32 %v2866_v46, %v6263_v42 }
0x3600   :  { %5593 = vtanh.f32 %v3048_v62  ;;  %v3049_v63 = vsub.f32 0.0, %v3048_v62  ;;  %v2972_v48 = vadd.f32 %v2971_v17, %v2970_v35 }
0x3602   :  { %v3050_v45 = vmul.f32 1.442695, %v3049_v63 }
0x3604   :  { %5595 = vpow2.f32 %v3050_v45 }
0x360a   :  { %v5594_v43 = vpop.eup %5593 }
0x360b   :  { %3058 = vrot.lane.b32.xlu1 %v5594_v43, %s5895_s22 }
0x360e   :  { %v5596_v52 = vpop.eup %5595 }
0x360f   :  { %v3052_v32 = vadd.f32 1.0, %v5596_v52 }
0x3611   :  { %5597 = vrcp.f32 %v3052_v32 }
0x361b   :  { %v5598_v23 = vpop.eup %5597 }
0x361c   :  { %v3056_v53 = vmul.f32 %v5598_v23, %v2972_v48 }
0x367d   :  { %v3059_v3 = vpop.permute.xlu1 %3058 }
0x367e   :  { %v3061_v27 = vmul.f32 %v5598_v23, %v3059_v3 }
0x3680   :  { %3063 = vrot.lane.b32.xlu0 %v3061_v27, %s5896_s10 }
0x36f2   :  { %v3064_v29 = vpop.permute.xlu0 %3063 }
0x36f3   :  { %v3066_v54 = vadd.f32 %v3064_v29, %v3056_v53 }
0x36f5   :  { %5599 = vtanh.f32 %v3066_v54  ;;  %v3076_v43 = vmul.f32 %v3066_v54, %v6282_v19 }
0x36ff   :  { %v5600_v6 = vpop.eup %5599 }
0x3700   :  { %3069 = vrot.lane.b32.xlu1 %v5600_v6, %s5897_s30 }
0x3772   :  { %v3070_v15 = vpop.permute.xlu1 %3069 }
0x3773   :  { %v3072_v30 = vmul.f32 %v5598_v23, %v3070_v15 }
0x3775   :  { %v3073_v21 = vmul.f32 %v3072_v30, %v6282_v19 }
0x3777   :  { %v3075_v58 = vadd.f32 %v3074_v14, %v3073_v21 }
0x3779   :  { %3080 = vrot.lane.b32.xlu0 %v3075_v58, %s5898_s14  ;;  %v3180_v17 = vmul.f32 %v3075_v58, %v6306_v57 }
0x37eb   :  { %v3081_v2 = vpop.permute.xlu0 %3080 }
0x37ec   :  { %5131 = vmatmul.mubr.msk.f32.vlgmr.msra.gmra.mrb[32].mxu1 %vm323_vm2, %v3081_v2 }
0x37ed   :  { %5333 = vmatpush3.bf16.msra.mxu1 %v6579_v12  ;;  %5137 = vmatprep.mubr.msk.f32.mxu1 %vm5892_vm0, %v5893_v1 }
0x37ee   :  { %5334 = vmatprep.subr.bf16.mxu1 %v5891_v0 }
0x38bf   :  { %v3150_v46 = vpop.f32.mrb[32].mxu1 }
0x38c0   :  { %v3154_v7 = vadd.f32 %v6644_v16, %v3150_v46  ;;  %v5132_v18 = vpop.f32.mrb[33].mxu1  ;;  %v3077_v16 = vmul.f32 %v2972_v48, %v6284_v20 }
0x38c2   :  { %5601 = vtanh.f32 %v3154_v7  ;;  %v3155_v47 = vsub.f32 0.0, %v3154_v7  ;;  %v3078_v63 = vadd.f32 %v3077_v16, %v3076_v43  ;;  %v3398_v16 = vld [vmem:[%s6957_s12] sm:$0xff] }
0x38c4   :  { %v3156_v37 = vmul.f32 1.442695, %v3155_v47 }
0x38c6   :  { %5603 = vpow2.f32 %v3156_v37 }
0x38cc   :  { %v5602_v5 = vpop.eup %5601 }
0x38cd   :  { %3164 = vrot.lane.b32.xlu1 %v5602_v5, %s5895_s22 }
0x38d0   :  { %v5604_v61 = vpop.eup %5603 }
0x38d1   :  { %v3158_v8 = vadd.f32 1.0, %v5604_v61 }
0x38d3   :  { %5605 = vrcp.f32 %v3158_v8 }
0x38dd   :  { %v5606_v13 = vpop.eup %5605 }
0x38de   :  { %v3162_v45 = vmul.f32 %v5606_v13, %v3078_v63 }
0x393f   :  { %v3165_v62 = vpop.permute.xlu1 %3164 }
0x3940   :  { %v3167_v28 = vmul.f32 %v5606_v13, %v3165_v62 }
0x3942   :  { %3169 = vrot.lane.b32.xlu0 %v3167_v28, %s5896_s10 }
0x39b4   :  { %v3170_v52 = vpop.permute.xlu0 %3169 }
0x39b5   :  { %v3172_v32 = vadd.f32 %v3170_v52, %v3162_v45 }
0x39b7   :  { %5607 = vtanh.f32 %v3172_v32  ;;  %v3182_v7 = vmul.f32 %v3172_v32, %v6304_v56 }
0x39c1   :  { %v5608_v23 = vpop.eup %5607 }
0x39c2   :  { %3175 = vrot.lane.b32.xlu1 %v5608_v23, %s5897_s30 }
0x3a34   :  { %v3176_v3 = vpop.permute.xlu1 %3175 }
0x3a35   :  { %v3178_v27 = vmul.f32 %v5606_v13, %v3176_v3 }
0x3a37   :  { %v3179_v35 = vmul.f32 %v3178_v27, %v6304_v56  ;;  %v5395_v27 = vadd.f32 %v6676_v44, %v6656_v51 }
0x3a39   :  { %v3181_v53 = vadd.f32 %v3180_v17, %v3179_v35 }
0x3a3b   :  { %3186 = vrot.lane.b32.xlu0 %v3181_v53, %s5898_s14  ;;  %v3286_v62 = vmul.f32 %v3181_v53, %v6353_v10 }
0x3aad   :  { %v3187_v29 = vpop.permute.xlu0 %3186 }
0x3aae   :  { %5138 = vmatmul.mubr.msk.f32.vlgmr.msra.gmra.mrb[34].mxu1 %vm323_vm2, %v3187_v29 }
0x3aaf   :  { %5336 = vmatpush3.bf16.msra.mxu1 %v6579_v12  ;;  %5144 = vmatprep.mubr.msk.f32.mxu1 %vm5892_vm0, %v5893_v1 }
0x3ab0   :  { %5345 = vmatprep.subr.bf16.mxu1 %v5891_v0 }
0x3b81   :  { %v3256_v48 = vpop.f32.mrb[34].mxu1 }
0x3b82   :  { %v3260_v54 = vadd.f32 %v6650_v39, %v3256_v48  ;;  %v5139_v6 = vpop.f32.mrb[35].mxu1  ;;  %v3183_v39 = vmul.f32 %v3078_v63, %v6306_v57  ;;  %v3399_v63 = vld [vmem:[%s6957_s12 + $0x8] sm:$0xff] }
0x3b83   :  { %v6784_v45 = vpack.c.bf16 %v3399_v63, %v3398_v16 }
0x3b84   :  { %5609 = vtanh.f32 %v3260_v54  ;;  %v3261_v30 = vsub.f32 0.0, %v3260_v54  ;;  %v6765_v18 = vadd.f32 %v3183_v39, %v3182_v7 }
0x3b86   :  { %v3262_v14 = vmul.f32 1.442695, %v3261_v30 }
0x3b88   :  { %5611 = vpow2.f32 %v3262_v14 }
0x3b8e   :  { %v5610_v15 = vpop.eup %5609 }
0x3b8f   :  { %3270 = vrot.lane.b32.xlu1 %v5610_v15, %s5895_s22 }
0x3b92   :  { %v5612_v21 = vpop.eup %5611 }
0x3b93   :  { %v3264_v58 = vadd.f32 1.0, %v5612_v21 }
0x3b95   :  { %5613 = vrcp.f32 %v3264_v58 }
0x3b9f   :  { %v5614_v12 = vpop.eup %5613 }
0x3ba0   :  { %v3268_v5 = vmul.f32 %v5614_v12, %v6765_v18 }
0x3c01   :  { %v3271_v2 = vpop.permute.xlu1 %3270 }
0x3c02   :  { %v3273_v46 = vmul.f32 %v5614_v12, %v3271_v2 }
0x3c04   :  { %3275 = vrot.lane.b32.xlu0 %v3273_v46, %s5896_s10 }
0x3c76   :  { %v3276_v47 = vpop.permute.xlu0 %3275 }
0x3c77   :  { %v6768_v37 = vadd.f32 %v3276_v47, %v3268_v5 }
0x3c79   :  { %5615 = vtanh.f32 %v6768_v37 }
0x3c83   :  { %v5616_v61 = vpop.eup %5615 }
0x3c84   :  { %3281 = vrot.lane.b32.xlu1 %v5616_v61, %s5897_s30 }
0x3cf6   :  { %v3282_v8 = vpop.permute.xlu1 %3281 }
0x3cf7   :  { %v3284_v13 = vmul.f32 %v5614_v12, %v3282_v8 }
0x3cf9   :  { %v3285_v28 = vmul.f32 %v3284_v13, %v6350_v9 }
0x3cfb   :  { %v6774_v43 = vadd.f32 %v3286_v62, %v3285_v28 }
0x3cfd   :  { %3292 = vrot.lane.b32.xlu0 %v6774_v43, %s5898_s14 }
0x3d6f   :  { %v3293_v52 = vpop.permute.xlu0 %3292 }
0x3d70   :  { %5145 = vmatmul.mubr.msk.f32.vlgmr.msra.gmra.mrb[36].mxu1 %vm323_vm2, %v3293_v52 }
0x3d71   :  { %5347 = vmatpush3.bf16.msra.mxu1 %v6784_v45  ;;  %5183 = vmatprep.mubr.msk.f32.mxu1 %vm5892_vm0, %v5893_v1 }
0x3d72   :  { %5348 = vmatprep.subr.bf16.mxu1 %v5891_v0 }
0x3d74   :  { %5184 = vmatmul.mubr.f32.vlgmr.msra.gmra.mrb[38].mxu1 %v5893_v1 }
0x3d75   :  { %5350 = vmatpush3.bf16.msra.mxu1 %v6784_v45  ;;  %5190 = vmatprep.mubr.msk.f32.mxu1 %vm5892_vm0, %v5893_v1 }
0x3d76   :  { %5351 = vmatprep.subr.bf16.mxu1 %v5891_v0 }
0x3e43   :  { %v3362_v32 = vpop.f32.mrb[36].mxu1 }
0x3e44   :  { %v6797_v23 = vadd.f32 %v6648_v36, %v3362_v32  ;;  %v5146_v3 = vpop.f32.mrb[37].mxu1 }
0x3e47   :  { %v3691_v35 = vpop.f32.mrb[38].mxu1 }
0x3e48   :  { %v3695_v17 = vadd.f32 %v5395_v27, %v3691_v35  ;;  %v5185_v53 = vpop.f32.mrb[39].mxu1 }
0x3e4a   :  { %5617 = vtanh.f32 %v3695_v17  ;;  %v3696_v48 = vsub.f32 0.0, %v3695_v17 }
0x3e4c   :  { %v3697_v54 = vmul.f32 1.442695, %v3696_v48 }
0x3e4e   :  { %5619 = vpow2.f32 %v3697_v54 }
0x3e54   :  { %v5618_v29 = vpop.eup %5617 }
0x3e55   :  { %3705 = vrot.lane.b32.xlu1 %v5618_v29, %s5895_s22 }
0x3e58   :  { %v5620_v6 = vpop.eup %5619 }
0x3e59   :  { %v3699_v15 = vadd.f32 1.0, %v5620_v6 }
0x3e5b   :  { %5621 = vrcp.f32 %v3699_v15 }
0x3e65   :  { %v5622_v30 = vpop.eup %5621 }
0x3e66   :  { %v3703_v21 = vmul.f32 0.0, %v5622_v30 }
0x3ec7   :  { %v3706_v36 = vpop.permute.xlu1 %3705 }
0x3ec8   :  { %v3708_v14 = vmul.f32 %v5622_v30, %v3706_v36 }
0x3eca   :  { %3710 = vrot.lane.b32.xlu0 %v3708_v14, %s5896_s10 }
0x3f3c   :  { %v3711_v51 = vpop.permute.xlu0 %3710 }
0x3f3d   :  { %v3713_v44 = vadd.f32 %v3711_v51, %v3703_v21 }
0x3f3f   :  { %5623 = vtanh.f32 %v3713_v44  ;;  %v3722_v3 = vmul.f32 %v3713_v44, %v6399_v33 }
0x3f49   :  { %v5624_v58 = vpop.eup %5623 }
0x3f4a   :  { %3716 = vrot.lane.b32.xlu1 %v5624_v58, %s5897_s30 }
0x3fbc   :  { %v3717_v12 = vpop.permute.xlu1 %3716 }
0x3fbd   :  { %v3719_v2 = vmul.f32 %v5622_v30, %v3717_v12 }
0x3fbf   :  { %v3720_v46 = vmul.f32 %v3719_v2, %v6399_v33 }
0x3fc1   :  { %v3721_v7 = vadd.f32 %v3720_v46, %v6404_v38 }
0x3fc3   :  { %3725 = vrot.lane.b32.xlu0 %v3721_v7, %s5898_s14  ;;  %v3825_v54 = vmul.f32 %v3721_v7, %v6353_v10 }
0x4035   :  { %v3726_v39 = vpop.permute.xlu0 %3725 }
0x4036   :  { %5191 = vmatmul.mubr.msk.f32.vlgmr.msra.gmra.mrb[40].mxu1 %vm323_vm2, %v3726_v39 }
0x4037   :  { %5353 = vmatpush3.bf16.msra.mxu1 %v6784_v45  ;;  %5197 = vmatprep.mubr.msk.f32.mxu1 %vm5892_vm0, %v5893_v1 }
0x4038   :  { %5354 = vmatprep.subr.bf16.mxu1 %v5891_v0 }
0x4109   :  { %v3795_v5 = vpop.f32.mrb[40].mxu1 }
0x410a   :  { %v3799_v47 = vadd.f32 %v6679_v26, %v3795_v5  ;;  %v5192_v61 = vpop.f32.mrb[41].mxu1  ;;  %v3723_v26 = vadd.f32 %v3722_v3, %v6404_v38 }
0x410c   :  { %5625 = vtanh.f32 %v3799_v47  ;;  %v3800_v13 = vsub.f32 0.0, %v3799_v47 }
0x410e   :  { %v3801_v62 = vmul.f32 1.442695, %v3800_v13 }
0x4110   :  { %5627 = vpow2.f32 %v3801_v62 }
0x4116   :  { %v5626_v8 = vpop.eup %5625 }
0x4117   :  { %3809 = vrot.lane.b32.xlu1 %v5626_v8, %s5895_s22 }
0x411a   :  { %v5628_v28 = vpop.eup %5627 }
0x411b   :  { %v3803_v16 = vadd.f32 1.0, %v5628_v28 }
0x411d   :  { %5629 = vrcp.f32 %v3803_v16 }
0x4127   :  { %v5630_v63 = vpop.eup %5629 }
0x4128   :  { %v3807_v27 = vmul.f32 %v5630_v63, %v3723_v26 }
0x4189   :  { %v3810_v52 = vpop.permute.xlu1 %3809 }
0x418a   :  { %v3812_v32 = vmul.f32 %v5630_v63, %v3810_v52 }
0x418c   :  { %3814 = vrot.lane.b32.xlu0 %v3812_v32, %s5896_s10 }
0x41fe   :  { %v3815_v35 = vpop.permute.xlu0 %3814 }
0x41ff   :  { %v3817_v17 = vadd.f32 %v3815_v35, %v3807_v27 }
0x4201   :  { %5631 = vtanh.f32 %v3817_v17  ;;  %v3827_v39 = vmul.f32 %v3817_v17, %v6350_v9 }
0x420b   :  { %v5632_v53 = vpop.eup %5631 }
0x420c   :  { %3820 = vrot.lane.b32.xlu1 %v5632_v53, %s5897_s30 }
0x427e   :  { %v3821_v29 = vpop.permute.xlu1 %3820 }
0x427f   :  { %v3823_v48 = vmul.f32 %v5630_v63, %v3821_v29 }
0x4281   :  { %v3824_v6 = vmul.f32 %v3823_v48, %v6350_v9 }
0x4283   :  { %v3826_v15 = vadd.f32 %v3825_v54, %v3824_v6 }
0x4285   :  { %3831 = vrot.lane.b32.xlu0 %v3826_v15, %s5898_s14  ;;  %v3931_v16 = vmul.f32 %v3826_v15, %v6306_v57 }
0x42f7   :  { %v3832_v30 = vpop.permute.xlu0 %3831 }
0x42f8   :  { %5198 = vmatmul.mubr.msk.f32.vlgmr.msra.gmra.mrb[42].mxu1 %vm323_vm2, %v3832_v30 }
0x42f9   :  { %5356 = vmatpush3.bf16.msra.mxu1 %v6784_v45  ;;  %5204 = vmatprep.mubr.msk.f32.mxu1 %vm5892_vm0, %v5893_v1 }
0x42fa   :  { %5357 = vmatprep.subr.bf16.mxu1 %v5891_v0 }
0x43cb   :  { %v3901_v38 = vpop.f32.mrb[42].mxu1 }
0x43cc   :  { %v3905_v36 = vadd.f32 %v6671_v24, %v3901_v38  ;;  %v5199_v14 = vpop.f32.mrb[43].mxu1  ;;  %v3828_v24 = vmul.f32 %v3723_v26, %v6353_v10 }
0x43ce   :  { %5633 = vtanh.f32 %v3905_v36  ;;  %v3906_v51 = vsub.f32 0.0, %v3905_v36  ;;  %v3829_v5 = vadd.f32 %v3828_v24, %v3827_v39 }
0x43d0   :  { %v3907_v44 = vmul.f32 1.442695, %v3906_v51 }
0x43d2   :  { %5635 = vpow2.f32 %v3907_v44 }
0x43d8   :  { %v5634_v21 = vpop.eup %5633 }
0x43d9   :  { %3915 = vrot.lane.b32.xlu1 %v5634_v21, %s5895_s22 }
0x43dc   :  { %v5636_v58 = vpop.eup %5635 }
0x43dd   :  { %v3909_v12 = vadd.f32 1.0, %v5636_v58 }
0x43df   :  { %5637 = vrcp.f32 %v3909_v12 }
0x43e9   :  { %v5638_v2 = vpop.eup %5637 }
0x43ea   :  { %v3913_v47 = vmul.f32 %v5638_v2, %v3829_v5 }
0x444b   :  { %v3916_v46 = vpop.permute.xlu1 %3915 }
0x444c   :  { %v3918_v7 = vmul.f32 %v5638_v2, %v3916_v46 }
0x444e   :  { %3920 = vrot.lane.b32.xlu0 %v3918_v7, %s5896_s10 }
0x44c0   :  { %v3921_v61 = vpop.permute.xlu0 %3920 }
0x44c1   :  { %v3923_v8 = vadd.f32 %v3921_v61, %v3913_v47 }
0x44c3   :  { %5639 = vtanh.f32 %v3923_v8  ;;  %v3933_v30 = vmul.f32 %v3923_v8, %v6304_v56 }
0x44cd   :  { %v5640_v13 = vpop.eup %5639 }
0x44ce   :  { %3926 = vrot.lane.b32.xlu1 %v5640_v13, %s5897_s30 }
0x4540   :  { %v3927_v62 = vpop.permute.xlu1 %3926 }
0x4541   :  { %v3929_v28 = vmul.f32 %v5638_v2, %v3927_v62 }
0x4543   :  { %v3930_v63 = vmul.f32 %v3929_v28, %v6304_v56 }
0x4545   :  { %v3932_v52 = vadd.f32 %v3931_v16, %v3930_v63 }
0x4547   :  { %3937 = vrot.lane.b32.xlu0 %v3932_v52, %s5898_s14  ;;  %v4037_v12 = vmul.f32 %v3932_v52, %v6284_v20 }
0x45b9   :  { %v3938_v32 = vpop.permute.xlu0 %3937 }
0x45ba   :  { %5205 = vmatmul.mubr.msk.f32.vlgmr.msra.gmra.mrb[44].mxu1 %vm323_vm2, %v3938_v32 }
0x45bb   :  { %5359 = vmatpush3.bf16.msra.mxu1 %v6784_v45  ;;  %5211 = vmatprep.mubr.msk.f32.mxu1 %vm5892_vm0, %v5893_v1 }
0x45bc   :  { %5360 = vmatprep.subr.bf16.mxu1 %v5891_v0 }
0x468d   :  { %v4007_v3 = vpop.f32.mrb[44].mxu1 }
0x468e   :  { %v4011_v26 = vadd.f32 %v6674_v55, %v4007_v3  ;;  %v5206_v27 = vpop.f32.mrb[45].mxu1  ;;  %v3934_v55 = vmul.f32 %v3829_v5, %v6306_v57 }
0x4690   :  { %5641 = vtanh.f32 %v4011_v26  ;;  %v4012_v17 = vsub.f32 0.0, %v4011_v26  ;;  %v3935_v38 = vadd.f32 %v3934_v55, %v3933_v30 }
0x4692   :  { %v4013_v53 = vmul.f32 1.442695, %v4012_v17 }
0x4694   :  { %5643 = vpow2.f32 %v4013_v53 }
0x469a   :  { %v5642_v35 = vpop.eup %5641 }
0x469b   :  { %4021 = vrot.lane.b32.xlu1 %v5642_v35, %s5895_s22 }
0x469e   :  { %v5644_v29 = vpop.eup %5643 }
0x469f   :  { %v4015_v48 = vadd.f32 1.0, %v5644_v29 }
0x46a1   :  { %5645 = vrcp.f32 %v4015_v48 }
0x46ab   :  { %v5646_v54 = vpop.eup %5645 }
0x46ac   :  { %v4019_v36 = vmul.f32 %v5646_v54, %v3935_v38 }
0x470d   :  { %v4022_v6 = vpop.permute.xlu1 %4021 }
0x470e   :  { %v4024_v15 = vmul.f32 %v5646_v54, %v4022_v6 }
0x4710   :  { %4026 = vrot.lane.b32.xlu0 %v4024_v15, %s5896_s10 }
0x4782   :  { %v4027_v14 = vpop.permute.xlu0 %4026 }
0x4783   :  { %v4029_v21 = vadd.f32 %v4027_v14, %v4019_v36 }
0x4785   :  { %5647 = vtanh.f32 %v4029_v21  ;;  %v4039_v16 = vmul.f32 %v4029_v21, %v6282_v19 }
0x478f   :  { %v5648_v51 = vpop.eup %5647 }
0x4790   :  { %4032 = vrot.lane.b32.xlu1 %v5648_v51, %s5897_s30 }
0x4802   :  { %v4033_v44 = vpop.permute.xlu1 %4032 }
0x4803   :  { %v4035_v58 = vmul.f32 %v5646_v54, %v4033_v44 }
0x4805   :  { %v4036_v2 = vmul.f32 %v4035_v58, %v6282_v19 }
0x4807   :  { %v4038_v46 = vadd.f32 %v4037_v12, %v4036_v2 }
0x4809   :  { %4043 = vrot.lane.b32.xlu0 %v4038_v46, %s5898_s14  ;;  %v4143_v17 = vmul.f32 %v4038_v46, %v6263_v42 }
0x487b   :  { %v4044_v56 = vpop.permute.xlu0 %4043 }
0x487c   :  { %5212 = vmatmul.mubr.msk.f32.vlgmr.msra.gmra.mrb[46].mxu1 %vm323_vm2, %v4044_v56 }
0x487d   :  { %5362 = vmatpush3.bf16.msra.mxu1 %v6784_v45  ;;  %5218 = vmatprep.mubr.msk.f32.mxu1 %vm5892_vm0, %v5893_v1 }
0x487e   :  { %5363 = vmatprep.subr.bf16.mxu1 %v5891_v0 }
0x494f   :  { %v4113_v57 = vpop.f32.mrb[46].mxu1 }
0x4950   :  { %v4117_v7 = vadd.f32 %v6665_v34, %v4113_v57  ;;  %v5213_v39 = vpop.f32.mrb[47].mxu1  ;;  %v4040_v34 = vmul.f32 %v3935_v38, %v6284_v20 }
0x4952   :  { %5649 = vtanh.f32 %v4117_v7  ;;  %v4118_v5 = vsub.f32 0.0, %v4117_v7  ;;  %v4041_v63 = vadd.f32 %v4040_v34, %v4039_v16 }
0x4954   :  { %v4119_v47 = vmul.f32 1.442695, %v4118_v5 }
0x4956   :  { %5651 = vpow2.f32 %v4119_v47 }
0x495c   :  { %v5650_v24 = vpop.eup %5649 }
0x495d   :  { %4127 = vrot.lane.b32.xlu1 %v5650_v24, %s5895_s22 }
0x4960   :  { %v5652_v61 = vpop.eup %5651 }
0x4961   :  { %v4121_v8 = vadd.f32 1.0, %v5652_v61 }
0x4963   :  { %5653 = vrcp.f32 %v4121_v8 }
0x496d   :  { %v5654_v13 = vpop.eup %5653 }
0x496e   :  { %v4125_v52 = vmul.f32 %v5654_v13, %v4041_v63 }
0x49cf   :  { %v4128_v62 = vpop.permute.xlu1 %4127 }
0x49d0   :  { %v4130_v28 = vmul.f32 %v5654_v13, %v4128_v62 }
0x49d2   :  { %4132 = vrot.lane.b32.xlu0 %v4130_v28, %s5896_s10 }
0x4a44   :  { %v4133_v32 = vpop.permute.xlu0 %4132 }
0x4a45   :  { %v4135_v3 = vadd.f32 %v4133_v32, %v4125_v52 }
0x4a47   :  { %5655 = vtanh.f32 %v4135_v3  ;;  %v4145_v51 = vmul.f32 %v4135_v3, %v6261_v41 }
0x4a51   :  { %v5656_v26 = vpop.eup %5655 }
0x4a52   :  { %4138 = vrot.lane.b32.xlu1 %v5656_v26, %s5897_s30 }
0x4ac4   :  { %v4139_v27 = vpop.permute.xlu1 %4138 }
0x4ac5   :  { %v4141_v35 = vmul.f32 %v5654_v13, %v4139_v27 }
0x4ac7   :  { %v4142_v53 = vmul.f32 %v4141_v35, %v6261_v41 }
0x4ac9   :  { %v4144_v29 = vadd.f32 %v4143_v17, %v4142_v53  ;;  %v3367_v17 = vsub.f32 0.0, %v6797_v23 }
0x4acb   :  { %4149 = vrot.lane.b32.xlu0 %v4144_v29, %s5898_s14  ;;  %v4249_v7 = vmul.f32 %v4144_v29, %v6241_v60  ;;  %v3368_v53 = vmul.f32 1.442695, %v3367_v17  ;;  %v4751_v17 = vld [vmem:[%s6960_s15] ss:$0 sm:$0xff] }
0x4b3d   :  { %v4150_v19 = vpop.permute.xlu0 %4149 }
0x4b3e   :  { %5219 = vmatmul.mubr.msk.f32.vlgmr.msra.gmra.mrb[48].mxu1 %vm323_vm2, %v4150_v19 }
0x4b3f   :  { %5365 = vmatpush3.bf16.msra.mxu1 %v6784_v45  ;;  %5225 = vmatprep.mubr.msk.f32.mxu1 %vm5892_vm0, %v5893_v1 }
0x4b40   :  { %5366 = vmatprep.subr.bf16.mxu1 %v5891_v0 }
0x4c11   :  { %v4219_v20 = vpop.f32.mrb[48].mxu1 }
0x4c12   :  { %v4223_v48 = vadd.f32 %v6668_v4, %v4219_v20  ;;  %v5220_v54 = vpop.f32.mrb[49].mxu1  ;;  %v4146_v4 = vmul.f32 %v4041_v63, %v6263_v42 }
0x4c14   :  { %5657 = vtanh.f32 %v4223_v48  ;;  %v4224_v15 = vsub.f32 0.0, %v4223_v48  ;;  %v4147_v44 = vadd.f32 %v4146_v4, %v4145_v51 }
0x4c16   :  { %v4225_v30 = vmul.f32 1.442695, %v4224_v15 }
0x4c18   :  { %5659 = vpow2.f32 %v4225_v30 }
0x4c1e   :  { %v5658_v6 = vpop.eup %5657 }
0x4c1f   :  { %4233 = vrot.lane.b32.xlu1 %v5658_v6, %s5895_s22 }
0x4c22   :  { %v5660_v55 = vpop.eup %5659 }
0x4c23   :  { %v4227_v38 = vadd.f32 1.0, %v5660_v55  ;;  %v3289_v55 = vmul.f32 %v6765_v18, %v6353_v10 }
0x4c25   :  { %5661 = vrcp.f32 %v4227_v38 }
0x4c2f   :  { %v5662_v36 = vpop.eup %5661 }
0x4c30   :  { %v4231_v58 = vmul.f32 %v5662_v36, %v4147_v44 }
0x4c91   :  { %v4234_v14 = vpop.permute.xlu1 %4233 }
0x4c92   :  { %v4236_v21 = vmul.f32 %v5662_v36, %v4234_v14 }
0x4c94   :  { %4238 = vrot.lane.b32.xlu0 %v4236_v21, %s5896_s10 }
0x4d06   :  { %v4239_v12 = vpop.permute.xlu0 %4238 }
0x4d07   :  { %v4241_v2 = vadd.f32 %v4239_v12, %v4231_v58 }
0x4d09   :  { %5663 = vtanh.f32 %v4241_v2  ;;  %v4251_v63 = vmul.f32 %v4241_v2, %v6239_v59 }
0x4d13   :  { %v5664_v46 = vpop.eup %5663 }
0x4d14   :  { %4244 = vrot.lane.b32.xlu1 %v5664_v46, %s5897_s30 }
0x4d86   :  { %v4245_v56 = vpop.permute.xlu1 %4244 }
0x4d87   :  { %v4247_v57 = vmul.f32 %v5662_v36, %v4245_v56 }
0x4d89   :  { %v4248_v39 = vmul.f32 %v4247_v57, %v6239_v59 }
0x4d8b   :  { %v4250_v24 = vadd.f32 %v4249_v7, %v4248_v39 }
0x4d8d   :  { %4255 = vrot.lane.b32.xlu0 %v4250_v24, %s5898_s14  ;;  %v4355_v20 = vmul.f32 %v4250_v24, %v6217_v25 }
0x4dff   :  { %v4256_v41 = vpop.permute.xlu0 %4255 }
0x4e00   :  { %5226 = vmatmul.mubr.msk.f32.vlgmr.msra.gmra.mrb[50].mxu1 %vm323_vm2, %v4256_v41 }
0x4e01   :  { %5368 = vmatpush3.bf16.msra.mxu1 %v6784_v45  ;;  %5232 = vmatprep.mubr.msk.f32.mxu1 %vm5892_vm0, %v5893_v1 }
0x4e02   :  { %5375 = vmatprep.subr.bf16.mxu1 %v5891_v0 }
0x4ed3   :  { %v4325_v42 = vpop.f32.mrb[50].mxu1 }
0x4ed4   :  { %v4329_v5 = vadd.f32 %v6659_v11, %v4325_v42  ;;  %v5227_v47 = vpop.f32.mrb[51].mxu1  ;;  %v4252_v11 = vmul.f32 %v4147_v44, %v6241_v60 }
0x4ed5   :  { %v4473_v47 = vld [vmem:[#allocation14 + $0x8] sm:$0xff] }
0x4ed6   :  { %5665 = vtanh.f32 %v4329_v5  ;;  %v4330_v8 = vsub.f32 0.0, %v4329_v5  ;;  %v4253_v52 = vadd.f32 %v4252_v11, %v4251_v63  ;;  %v4472_v5 = vld [vmem:[#allocation14] sm:$0xff] }
0x4ed8   :  { %v4331_v13 = vmul.f32 1.442695, %v4330_v8 }
0x4eda   :  { %5667 = vpow2.f32 %v4331_v13  ;;  %v5370_v13 = vpack.c.bf16 %v4473_v47, %v4472_v5 }
0x4edc   :  { %5371 = vmatpush3.bf16.msra.mxu0 %v5370_v13 }
0x4edd   :  { %5372 = vmatprep.subr.bf16.mxu0 %v5891_v0 }
0x4ee0   :  { %v5666_v61 = vpop.eup %5665 }
0x4ee1   :  { %4339 = vrot.lane.b32.xlu1 %v5666_v61, %s5895_s22  ;;  %v4474_v61 = vld [vmem:[#allocation14 + $0x10] sm:$0xff] }
0x4ee4   :  { %v5668_v62 = vpop.eup %5667 }
0x4ee5   :  { %v4333_v28 = vadd.f32 1.0, %v5668_v62  ;;  %v4475_v62 = vld [vmem:[#allocation14 + $0x18] sm:$0xff] }
0x4ee7   :  { %5669 = vrcp.f32 %v4333_v28  ;;  %v5373_v28 = vpack.c.bf16 %v4475_v62, %v4474_v61 }
0x4ee9   :  { %5374 = vmatpush3.bf16.msra.mxu0 %v5373_v28 }
0x4ef1   :  { %v5670_v45 = vpop.eup %5669 }
0x4ef2   :  { %v4337_v32 = vmul.f32 %v5670_v45, %v4253_v52 }
0x4f53   :  { %v4340_v16 = vpop.permute.xlu1 %4339 }
0x4f54   :  { %v4342_v34 = vmul.f32 %v5670_v45, %v4340_v16 }
0x4f56   :  { %4344 = vrot.lane.b32.xlu0 %v4342_v34, %s5896_s10 }
0x4fc8   :  { %v4345_v3 = vpop.permute.xlu0 %4344 }
0x4fc9   :  { %v4347_v26 = vadd.f32 %v4345_v3, %v4337_v32 }
0x4fcb   :  { %5671 = vtanh.f32 %v4347_v26  ;;  %v4357_v57 = vmul.f32 %v4347_v26, %v6219_v31 }
0x4fcc   :  { %5673 = vtanh.f32 %v6797_v23  ;;  %v3288_v23 = vmul.f32 %v6768_v37, %v6350_v9 }
0x4fcd   :  { %5675 = vpow2.f32 %v3368_v53 }
0x4fce   :  { %v3290_v38 = vadd.f32 %v3289_v55, %v3288_v23 }
0x4fd5   :  { %v5672_v27 = vpop.eup %5671 }
0x4fd6   :  { %4350 = vrot.lane.b32.xlu1 %v5672_v27, %s5897_s30  ;;  %v5674_v35 = vpop.eup %5673  ;;  %v4561_v27 = vld [vmem:[%s6961_s16 + $0x18] sm:$0xff] }
0x4fd7   :  { %v5676_v59 = vpop.eup %5675 }
0x4fd8   :  { %v3370_v29 = vadd.f32 1.0, %v5676_v59 }
0x4fda   :  { %3376 = vrot.lane.b32.xlu1 %v5674_v35, %s5895_s22  ;;  %5677 = vrcp.f32 %v3370_v29 }
0x4fe4   :  { %v5678_v54 = vpop.eup %5677 }
0x4fe5   :  { %v3374_v36 = vmul.f32 %v5678_v54, %v3290_v38 }
0x5048   :  { %v4351_v60 = vpop.permute.xlu1 %4350 }
0x5049   :  { %v4353_v19 = vmul.f32 %v5670_v45, %v4351_v60 }
0x504b   :  { %v4354_v48 = vmul.f32 %v4353_v19, %v6219_v31  ;;  %v4753_v19 = vld [vmem:[%s6962_s17] ss:$0 sm:$0xff]  ;;  %s6974_s17 = sld [smem:[#allocation24_spill]] }
0x504c   :  { %v3377_v6 = vpop.permute.xlu1 %3376 }
0x504d   :  { %v4356_v15 = vadd.f32 %v4355_v20, %v4354_v48  ;;  %v3379_v30 = vmul.f32 %v5678_v54, %v3377_v6 }
0x504f   :  { %4361 = vrot.lane.b32.xlu0 %v4356_v15, %s5898_s14  ;;  %3381 = vrot.lane.b32.xlu1 %v3379_v30, %s5896_s10  ;;  %v4461_v11 = vmul.f32 %v4356_v15, %v6195_v50  ;;  %v4559_v50 = vld [vmem:[%s6961_s16 + $0x8] sm:$0xff] }
0x50c1   :  { %v4362_v14 = vpop.permute.xlu0 %4361  ;;  %v3382_v21 = vpop.permute.xlu1 %3381 }
0x50c2   :  { %v3384_v51 = vadd.f32 %v3382_v21, %v3374_v36  ;;  %5233 = vmatmul.mubr.msk.f32.vlgmr.msra.gmra.mrb[52].mxu1 %vm323_vm2, %v4362_v14 }
0x50c3   :  { %5254 = vmatprep.mubr.msk.f32.mxu1 %vm5892_vm0, %v5893_v1 }
0x50c4   :  { %5679 = vtanh.f32 %v3384_v51 }
0x50ce   :  { %v5680_v4 = vpop.eup %5679 }
0x50cf   :  { %3387 = vrot.lane.b32.xlu1 %v5680_v4, %s5897_s30 }
0x5141   :  { %v3388_v42 = vpop.permute.xlu1 %3387 }
0x5142   :  { %v3390_v8 = vmul.f32 %v5678_v54, %v3388_v42 }
0x5144   :  { %v3391_v31 = vmul.f32 %v3390_v8, %v6399_v33 }
0x5195   :  { %v4431_v44 = vpop.f32.mrb[52].mxu1 }
0x5196   :  { %v4435_v9 = vadd.f32 %v6662_v40, %v4431_v44  ;;  %v5234_v37 = vpop.f32.mrb[53].mxu1  ;;  %v4358_v40 = vmul.f32 %v4253_v52, %v6217_v25  ;;  %v3392_v25 = vmul.f32 %v6774_v43, %v6401_v22  ;;  %v4558_v43 = vld [vmem:[%s6961_s16] sm:$0xff] }
0x5197   :  { %v5376_v26 = vpack.c.bf16 %v4559_v50, %v4558_v43 }
0x5198   :  { %5681 = vtanh.f32 %v4435_v9  ;;  %v4436_v18 = vsub.f32 0.0, %v4435_v9  ;;  %v4359_v7 = vadd.f32 %v4358_v40, %v4357_v57  ;;  %v3393_v16 = vadd.f32 %v3392_v25, %v3391_v31 }
0x5199   :  { %5377 = vmatpush3.bf16.msra.mxu1 %v5376_v26 }
0x519a   :  { %v4437_v58 = vmul.f32 1.442695, %v4436_v18  ;;  %5378 = vmatprep.subr.bf16.mxu1 %v5891_v0 }
0x519c   :  { %5683 = vpow2.f32 %v4437_v58 }
0x51a2   :  { %v5682_v10 = vpop.eup %5681 }
0x51a3   :  { %4445 = vrot.lane.b32.xlu0 %v5682_v10, %s5895_s22 }
0x51a6   :  { %v5684_v12 = vpop.eup %5683 }
0x51a7   :  { %v4439_v2 = vadd.f32 1.0, %v5684_v12 }
0x51a9   :  { %5685 = vrcp.f32 %v4439_v2 }
0x51b3   :  { %v5686_v46 = vpop.eup %5685 }
0x51b4   :  { %v4443_v39 = vmul.f32 %v5686_v46, %v4359_v7 }
0x5215   :  { %v4446_v1 = vpop.permute.xlu0 %4445 }
0x5216   :  { %v4448_v56 = vmul.f32 %v5686_v46, %v4446_v1 }
0x5218   :  { %4450 = vrot.lane.b32.xlu0 %v4448_v56, %s5896_s10 }
0x528a   :  { %v4451_v24 = vpop.permute.xlu0 %4450 }
0x528b   :  { %v4453_v41 = vadd.f32 %v4451_v24, %v4443_v39 }
0x528d   :  { %5687 = vtanh.f32 %v4453_v41 }
0x5297   :  { %v5688_v45 = vpop.eup %5687 }
0x5298   :  { %4456 = vrot.lane.b32.xlu0 %v5688_v45, %s5897_s30 }
0x529c   :  { %4468 = vrot.lane.b32.xlu0 %v3393_v16, %s5895_s22 }
0x530a   :  { %v4457_v34 = vpop.permute.xlu0 %4456 }
0x530b   :  { %v4459_v63 = vmul.f32 %v5686_v46, %v4457_v34 }
0x530d   :  { %v4460_v52 = vmul.f32 %v4459_v63, %v6193_v49  ;;  %v4560_v49 = vld [vmem:[%s6961_s16 + $0x10] sm:$0xff] }
0x530e   :  { %v4469_v33 = vpop.permute.xlu0 %4468  ;;  %v5379_v35 = vpack.c.bf16 %v4561_v27, %v4560_v49 }
0x530f   :  { %v4462_v32 = vadd.f32 %v4461_v11, %v4460_v52 }
0x5310   :  { %5380 = vmatpush3.bf16.msra.mxu1 %v5379_v35 }
0x5311   :  { %4464 = vrot.lane.b32.xlu1 %v4462_v32, %s5898_s14 }
0x5383   :  { %v4465_v3 = vpop.permute.xlu1 %4464 }
0x5384   :  { %v4471_v22 = vsel %vm323_vm2, %v4465_v3, %v4469_v33 }
0x5385   :  { %5244 = vmatmul.mubr.msk.f32.vlgmr.msra.gmra.mrb[42].mxu0 %vm4483_vm3, %v4471_v22 }
0x5458   :  { %v4553_v53 = vpop.f32.mrb[42].mxu0 }
0x5459   :  { %v4554_v59 = vadd.f32 %v4751_v17, %v4553_v53  ;;  %v5245_v29 = vpop.f32.mrb[43].mxu0 }
0x545b   :  { %5689 = vtanh.f32 %v4554_v59 }
0x5465   :  { %v5690_v60 = vpop.eup %5689 }
0x5466   :  { %5255 = vmatmul.mubr.msk.f32.vlgmr.msra.gmra.mrb[54].mxu1 %vm4483_vm3, %v5690_v60 }
0x5539   :  { %v4638_v20 = vpop.f32.mrb[54].mxu1 }
0x553a   :  { %v4639_v48 = vadd.f32 %v4753_v19, %v4638_v20  ;;  %v5256_v0 = vpop.f32.mrb[55].mxu1 }
0x553c   :  { %v4643_v54 = vsel %vm4642_vm4, %v4639_v48, -inf }
0x553d   :  { %4644 = vmax.xlane.f32.xlu1 %v4643_v54 }
0x55ca   :  { %v4645_v6 = vpop.xlane.xlu1 %4644 }
0x55cb   :  { %v4646_v15 = vsub.f32 %v4639_v48, %v4645_v6 }
0x55cd   :  { %v4647_v30 = vmul.f32 1.442695, %v4646_v15 }
0x55cf   :  { %5691 = vpow2.f32 %v4647_v30 }
0x55d9   :  { %v5692_v23 = vpop.eup %5691 }
0x55da   :  { %v4649_v55 = vsel %vm4642_vm4, %v5692_v23, 0.0 }
0x55db   :  { %4650 = vadd.xlane.f32.xlu0 %v4649_v55 }
0x5668   :  { %v4651_v38 = vpop.xlane.xlu0 %4650 }
0x5669   :  { %5693 = vrcp.f32 %v4651_v38 }
0x5673   :  { %v5694_v36 = vpop.eup %5693 }
0x5674   :  { %v4653_v14 = vmul.f32 %v5694_v36, %v5692_v23 }
0x5676   :  { %4654 = vst.msk [vmem:[%s6974_s17] sm:$0xff] %vm4642_vm4, %v4653_v14 }
0x5677   :  { %4659 = vsyncpa [#allocation4], 1 }
0x5678   :  { %4660 = vsyncpa [#allocation6], 1 }
0x5679   :  { %4661 = vsyncpa [#allocation9], 1 }
0x567a   :  { %4662 = vsyncpa [#allocation12], 1 }
0x567b   :  { %4663 = vsyncpa [#allocation15], 1 }

</bundles_post_ra>
